<compile_context>
chip_gen: v6e
topology: v6e:2x2x1
jax: 0.10.0
libtpu: 0.0.40
codegen_flags: <defaults>
</compile_context>

<pallas_src>
import functools

import jax
import jax.numpy as jnp
from jax import lax
from jax.experimental import pallas as pl
from jax.experimental.pallas import tpu as pltpu


def _round_up(x: int, m: int) -> int:
    return (x + m - 1) // m * m


def _vmem_cap_bytes() -> int:
    """Physical VMEM per TensorCore; conservative fallback if the query fails."""
    try:
        return int(pltpu.get_tpu_info().vmem_capacity_bytes)
    except Exception:
        return 64 * 1024 * 1024          # v7x per-core VMEM (smallest of v5e/v6e/v7x)


def _find_neighbors_kernel(inv_ref, x_ref, o_ref, *, k: int, n_valid: int,
                           h_valid: int):
    """One row block of sessions against the full (resident) session matrix.

    inv_ref: (1, Bp)  reciprocal row norms rsqrt(sum(x*x) + H*1e-6), precomputed
    x_ref:   (Bp, Hp) full zero-padded session matrix (resident across grid steps)
    o_ref:   (tm, Hp) neighbor-aggregated output rows
    """
    Bp = x_ref.shape[0]
    tm = o_ref.shape[0]
    row0 = pl.multiple_of(pl.program_id(0) * tm, tm)

    xf = x_ref[...]                                       # (Bp, Hp), input dtype
    xb = x_ref[pl.ds(row0, tm), :].astype(jnp.float32)    # (tm, Hp) row block
    inv_f = inv_ref[...].astype(jnp.float32)              # (1, Bp)
    eps = jnp.float32(h_valid * 1e-6)

    # Row-block inverse norms (step-local; full-matrix norms come precomputed).
    inv_b = lax.rsqrt(jnp.sum(xb * xb, axis=-1, keepdims=True) + eps)    # (tm,1)

    # Cosine-similarity block: one f32 MXU matmul, then cheap row/col rescales.
    s = lax.dot_general(xb * inv_b, xf.astype(jnp.float32),
                        (((1,), (1,)), ((), ())),
                        preferred_element_type=jnp.float32)              # (tm,Bp)
    s = s * inv_f                                                        # column scale

    # Mask padded columns so they never contribute to softmax / top-k.
    col = lax.broadcasted_iota(jnp.int32, (tm, Bp), 1)
    s = jnp.where(col < n_valid, s, jnp.float32(-1e30))

    # |cos| < 1  =>  exp() needs no row-max stabilisation (saves one XLU reduce);
    # the softmax normalisation 1/Z is folded into the top-k temperature below.
    e = jnp.exp(s)                                        # padded cols -> exactly 0
    recip_z = 1.0 / jnp.sum(e, axis=-1, keepdims=True)    # (tm,1), exact

    # Fused top-k + softmax(top-k) + sparse weight-row build (k static -> unrolls).
    vals = e
    w_row = jnp.zeros_like(e)
    denom = jnp.zeros((tm, 1), jnp.float32)
    e_top = None
    for i in range(k):
        cur_max = jnp.max(vals, axis=-1, keepdims=True)
        is_max = vals >= cur_max
        sel_idx = jnp.min(jnp.where(is_max, col, jnp.int32(Bp)),
                          axis=-1, keepdims=True)         # smallest-index tie-break
        onehot = (col == sel_idx).astype(jnp.float32)
        if i == 0:
            e_top = cur_max                               # largest value (descending)
            wk = jnp.ones((tm, 1), jnp.float32)           # exp(0)
        else:
            # softmax over the top-k of (e / Z), with the max (= e_top / Z) subtracted
            wk = jnp.exp((cur_max - e_top) * recip_z)
        denom = denom + wk
        w_row = w_row + wk * onehot
        if i + 1 < k:
            vals = vals * (1.0 - onehot)                  # exclude; real cols keep e > 0

    w_row = w_row * (1.0 / denom)                         # exact (tm,1) reciprocal

    # Gather + weighted sum == (tm,Bp) @ (Bp,Hp) on the MXU; bf16 operands, f32 acc.
    nb = jnp.dot(w_row.astype(jnp.bfloat16), xf.astype(jnp.bfloat16),
                 preferred_element_type=jnp.float32)
    # Dropout(0.4) is identity in eval mode.
    o_ref[...] = nb.astype(o_ref.dtype)


def find_neighbors(sess_emb: jax.Array, neighbor_n: int = 3, *,
                   tm: int = 256) -> jax.Array:
    """Pallas implementation of FindNeighbors.forward (dropout = identity)."""
    B, H = sess_emb.shape
    k = min(neighbor_n, B)
    Bp = _round_up(B, 128)               # lane-dense columns of all (tm,Bp) temps
    Hp = _round_up(H, 128)               # lane-dense hidden dim / output stores
    tm = min(tm, Bp)
    if Bp % tm:                          # Bp is always a multiple of 128
        tm = 128
    n_blocks = pl.cdiv(B, tm)            # skip trailing all-padding row blocks

    x = jnp.pad(sess_emb, ((0, Bp - B), (0, Hp - H)))
    # Full-matrix inverse norms computed ONCE here (not per grid step).
    xf32 = x.astype(jnp.float32)
    inv = lax.rsqrt(jnp.sum(xf32 * xf32, axis=1) + jnp.float32(H * 1e-6))[None, :]

    kernel = functools.partial(_find_neighbors_kernel, k=k, n_valid=B, h_valid=H)

    # Size-derived VMEM limit (feedback: do not hard-code 32 MiB).
    mib = 1024 * 1024
    itemsize = jnp.dtype(sess_emb.dtype).itemsize
    est = (Bp * Hp * itemsize                # resident session matrix
           + Bp * Hp * (4 + 2)               # in-kernel f32 + bf16 views of it
           + 2 * tm * Hp * (itemsize + 4)    # double-buffered output block + f32 acc
           + 8 * tm * Bp * 4                 # (tm,Bp) f32/i32 temps (s, e, w_row, col, ...)
           + 2 * 8 * Bp * 4)                 # (1,Bp) norm row (sublane-padded, 2 bufs)
    vmem_limit = int(min(max(est + 4 * mib, 32 * mib), 0.8 * _vmem_cap_bytes()))

    def _run(resident_spec: pl.BlockSpec) -> jax.Array:
        return pl.pallas_call(
            kernel,
            out_shape=jax.ShapeDtypeStruct((Bp, Hp), sess_emb.dtype),
            grid=(n_blocks,),
            in_specs=[
                pl.BlockSpec((1, Bp), lambda i: (0, 0)),   # inverse norms (tiny, constant)
                resident_spec,                             # full session matrix (constant)
            ],
            out_specs=pl.BlockSpec((tm, Hp), lambda i: (i, 0)),
            compiler_params=pltpu.CompilerParams(
                dimension_semantics=("parallel",),         # megacore over row blocks
                vmem_limit_bytes=vmem_limit,
            ),
        )(inv, x)

    try:
        # Constant index map => double-buffering the resident matrix is pure VMEM
        # waste; single-buffer it (feedback #3, critical on v7x's 64 MiB VMEM).
        out = _run(pl.BlockSpec((Bp, Hp), lambda i: (0, 0),
                                pipeline_mode=pl.Buffered(1)))
    except Exception:
        # pl.Buffered / BlockSpec.pipeline_mode unsupported on this JAX version:
        # fall back to the known-good default (double-buffered) resident matrix.
        out = _run(pl.BlockSpec((Bp, Hp), lambda i: (0, 0)))
    return out[:B, :H]


def _find_neighbors_ref(sess_emb: jnp.ndarray, neighbor_n: int = 3) -> jnp.ndarray:
    """Pure-JAX reference mirroring the PyTorch forward (eval mode)."""
    x = sess_emb.astype(jnp.float32)
    B, H = x.shape
    k = min(neighbor_n, B)
    fenzi = x @ x.T
    fenmu_l = jnp.sqrt(jnp.sum(x * x + 1e-6, axis=1))[:, None]
    fenmu = fenmu_l @ fenmu_l.T
    cos = jax.nn.softmax(fenzi / fenmu, axis=-1)
    cos_topk, topk_idx = lax.top_k(cos, k)
    cos_topk = jax.nn.softmax(cos_topk, axis=-1)
    sess_topk = x[topk_idx]                              # (B, k, H)
    return jnp.sum(cos_topk[:, :, None] * sess_topk, axis=1).astype(sess_emb.dtype)


if __name__ == "__main__":
    key = jax.random.PRNGKey(0)
    k1, k2, k3 = jax.random.split(key, 3)

    def _check(x, name):
        out = jax.block_until_ready(find_neighbors(x, neighbor_n=3))
        ref = _find_neighbors_ref(x, neighbor_n=3)
        assert out.shape == x.shape
        # Tolerance covers the bf16 operands of the gather matmul (f32 accumulate)
        # and the EUP rsqrt used in the similarity row scaling.
        err = float(jnp.max(jnp.abs(out - ref)))
        assert jnp.allclose(out, ref, atol=2e-2, rtol=2e-2), (
            f"{name}: mismatch vs reference, max|diff|={err}")

    # Small shape consistent with the module (batch of sessions, hidden=32).
    _check(jax.random.normal(k1, (8, 32), dtype=jnp.float32), "small")
    # Non-aligned shape: exercises B/H zero-padding + padded-column masking.
    _check(jax.random.normal(k2, (200, 96), dtype=jnp.float32), "padded")
    # Multi-block grid (tm falls back to 128): exercises the in-kernel dynamic row
    # slice of the resident matrix and the 'parallel' (megacore) grid axis.
    _check(jax.random.normal(k3, (300, 96), dtype=jnp.float32), "multi-block")

    print("KERNEL_OK")
</pallas_src>

<mosaic_0001>
module attributes {stable_mosaic.version = 11 : i64} {
  func.func @_find_neighbors_kernel(%arg0: i32, %arg1: memref<1x128xf32, #tpu.memory_space<vmem>>, %arg2: memref<128x128xf32, #tpu.memory_space<vmem>>, %arg3: memref<128x128xf32, #tpu.memory_space<vmem>>) attributes {dimension_semantics = [#tpu.dimension_semantics<parallel>], iteration_bounds = array<i64: 1>, scalar_prefetch = 0 : i64, scratch_operands = 0 : i64, tpu.core_type = #tpu.core_type<tc>, window_params = [{pipeline_mode = #tpu.pipeline_mode<synchronous>, transform_indices = @transform_0, window_bounds = array<i64: 1, 128>}, {pipeline_mode = #tpu.pipeline_mode<synchronous>, transform_indices = @transform_1, window_bounds = array<i64: 128, 128>}, {transform_indices = @transform_2, window_bounds = array<i64: 128, 128>}]} {
    %c128_i32 = arith.constant 128 : i32
    %0 = arith.muli %arg0, %c128_i32 : i32
    %1 = tpu.assume_multiple %0, 128 : i32
    %c0 = arith.constant 0 : index
    %c0_0 = arith.constant 0 : index
    %2 = vector.load %arg2[%c0, %c0_0] : memref<128x128xf32, #tpu.memory_space<vmem>>, vector<128x128xf32>
    %3 = arith.index_cast %1 : i32 to index
    %c0_1 = arith.constant 0 : index
    %4 = vector.load %arg2[%3, %c0_1] : memref<128x128xf32, #tpu.memory_space<vmem>>, vector<128x128xf32>
    %c0_2 = arith.constant 0 : index
    %c0_3 = arith.constant 0 : index
    %5 = vector.load %arg1[%c0_2, %c0_3] : memref<1x128xf32, #tpu.memory_space<vmem>>, vector<1x128xf32>
    %6 = arith.mulf %4, %4 : vector<128x128xf32>
    %cst = arith.constant dense<0.000000e+00> : vector<128xf32>
    %7 = vector.multi_reduction <add>, %6, %cst [1] : vector<128x128xf32> to vector<128xf32>
    %8 = vector.shape_cast %7 : vector<128xf32> to vector<128x1xf32>
    %cst_4 = arith.constant 3.200000e-05 : f32
    %9 = vector.broadcast %cst_4 : f32 to vector<128x1xf32>
    %10 = arith.addf %8, %9 : vector<128x1xf32>
    %11 = math.rsqrt %10 : vector<128x1xf32>
    %12 = vector.broadcast %11 : vector<128x1xf32> to vector<128x128xf32>
    %13 = arith.mulf %4, %12 : vector<128x128xf32>
    %cst_5 = arith.constant dense<0.000000e+00> : vector<128x128xf32>
    %14 = tpu.matmul %13, %2, %cst_5 {dimension_numbers = #tpu.dot_dimension_numbers<[1], [1], [0], [0], [0, 0, 1, 0], [], []>} : vector<128x128xf32>, vector<128x128xf32>, vector<128x128xf32> -> vector<128x128xf32>
    %15 = vector.broadcast %5 : vector<1x128xf32> to vector<128x128xf32>
    %16 = arith.mulf %14, %15 : vector<128x128xf32>
    %17 = tpu.iota {dimensions = array<i32: 1>} : vector<128x128xi32>
    %c8_i32 = arith.constant 8 : i32
    %18 = vector.broadcast %c8_i32 : i32 to vector<128x128xi32>
    %19 = arith.cmpi slt, %17, %18 : vector<128x128xi32>
    %cst_6 = arith.constant -1.000000e+30 : f32
    %20 = vector.broadcast %cst_6 : f32 to vector<128x128xf32>
    %21 = arith.select %19, %16, %20 : vector<128x128xi1>, vector<128x128xf32>
    %22 = math.exp %21 : vector<128x128xf32>
    %cst_7 = arith.constant dense<0.000000e+00> : vector<128xf32>
    %23 = vector.multi_reduction <add>, %22, %cst_7 [1] : vector<128x128xf32> to vector<128xf32>
    %24 = vector.shape_cast %23 : vector<128xf32> to vector<128x1xf32>
    %cst_8 = arith.constant 1.000000e+00 : f32
    %25 = vector.broadcast %cst_8 : f32 to vector<128x1xf32>
    %26 = arith.divf %25, %24 : vector<128x1xf32>
    %cst_9 = arith.constant 0.000000e+00 : f32
    %27 = vector.broadcast %cst_9 : f32 to vector<128x128xf32>
    %cst_10 = arith.constant 0.000000e+00 : f32
    %28 = vector.broadcast %cst_10 : f32 to vector<128x1xf32>
    %cst_11 = arith.constant dense<0xFF800000> : vector<128xf32>
    %29 = vector.multi_reduction <maximumf>, %22, %cst_11 [1] : vector<128x128xf32> to vector<128xf32>
    %30 = vector.shape_cast %29 : vector<128xf32> to vector<128x1xf32>
    %31 = vector.broadcast %30 : vector<128x1xf32> to vector<128x128xf32>
    %32 = arith.cmpf oge, %22, %31 : vector<128x128xf32>
    %c128_i32_12 = arith.constant 128 : i32
    %33 = vector.broadcast %c128_i32_12 : i32 to vector<128x128xi32>
    %34 = arith.select %32, %17, %33 : vector<128x128xi1>, vector<128x128xi32>
    %cst_13 = arith.constant dense<2147483647> : vector<128xi32>
    %35 = vector.multi_reduction <minsi>, %34, %cst_13 [1] : vector<128x128xi32> to vector<128xi32>
    %36 = vector.shape_cast %35 : vector<128xi32> to vector<128x1xi32>
    %37 = vector.broadcast %36 : vector<128x1xi32> to vector<128x128xi32>
    %38 = arith.cmpi eq, %17, %37 : vector<128x128xi32>
    %39 = arith.extui %38 : vector<128x128xi1> to vector<128x128xi32>
    %40 = arith.sitofp %39 : vector<128x128xi32> to vector<128x128xf32>
    %cst_14 = arith.constant 1.000000e+00 : f32
    %41 = vector.broadcast %cst_14 : f32 to vector<128x1xf32>
    %42 = arith.addf %28, %41 : vector<128x1xf32>
    %43 = vector.broadcast %41 : vector<128x1xf32> to vector<128x128xf32>
    %44 = arith.mulf %43, %40 : vector<128x128xf32>
    %45 = arith.addf %27, %44 : vector<128x128xf32>
    %cst_15 = arith.constant 1.000000e+00 : f32
    %46 = vector.broadcast %cst_15 : f32 to vector<128x128xf32>
    %47 = arith.subf %46, %40 : vector<128x128xf32>
    %48 = arith.mulf %22, %47 : vector<128x128xf32>
    %cst_16 = arith.constant dense<0xFF800000> : vector<128xf32>
    %49 = vector.multi_reduction <maximumf>, %48, %cst_16 [1] : vector<128x128xf32> to vector<128xf32>
    %50 = vector.shape_cast %49 : vector<128xf32> to vector<128x1xf32>
    %51 = vector.broadcast %50 : vector<128x1xf32> to vector<128x128xf32>
    %52 = arith.cmpf oge, %48, %51 : vector<128x128xf32>
    %c128_i32_17 = arith.constant 128 : i32
    %53 = vector.broadcast %c128_i32_17 : i32 to vector<128x128xi32>
    %54 = arith.select %52, %17, %53 : vector<128x128xi1>, vector<128x128xi32>
    %cst_18 = arith.constant dense<2147483647> : vector<128xi32>
    %55 = vector.multi_reduction <minsi>, %54, %cst_18 [1] : vector<128x128xi32> to vector<128xi32>
    %56 = vector.shape_cast %55 : vector<128xi32> to vector<128x1xi32>
    %57 = vector.broadcast %56 : vector<128x1xi32> to vector<128x128xi32>
    %58 = arith.cmpi eq, %17, %57 : vector<128x128xi32>
    %59 = arith.extui %58 : vector<128x128xi1> to vector<128x128xi32>
    %60 = arith.sitofp %59 : vector<128x128xi32> to vector<128x128xf32>
    %61 = arith.subf %50, %30 : vector<128x1xf32>
    %62 = arith.mulf %61, %26 : vector<128x1xf32>
    %63 = math.exp %62 : vector<128x1xf32>
    %64 = arith.addf %42, %63 : vector<128x1xf32>
    %65 = vector.broadcast %63 : vector<128x1xf32> to vector<128x128xf32>
    %66 = arith.mulf %65, %60 : vector<128x128xf32>
    %67 = arith.addf %45, %66 : vector<128x128xf32>
    %cst_19 = arith.constant 1.000000e+00 : f32
    %68 = vector.broadcast %cst_19 : f32 to vector<128x128xf32>
    %69 = arith.subf %68, %60 : vector<128x128xf32>
    %70 = arith.mulf %48, %69 : vector<128x128xf32>
    %cst_20 = arith.constant dense<0xFF800000> : vector<128xf32>
    %71 = vector.multi_reduction <maximumf>, %70, %cst_20 [1] : vector<128x128xf32> to vector<128xf32>
    %72 = vector.shape_cast %71 : vector<128xf32> to vector<128x1xf32>
    %73 = vector.broadcast %72 : vector<128x1xf32> to vector<128x128xf32>
    %74 = arith.cmpf oge, %70, %73 : vector<128x128xf32>
    %c128_i32_21 = arith.constant 128 : i32
    %75 = vector.broadcast %c128_i32_21 : i32 to vector<128x128xi32>
    %76 = arith.select %74, %17, %75 : vector<128x128xi1>, vector<128x128xi32>
    %cst_22 = arith.constant dense<2147483647> : vector<128xi32>
    %77 = vector.multi_reduction <minsi>, %76, %cst_22 [1] : vector<128x128xi32> to vector<128xi32>
    %78 = vector.shape_cast %77 : vector<128xi32> to vector<128x1xi32>
    %79 = vector.broadcast %78 : vector<128x1xi32> to vector<128x128xi32>
    %80 = arith.cmpi eq, %17, %79 : vector<128x128xi32>
    %81 = arith.extui %80 : vector<128x128xi1> to vector<128x128xi32>
    %82 = arith.sitofp %81 : vector<128x128xi32> to vector<128x128xf32>
    %83 = arith.subf %72, %30 : vector<128x1xf32>
    %84 = arith.mulf %83, %26 : vector<128x1xf32>
    %85 = math.exp %84 : vector<128x1xf32>
    %86 = arith.addf %64, %85 : vector<128x1xf32>
    %87 = vector.broadcast %85 : vector<128x1xf32> to vector<128x128xf32>
    %88 = arith.mulf %87, %82 : vector<128x128xf32>
    %89 = arith.addf %67, %88 : vector<128x128xf32>
    %cst_23 = arith.constant 1.000000e+00 : f32
    %90 = vector.broadcast %cst_23 : f32 to vector<128x1xf32>
    %91 = arith.divf %90, %86 : vector<128x1xf32>
    %92 = vector.broadcast %91 : vector<128x1xf32> to vector<128x128xf32>
    %93 = arith.mulf %89, %92 : vector<128x128xf32>
    %94 = arith.truncf %93 : vector<128x128xf32> to vector<128x128xbf16>
    %95 = arith.truncf %2 : vector<128x128xf32> to vector<128x128xbf16>
    %cst_24 = arith.constant dense<0.000000e+00> : vector<128x128xf32>
    %96 = tpu.matmul %94, %95, %cst_24 {dimension_numbers = #tpu.dot_dimension_numbers<[1], [0], [0], [1], [0, 0, 1, 1], [], []>} : vector<128x128xbf16>, vector<128x128xbf16>, vector<128x128xf32> -> vector<128x128xf32>
    %c0_25 = arith.constant 0 : index
    %c0_26 = arith.constant 0 : index
    %97 = vector.load %arg3[%c0_25, %c0_26] : memref<128x128xf32, #tpu.memory_space<vmem>>, vector<128x128xf32>
    tpu.vector_store %arg3[%c0_25, %c0_26], %96 {strides = array<i32>} : memref<128x128xf32, #tpu.memory_space<vmem>>, vector<128x128xf32>,
    return
  }
  func.func @transform_0(%arg0: i32) -> (i32, i32) {
    %c0_i32 = arith.constant 0 : i32
    %c0_i32_0 = arith.constant 0 : i32
    %c0_i32_1 = arith.constant 0 : i32
    return %c0_i32, %c0_i32_0 : i32, i32
  }
  func.func @transform_1(%arg0: i32) -> (i32, i32) {
    %c0_i32 = arith.constant 0 : i32
    %c0_i32_0 = arith.constant 0 : i32
    %c0_i32_1 = arith.constant 0 : i32
    return %c0_i32, %c0_i32_0 : i32, i32
  }
  func.func @transform_2(%arg0: i32) -> (i32, i32) {
    %c0_i32 = arith.constant 0 : i32
    %c0_i32_0 = arith.constant 0 : i32
    return %arg0, %c0_i32 : i32, i32
  }
}

module attributes {stable_mosaic.version = 11 : i64} {
  func.func @_find_neighbors_kernel(%arg0: i32, %arg1: memref<1x128xf32, #tpu.memory_space<vmem>>, %arg2: memref<128x128xf32, #tpu.memory_space<vmem>>, %arg3: memref<128x128xf32, #tpu.memory_space<vmem>>) attributes {dimension_semantics = [#tpu.dimension_semantics<parallel>], iteration_bounds = array<i64: 1>, scalar_prefetch = 0 : i64, scratch_operands = 0 : i64, tpu.core_type = #tpu.core_type<tc>, window_params = [{pipeline_mode = #tpu.pipeline_mode<synchronous>, transform_indices = @transform_0, window_bounds = array<i64: 1, 128>}, {pipeline_mode = #tpu.pipeline_mode<synchronous>, transform_indices = @transform_1, window_bounds = array<i64: 128, 128>}, {transform_indices = @transform_2, window_bounds = array<i64: 128, 128>}]} {
    %c128_i32 = arith.constant 128 : i32
    %0 = arith.muli %arg0, %c128_i32 : i32
    %1 = tpu.assume_multiple %0, 128 : i32
    %c0 = arith.constant 0 : index
    %c0_0 = arith.constant 0 : index
    %2 = vector.load %arg2[%c0, %c0_0] : memref<128x128xf32, #tpu.memory_space<vmem>>, vector<128x128xf32>
    %3 = arith.index_cast %1 : i32 to index
    %c0_1 = arith.constant 0 : index
    %4 = vector.load %arg2[%3, %c0_1] : memref<128x128xf32, #tpu.memory_space<vmem>>, vector<128x128xf32>
    %c0_2 = arith.constant 0 : index
    %c0_3 = arith.constant 0 : index
    %5 = vector.load %arg1[%c0_2, %c0_3] : memref<1x128xf32, #tpu.memory_space<vmem>>, vector<1x128xf32>
    %6 = arith.mulf %4, %4 : vector<128x128xf32>
    %cst = arith.constant dense<0.000000e+00> : vector<128xf32>
    %7 = vector.multi_reduction <add>, %6, %cst [1] : vector<128x128xf32> to vector<128xf32>
    %8 = vector.shape_cast %7 : vector<128xf32> to vector<128x1xf32>
    %cst_4 = arith.constant 3.200000e-05 : f32
    %9 = vector.broadcast %cst_4 : f32 to vector<128x1xf32>
    %10 = arith.addf %8, %9 : vector<128x1xf32>
    %11 = math.rsqrt %10 : vector<128x1xf32>
    %12 = vector.broadcast %11 : vector<128x1xf32> to vector<128x128xf32>
    %13 = arith.mulf %4, %12 : vector<128x128xf32>
    %cst_5 = arith.constant dense<0.000000e+00> : vector<128x128xf32>
    %14 = tpu.matmul %13, %2, %cst_5 {dimension_numbers = #tpu.dot_dimension_numbers<[1], [1], [0], [0], [0, 0, 1, 0], [], []>} : vector<128x128xf32>, vector<128x128xf32>, vector<128x128xf32> -> vector<128x128xf32>
    %15 = vector.broadcast %5 : vector<1x128xf32> to vector<128x128xf32>
    %16 = arith.mulf %14, %15 : vector<128x128xf32>
    %17 = tpu.iota {dimensions = array<i32: 1>} : vector<128x128xi32>
    %c8_i32 = arith.constant 8 : i32
    %18 = vector.broadcast %c8_i32 : i32 to vector<128x128xi32>
    %19 = arith.cmpi slt, %17, %18 : vector<128x128xi32>
    %cst_6 = arith.constant -1.000000e+30 : f32
    %20 = vector.broadcast %cst_6 : f32 to vector<128x128xf32>
    %21 = arith.select %19, %16, %20 : vector<128x128xi1>, vector<128x128xf32>
    %22 = math.exp %21 : vector<128x128xf32>
    %cst_7 = arith.constant dense<0.000000e+00> : vector<128xf32>
    %23 = vector.multi_reduction <add>, %22, %cst_7 [1] : vector<128x128xf32> to vector<128xf32>
    %24 = vector.shape_cast %23 : vector<128xf32> to vector<128x1xf32>
    %cst_8 = arith.constant 1.000000e+00 : f32
    %25 = vector.broadcast %cst_8 : f32 to vector<128x1xf32>
    %26 = arith.divf %25, %24 : vector<128x1xf32>
    %cst_9 = arith.constant 0.000000e+00 : f32
    %27 = vector.broadcast %cst_9 : f32 to vector<128x128xf32>
    %cst_10 = arith.constant 0.000000e+00 : f32
    %28 = vector.broadcast %cst_10 : f32 to vector<128x1xf32>
    %cst_11 = arith.constant dense<0xFF800000> : vector<128xf32>
    %29 = vector.multi_reduction <maximumf>, %22, %cst_11 [1] : vector<128x128xf32> to vector<128xf32>
    %30 = vector.shape_cast %29 : vector<128xf32> to vector<128x1xf32>
    %31 = vector.broadcast %30 : vector<128x1xf32> to vector<128x128xf32>
    %32 = arith.cmpf oge, %22, %31 : vector<128x128xf32>
    %c128_i32_12 = arith.constant 128 : i32
    %33 = vector.broadcast %c128_i32_12 : i32 to vector<128x128xi32>
    %34 = arith.select %32, %17, %33 : vector<128x128xi1>, vector<128x128xi32>
    %cst_13 = arith.constant dense<2147483647> : vector<128xi32>
    %35 = vector.multi_reduction <minsi>, %34, %cst_13 [1] : vector<128x128xi32> to vector<128xi32>
    %36 = vector.shape_cast %35 : vector<128xi32> to vector<128x1xi32>
    %37 = vector.broadcast %36 : vector<128x1xi32> to vector<128x128xi32>
    %38 = arith.cmpi eq, %17, %37 : vector<128x128xi32>
    %39 = arith.extui %38 : vector<128x128xi1> to vector<128x128xi32>
    %40 = arith.sitofp %39 : vector<128x128xi32> to vector<128x128xf32>
    %cst_14 = arith.constant 1.000000e+00 : f32
    %41 = vector.broadcast %cst_14 : f32 to vector<128x1xf32>
    %42 = arith.addf %28, %41 : vector<128x1xf32>
    %43 = vector.broadcast %41 : vector<128x1xf32> to vector<128x128xf32>
    %44 = arith.mulf %43, %40 : vector<128x128xf32>
    %45 = arith.addf %27, %44 : vector<128x128xf32>
    %cst_15 = arith.constant 1.000000e+00 : f32
    %46 = vector.broadcast %cst_15 : f32 to vector<128x128xf32>
    %47 = arith.subf %46, %40 : vector<128x128xf32>
    %48 = arith.mulf %22, %47 : vector<128x128xf32>
    %cst_16 = arith.constant dense<0xFF800000> : vector<128xf32>
    %49 = vector.multi_reduction <maximumf>, %48, %cst_16 [1] : vector<128x128xf32> to vector<128xf32>
    %50 = vector.shape_cast %49 : vector<128xf32> to vector<128x1xf32>
    %51 = vector.broadcast %50 : vector<128x1xf32> to vector<128x128xf32>
    %52 = arith.cmpf oge, %48, %51 : vector<128x128xf32>
    %c128_i32_17 = arith.constant 128 : i32
    %53 = vector.broadcast %c128_i32_17 : i32 to vector<128x128xi32>
    %54 = arith.select %52, %17, %53 : vector<128x128xi1>, vector<128x128xi32>
    %cst_18 = arith.constant dense<2147483647> : vector<128xi32>
    %55 = vector.multi_reduction <minsi>, %54, %cst_18 [1] : vector<128x128xi32> to vector<128xi32>
    %56 = vector.shape_cast %55 : vector<128xi32> to vector<128x1xi32>
    %57 = vector.broadcast %56 : vector<128x1xi32> to vector<128x128xi32>
    %58 = arith.cmpi eq, %17, %57 : vector<128x128xi32>
    %59 = arith.extui %58 : vector<128x128xi1> to vector<128x128xi32>
    %60 = arith.sitofp %59 : vector<128x128xi32> to vector<128x128xf32>
    %61 = arith.subf %50, %30 : vector<128x1xf32>
    %62 = arith.mulf %61, %26 : vector<128x1xf32>
    %63 = math.exp %62 : vector<128x1xf32>
    %64 = arith.addf %42, %63 : vector<128x1xf32>
    %65 = vector.broadcast %63 : vector<128x1xf32> to vector<128x128xf32>
    %66 = arith.mulf %65, %60 : vector<128x128xf32>
    %67 = arith.addf %45, %66 : vector<128x128xf32>
    %cst_19 = arith.constant 1.000000e+00 : f32
    %68 = vector.broadcast %cst_19 : f32 to vector<128x128xf32>
    %69 = arith.subf %68, %60 : vector<128x128xf32>
    %70 = arith.mulf %48, %69 : vector<128x128xf32>
    %cst_20 = arith.constant dense<0xFF800000> : vector<128xf32>
    %71 = vector.multi_reduction <maximumf>, %70, %cst_20 [1] : vector<128x128xf32> to vector<128xf32>
    %72 = vector.shape_cast %71 : vector<128xf32> to vector<128x1xf32>
    %73 = vector.broadcast %72 : vector<128x1xf32> to vector<128x128xf32>
    %74 = arith.cmpf oge, %70, %73 : vector<128x128xf32>
    %c128_i32_21 = arith.constant 128 : i32
    %75 = vector.broadcast %c128_i32_21 : i32 to vector<128x128xi32>
    %76 = arith.select %74, %17, %75 : vector<128x128xi1>, vector<128x128xi32>
    %cst_22 = arith.constant dense<2147483647> : vector<128xi32>
    %77 = vector.multi_reduction <minsi>, %76, %cst_22 [1] : vector<128x128xi32> to vector<128xi32>
    %78 = vector.shape_cast %77 : vector<128xi32> to vector<128x1xi32>
    %79 = vector.broadcast %78 : vector<128x1xi32> to vector<128x128xi32>
    %80 = arith.cmpi eq, %17, %79 : vector<128x128xi32>
    %81 = arith.extui %80 : vector<128x128xi1> to vector<128x128xi32>
    %82 = arith.sitofp %81 : vector<128x128xi32> to vector<128x128xf32>
    %83 = arith.subf %72, %30 : vector<128x1xf32>
    %84 = arith.mulf %83, %26 : vector<128x1xf32>
    %85 = math.exp %84 : vector<128x1xf32>
    %86 = arith.addf %64, %85 : vector<128x1xf32>
    %87 = vector.broadcast %85 : vector<128x1xf32> to vector<128x128xf32>
    %88 = arith.mulf %87, %82 : vector<128x128xf32>
    %89 = arith.addf %67, %88 : vector<128x128xf32>
    %cst_23 = arith.constant 1.000000e+00 : f32
    %90 = vector.broadcast %cst_23 : f32 to vector<128x1xf32>
    %91 = arith.divf %90, %86 : vector<128x1xf32>
    %92 = vector.broadcast %91 : vector<128x1xf32> to vector<128x128xf32>
    %93 = arith.mulf %89, %92 : vector<128x128xf32>
    %94 = arith.truncf %93 : vector<128x128xf32> to vector<128x128xbf16>
    %95 = arith.truncf %2 : vector<128x128xf32> to vector<128x128xbf16>
    %cst_24 = arith.constant dense<0.000000e+00> : vector<128x128xf32>
    %96 = tpu.matmul %94, %95, %cst_24 {dimension_numbers = #tpu.dot_dimension_numbers<[1], [0], [0], [1], [0, 0, 1, 1], [], []>} : vector<128x128xbf16>, vector<128x128xbf16>, vector<128x128xf32> -> vector<128x128xf32>
    %c0_25 = arith.constant 0 : index
    %c0_26 = arith.constant 0 : index
    %97 = vector.load %arg3[%c0_25, %c0_26] : memref<128x128xf32, #tpu.memory_space<vmem>>, vector<128x128xf32>
    tpu.vector_store %arg3[%c0_25, %c0_26], %96 {strides = array<i32>} : memref<128x128xf32, #tpu.memory_space<vmem>>, vector<128x128xf32>,
    return
  }
  func.func @transform_0(%arg0: i32) -> (i32, i32) {
    %c0_i32 = arith.constant 0 : i32
    %c0_i32_0 = arith.constant 0 : i32
    %c0_i32_1 = arith.constant 0 : i32
    return %c0_i32, %c0_i32_0 : i32, i32
  }
  func.func @transform_1(%arg0: i32) -> (i32, i32) {
    %c0_i32 = arith.constant 0 : i32
    %c0_i32_0 = arith.constant 0 : i32
    %c0_i32_1 = arith.constant 0 : i32
    return %c0_i32, %c0_i32_0 : i32, i32
  }
  func.func @transform_2(%arg0: i32) -> (i32, i32) {
    %c0_i32 = arith.constant 0 : i32
    %c0_i32_0 = arith.constant 0 : i32
    return %arg0, %c0_i32 : i32, i32
  }
}

</mosaic_0001>

<bundles_post_ra>
// kernel: tpu_custom_call.1
= control target key start
LH: loop header
LB: loop body
LE: loop exit
PB: predicated region body
PF: predicated region fallthrough
CT: control target
= control target key end

     0   :  { %7 = vsyncpa [#allocation3], 0  ;;  %s4183_s0 = inlined_call_operand.hbm [shape: f32[1,128], index: 0, kind: input, shape index: {}]   ;;  %s4184_s1 = inlined_call_operand.hbm [shape: f32[128,128], index: 1, kind: input, shape index: {}]   ;;  %s4185_s2 = inlined_call_operand.hbm [shape: f32[128,128], index: 2, kind: output, shape index: {}]  }
   0x1   :  { %8 = vsyncpa [#allocation6], 0 }
   0x2   :  { %9 = vsyncpa [#allocation4], 0  ;;  %s2424_s9 = smov [#allocation2]   ;;  %s2425_s11 = smov [#allocation5]  }
   0x3   :  { %s16_s10 = sshll.u32 %s2424_s9, 4  ;;  %s25_s12 = sshll.u32 %s2425_s11, 4  ;;  %s17_s10 = int_to_ptr.vmem [resolvable:$true] %s16_s10  ;;  %s26_s12 = int_to_ptr.vmem [resolvable:$true] %s25_s12 }
   0x4   :  { %s2366_s13 = scalar_lea.vmem %s17_s10, 16  ;;  %s2370_s14 = scalar_lea.vmem %s17_s10, 32 }
   0x5   :  { %p2367_p0 = scmp.ne.s32.totalorder %s17_s10, %s2366_s13  ;;  %p2371_p1 = scmp.lt.s32.totalorder %s17_s10, %s17_s10 }
   0x6   :  { %p2372_p2 = scmp.lt.s32.totalorder %s2370_s14, %s2366_s13 }
   0x8   :  { %p2373_p3 = por %p2372_p2, %p2371_p1 }
   0xa   :  { %p2374_p4 = pnand %p2373_p3, %p2367_p0 }
   0xc   :  { %2377 = shalt.err (!%p2374_p4)
}
   0xd   :  { %19 = dma.hbm_to_vmem [thread:$0]  %s4183_s0, 16, %s17_s10, [#allocation3]  }
   0xe   :  { %s2386_s17 = scalar_lea.vmem %s26_s12, 2048  ;;  %p2391_p6 = scmp.lt.s32.totalorder %s26_s12, %s26_s12 }
   0xf   :  { %p2387_p5 = scmp.ne.s32.totalorder %s26_s12, %s2386_s17  ;;  %p2392_p7 = scmp.lt.s32.totalorder %s2386_s17, %s2386_s17 }
  0x11   :  { %p2393_p8 = por %p2392_p7, %p2391_p6 }
  0x13   :  { %p2394_p9 = pnand %p2393_p8, %p2387_p5 }
  0x15   :  { %2397 = shalt.err (!%p2394_p9)
}
  0x16   :  { %s2426_s18 = smov 128   ;;  %s2427_s19 = smov 8  }
  0x17   :  { %31 = dma.hbm_to_vmem [thread:$0]  %s4184_s1, 2048, %s26_s12, [#allocation6], %s2426_s18, %s2426_s18, %s2427_s19  }
  0x18   :  { %2418 = dma.done.wait [#allocation3], 16  }
  0x19   :  { %2419 = vsyncadd [#allocation3], 4294967280 }
  0x1a   :  { %2420 = dma.done.wait [#allocation6], 2048  }
  0x1b   :  { %2421 = vsyncadd [#allocation6], 4294965248  ;;  %v2454_v0 = vld [vmem:[#allocation5] sm:$0xff]  ;;  %v2456_v1 = vld [vmem:[#allocation5 + $0x10] sm:$0xff]  ;;  %s2429_s0 = smov [#allocation7]  }
  0x1c   :  { %v2458_v2 = vld [vmem:[#allocation5 + $0x8] sm:$0xff]  ;;  %v74_v3 = vmul.f32 %v2454_v0, %v2454_v0  ;;  %v76_v4 = vmul.f32 %v2456_v1, %v2456_v1  ;;  %v2464_v5 = vld [vmem:[#allocation5 + $0x18] sm:$0xff]  ;;  %v2470_v8 = vld [vmem:[#allocation5 + $0x20] sm:$0xff]  ;;  %s1946_s1 = sshll.u32 %s2429_s0, 4  ;;  %s1947_s1 = int_to_ptr.vmem [resolvable:$true] %s1946_s1 }
  0x1d   :  { %v75_v6 = vmul.f32 %v2458_v2, %v2458_v2  ;;  %v77_v7 = vmul.f32 %v2464_v5, %v2464_v5  ;;  %v2472_v9 = vld [vmem:[#allocation5 + $0x28] sm:$0xff]  ;;  %v2474_v10 = vld [vmem:[#allocation5 + $0x78] sm:$0xff]  ;;  %v78_v11 = vmul.f32 %v2470_v8, %v2470_v8  ;;  %v2481_v13 = vld [vmem:[#allocation5 + $0x30] sm:$0xff]  ;;  %s2398_s22 = scalar_lea.vmem %s1947_s1, 2048  ;;  %p2403_p11 = scmp.lt.s32.totalorder %s1947_s1, %s1947_s1 }
  0x1e   :  { %90 = vadd.xlane.f32.xlu0 %v74_v3  ;;  %94 = vadd.xlane.f32.xlu1 %v76_v4  ;;  %v79_v12 = vmul.f32 %v2472_v9, %v2472_v9  ;;  %v2483_v14 = vld [vmem:[#allocation5 + $0x38] sm:$0xff]  ;;  %v2485_v15 = vld [vmem:[#allocation5 + $0x70] sm:$0xff]  ;;  %v80_v16 = vmul.f32 %v2481_v13, %v2481_v13  ;;  %v2493_v18 = vld [vmem:[#allocation5 + $0x40] sm:$0xff]  ;;  %v89_v31 = vmul.f32 %v2474_v10, %v2474_v10  ;;  %p2399_p10 = scmp.ne.s32.totalorder %s1947_s1, %s2398_s22  ;;  %p2404_p12 = scmp.lt.s32.totalorder %s2398_s22, %s2398_s22 }
  0x1f   :  { %2056 = vmatprep.subr.mxu0 %v2474_v10  ;;  %v81_v17 = vmul.f32 %v2483_v14, %v2483_v14  ;;  %v2495_v19 = vld [vmem:[#allocation5 + $0x48] sm:$0xff]  ;;  %v82_v21 = vmul.f32 %v2493_v18, %v2493_v18  ;;  %v2505_v23 = vld [vmem:[#allocation5 + $0x50] sm:$0xff]  ;;  %v2507_v24 = vld [vmem:[#allocation5 + $0x58] sm:$0xff]  ;;  %v88_v30 = vmul.f32 %v2485_v15, %v2485_v15 }
  0x20   :  { %2057 = vmatpush3.xpose.msra.mxu0 %v2474_v10  ;;  %v2497_v20 = vld [vmem:[#allocation5 + $0x68] sm:$0xff]  ;;  %v83_v22 = vmul.f32 %v2495_v19, %v2495_v19  ;;  %v2509_v25 = vld [vmem:[#allocation5 + $0x60] sm:$0xff]  ;;  %v84_v26 = vmul.f32 %v2505_v23, %v2505_v23  ;;  %v85_v27 = vmul.f32 %v2507_v24, %v2507_v24  ;;  %p2405_p13 = por %p2404_p12, %p2403_p11 }
  0x21   :  { %2058 = vmatprep.subr.mxu0 %v2485_v15  ;;  %v86_v28 = vmul.f32 %v2509_v25, %v2509_v25  ;;  %v87_v29 = vmul.f32 %v2497_v20, %v2497_v20 }
  0x22   :  { %92 = vadd.xlane.f32.xlu0 %v75_v6  ;;  %96 = vadd.xlane.f32.xlu1 %v77_v7  ;;  %p2406_p0 = pnand %p2405_p13, %p2399_p10 }
  0x24   :  { %2059 = vmatpush3.xpose.msra.mxu0 %v2485_v15 }
  0x25   :  { %2060 = vmatprep.subr.mxu0 %v2497_v20 }
  0x26   :  { %98 = vadd.xlane.f32.xlu0 %v78_v11  ;;  %100 = vadd.xlane.f32.xlu1 %v79_v12 }
  0x28   :  { %2061 = vmatpush3.xpose.msra.mxu0 %v2497_v20 }
  0x29   :  { %2062 = vmatprep.subr.mxu0 %v2509_v25 }
  0x2a   :  { %102 = vadd.xlane.f32.xlu0 %v80_v16  ;;  %104 = vadd.xlane.f32.xlu1 %v81_v17 }
  0x2c   :  { %2063 = vmatpush3.xpose.msra.mxu0 %v2509_v25 }
  0x2d   :  { %2064 = vmatprep.subr.mxu0 %v2507_v24 }
  0x2e   :  { %106 = vadd.xlane.f32.xlu0 %v82_v21  ;;  %108 = vadd.xlane.f32.xlu1 %v83_v22 }
  0x30   :  { %2065 = vmatpush3.xpose.msra.mxu0 %v2507_v24 }
  0x31   :  { %2066 = vmatprep.subr.mxu0 %v2505_v23 }
  0x32   :  { %110 = vadd.xlane.f32.xlu0 %v84_v26  ;;  %112 = vadd.xlane.f32.xlu1 %v85_v27 }
  0x34   :  { %2067 = vmatpush3.xpose.msra.mxu0 %v2505_v23 }
  0x35   :  { %2068 = vmatprep.subr.mxu0 %v2495_v19 }
  0x36   :  { %114 = vadd.xlane.f32.xlu0 %v86_v28  ;;  %116 = vadd.xlane.f32.xlu1 %v87_v29 }
  0x38   :  { %2069 = vmatpush3.xpose.msra.mxu0 %v2495_v19 }
  0x39   :  { %2070 = vmatprep.subr.mxu0 %v2493_v18 }
  0x3a   :  { %118 = vadd.xlane.f32.xlu0 %v88_v30  ;;  %120 = vadd.xlane.f32.xlu1 %v89_v31 }
  0x3c   :  { %2071 = vmatpush3.xpose.msra.mxu0 %v2493_v18 }
  0x3d   :  { %2072 = vmatprep.subr.mxu0 %v2483_v14 }
  0x40   :  { %2073 = vmatpush3.xpose.msra.mxu0 %v2483_v14 }
  0x41   :  { %2074 = vmatprep.subr.mxu0 %v2481_v13 }
  0x44   :  { %2075 = vmatpush3.xpose.msra.mxu0 %v2481_v13 }
  0x45   :  { %2076 = vmatprep.subr.mxu0 %v2472_v9 }
  0x48   :  { %2077 = vmatpush3.xpose.msra.mxu0 %v2472_v9 }
  0x49   :  { %2078 = vmatprep.subr.mxu0 %v2470_v8 }
  0x4c   :  { %2079 = vmatpush3.xpose.msra.mxu0 %v2470_v8 }
  0x4d   :  { %2080 = vmatprep.subr.mxu0 %v2464_v5 }
  0x50   :  { %2081 = vmatpush3.xpose.msra.mxu0 %v2464_v5 }
  0x51   :  { %2082 = vmatprep.subr.mxu0 %v2456_v1 }
  0x54   :  { %2083 = vmatpush3.xpose.msra.mxu0 %v2456_v1 }
  0x55   :  { %2084 = vmatprep.subr.mxu0 %v2458_v2 }
  0x58   :  { %2085 = vmatpush3.xpose.msra.mxu0 %v2458_v2 }
  0x59   :  { %2086 = vmatprep.subr.mxu0 %v2454_v0 }
  0x5c   :  { %2087 = vmatpush3.xpose.msra.mxu0 %v2454_v0 }
  0xa7   :  { %v91_v32 = vpop.xlane.xlu0 %90  ;;  %v95_v33 = vpop.xlane.xlu1 %94 }
  0xa8   :  { %v122_v34 = vadd.f32 3.2e-05, %v91_v32  ;;  %v124_v35 = vadd.f32 3.2e-05, %v95_v33 }
  0xaa   :  { %2150 = vrsqrt.f32 %v122_v34 }
  0xab   :  { %2152 = vrsqrt.f32 %v124_v35  ;;  %v93_v36 = vpop.xlane.xlu0 %92  ;;  %v97_v37 = vpop.xlane.xlu1 %96 }
  0xac   :  { %v123_v38 = vadd.f32 3.2e-05, %v93_v36  ;;  %v125_v39 = vadd.f32 3.2e-05, %v97_v37 }
  0xae   :  { %2154 = vrsqrt.f32 %v123_v38  ;;  %v2568_v38 = vld [vmem:[#allocation2] ss:$0 sm:$0xff] }
  0xaf   :  { %2156 = vrsqrt.f32 %v125_v39  ;;  %v99_v40 = vpop.xlane.xlu0 %98  ;;  %v101_v41 = vpop.xlane.xlu1 %100 }
  0xb0   :  { %v126_v42 = vadd.f32 3.2e-05, %v99_v40  ;;  %v127_v43 = vadd.f32 3.2e-05, %v101_v41 }
  0xb2   :  { %2158 = vrsqrt.f32 %v126_v42 }
  0xb3   :  { %2160 = vrsqrt.f32 %v127_v43  ;;  %v103_v44 = vpop.xlane.xlu0 %102  ;;  %v105_v45 = vpop.xlane.xlu1 %104 }
  0xb4   :  { %v128_v46 = vadd.f32 3.2e-05, %v103_v44  ;;  %v129_v47 = vadd.f32 3.2e-05, %v105_v45 }
  0xb6   :  { %2162 = vrsqrt.f32 %v128_v46 }
  0xb7   :  { %v2151_v48 = vpop.eup %2150  ;;  %2164 = vrsqrt.f32 %v129_v47  ;;  %v107_v49 = vpop.xlane.xlu0 %106 }
  0xb8   :  { %v109_v50 = vpop.xlane.xlu1 %108  ;;  %v2153_v51 = vpop.eup %2152  ;;  %v154_v52 = vmul.f32 %v2151_v48, %v2454_v0  ;;  %v130_v53 = vadd.f32 3.2e-05, %v107_v49 }
  0xb9   :  { %v131_v54 = vadd.f32 3.2e-05, %v109_v50  ;;  %v156_v58 = vmul.f32 %v2153_v51, %v2456_v1 }
  0xba   :  { %2088 = vmatprep.mubr.f32.mxu0 %v154_v52  ;;  %2166 = vrsqrt.f32 %v130_v53 }
  0xbb   :  { %v2155_v55 = vpop.eup %2154  ;;  %2168 = vrsqrt.f32 %v131_v54  ;;  %v111_v56 = vpop.xlane.xlu0 %110 }
  0xbc   :  { %v113_v57 = vpop.xlane.xlu1 %112  ;;  %v2157_v59 = vpop.eup %2156  ;;  %v132_v60 = vadd.f32 3.2e-05, %v111_v56  ;;  %v155_v61 = vmul.f32 %v2155_v55, %v2458_v2 }
  0xbd   :  { %v133_v62 = vadd.f32 3.2e-05, %v113_v57  ;;  %v157_v63 = vmul.f32 %v2157_v59, %v2464_v5 }
  0xbe   :  { %2170 = vrsqrt.f32 %v132_v60  ;;  %2089 = vmatmul.mubr.f32.vlgmr.msra.gmra.mxu0 %v155_v61 }
  0xbf   :  { %v2159_v0 = vpop.eup %2158  ;;  %2172 = vrsqrt.f32 %v133_v62  ;;  %2091 = vmatprep.mubr.f32.mxu0 %v156_v58  ;;  %v115_v3 = vpop.xlane.xlu0 %114 }
  0xc0   :  { %v117_v4 = vpop.xlane.xlu1 %116  ;;  %v2161_v6 = vpop.eup %2160  ;;  %v134_v7 = vadd.f32 3.2e-05, %v115_v3  ;;  %v158_v12 = vmul.f32 %v2159_v0, %v2470_v8 }
  0xc1   :  { %v135_v11 = vadd.f32 3.2e-05, %v117_v4  ;;  %v159_v1 = vmul.f32 %v2161_v6, %v2472_v9 }
  0xc2   :  { %2174 = vrsqrt.f32 %v134_v7  ;;  %2092 = vmatmul.mubr.f32.gmra.mxu0 %v157_v63 }
  0xc3   :  { %v2163_v2 = vpop.eup %2162  ;;  %2176 = vrsqrt.f32 %v135_v11  ;;  %2094 = vmatprep.mubr.f32.mxu0 %v158_v12  ;;  %v119_v16 = vpop.xlane.xlu0 %118 }
  0xc4   :  { %v121_v17 = vpop.xlane.xlu1 %120  ;;  %v2165_v5 = vpop.eup %2164  ;;  %v136_v21 = vadd.f32 3.2e-05, %v119_v16  ;;  %v160_v26 = vmul.f32 %v2163_v2, %v2481_v13 }
  0xc5   :  { %v137_v22 = vadd.f32 3.2e-05, %v121_v17  ;;  %v161_v27 = vmul.f32 %v2165_v5, %v2483_v14 }
  0xc6   :  { %2178 = vrsqrt.f32 %v136_v21  ;;  %2095 = vmatmul.mubr.f32.gmra.mxu0 %v159_v1 }
  0xc7   :  { %v2167_v28 = vpop.eup %2166  ;;  %2180 = vrsqrt.f32 %v137_v22  ;;  %2097 = vmatprep.mubr.f32.mxu0 %v160_v26 }
  0xc8   :  { %v2169_v8 = vpop.eup %2168  ;;  %v162_v9 = vmul.f32 %v2167_v28, %v2493_v18 }
  0xc9   :  { %v163_v29 = vmul.f32 %v2169_v8, %v2495_v19 }
  0xca   :  { %2098 = vmatmul.mubr.f32.gmra.mxu0 %v161_v27 }
  0xcb   :  { %v2171_v30 = vpop.eup %2170  ;;  %2100 = vmatprep.mubr.f32.mxu0 %v162_v9 }
  0xcc   :  { %v2173_v31 = vpop.eup %2172  ;;  %v164_v32 = vmul.f32 %v2171_v30, %v2505_v23  ;;  %v337_v23 = vlaneseq }
  0xcd   :  { %v165_v13 = vmul.f32 %v2173_v31, %v2507_v24 }
  0xce   :  { %2101 = vmatmul.mubr.f32.gmra.mxu0 %v163_v29  ;;  %v2566_v24 = vand.u32 127, %v337_v23 }
  0xcf   :  { %v2175_v33 = vpop.eup %2174  ;;  %2103 = vmatprep.mubr.f32.mxu0 %v164_v32 }
  0xd0   :  { %v2177_v14 = vpop.eup %2176  ;;  %v166_v34 = vmul.f32 %v2175_v33, %v2509_v25  ;;  %4303 = vst [vmem:[#allocation11_spill] sm:$0xff] %v2566_v24  ;;  %vm339_vm0 = vcmp.lt.s32.totalorder %v2566_v24, 8 }
  0xd1   :  { %v167_v35 = vmul.f32 %v2177_v14, %v2497_v20 }
  0xd2   :  { %2104 = vmatmul.mubr.f32.gmra.mxu0 %v165_v13 }
  0xd3   :  { %v2179_v18 = vpop.eup %2178  ;;  %2106 = vmatprep.mubr.f32.mxu0 %v166_v34 }
  0xd4   :  { %v2181_v36 = vpop.eup %2180  ;;  %v168_v19 = vmul.f32 %v2179_v18, %v2485_v15 }
  0xd5   :  { %v169_v37 = vmul.f32 %v2181_v36, %v2474_v10 }
  0xd6   :  { %2107 = vmatmul.mubr.f32.gmra.mxu0 %v167_v35 }
  0xd7   :  { %2109 = vmatprep.mubr.f32.mxu0 %v168_v19 }
  0xda   :  { %2110 = vmatmul.mubr.f32.gmra.mxu0 %v169_v37 }
 0x17e   :  { %v2090_v39 = vpop.f32.mrf.mxu0 }
 0x17f   :  { %v322_v20 = vmul.f32 %v2090_v39, %v2568_v38 }
 0x180   :  { %v236_v25 = vpop.f32.mrf.mxu0 }
 0x181   :  { %v341_v40 = vsel %vm339_vm0, %v322_v20, -1e+30  ;;  %v321_v15 = vmul.f32 %v2568_v38, %v236_v25 }
 0x182   :  { %v358_v41 = vmul.f32 1.442695, %v341_v40  ;;  %v2093_v10 = vpop.f32.mrf.mxu0 }
 0x183   :  { %v340_v42 = vsel %vm339_vm0, %v321_v15, -1e+30  ;;  %v324_v43 = vmul.f32 %v2093_v10, %v2568_v38 }
 0x184   :  { %2182 = vpow2.f32 %v358_v41  ;;  %v356_v44 = vmul.f32 1.442695, %v340_v42  ;;  %v246_v45 = vpop.f32.mrf.mxu0 }
 0x185   :  { %v343_v46 = vsel %vm339_vm0, %v324_v43, -1e+30  ;;  %v323_v47 = vmul.f32 %v2568_v38, %v246_v45 }
 0x186   :  { %2184 = vpow2.f32 %v356_v44  ;;  %v362_v48 = vmul.f32 1.442695, %v343_v46  ;;  %v2096_v49 = vpop.f32.mrf.mxu0 }
 0x187   :  { %v342_v50 = vsel %vm339_vm0, %v323_v47, -1e+30  ;;  %v326_v51 = vmul.f32 %v2096_v49, %v2568_v38 }
 0x188   :  { %2186 = vpow2.f32 %v362_v48  ;;  %v360_v52 = vmul.f32 1.442695, %v342_v50  ;;  %v256_v53 = vpop.f32.mrf.mxu0 }
 0x189   :  { %v345_v54 = vsel %vm339_vm0, %v326_v51, -1e+30  ;;  %v325_v55 = vmul.f32 %v2568_v38, %v256_v53 }
 0x18a   :  { %2188 = vpow2.f32 %v360_v52  ;;  %v366_v56 = vmul.f32 1.442695, %v345_v54  ;;  %v2099_v57 = vpop.f32.mrf.mxu0 }
 0x18b   :  { %v344_v58 = vsel %vm339_vm0, %v325_v55, -1e+30  ;;  %v328_v59 = vmul.f32 %v2099_v57, %v2568_v38 }
 0x18c   :  { %2190 = vpow2.f32 %v366_v56  ;;  %v364_v60 = vmul.f32 1.442695, %v344_v58  ;;  %v266_v61 = vpop.f32.mrf.mxu0 }
 0x18d   :  { %v347_v62 = vsel %vm339_vm0, %v328_v59, -1e+30  ;;  %v327_v63 = vmul.f32 %v2568_v38, %v266_v61 }
 0x18e   :  { %2192 = vpow2.f32 %v364_v60  ;;  %v370_v0 = vmul.f32 1.442695, %v347_v62  ;;  %v2102_v3 = vpop.f32.mrf.mxu0 }
 0x18f   :  { %v346_v4 = vsel %vm339_vm0, %v327_v63, -1e+30  ;;  %v330_v6 = vmul.f32 %v2102_v3, %v2568_v38 }
 0x190   :  { %2194 = vpow2.f32 %v370_v0  ;;  %v368_v7 = vmul.f32 1.442695, %v346_v4  ;;  %v276_v11 = vpop.f32.mrf.mxu0 }
 0x191   :  { %v2596_v12 = vpop.eup %2182  ;;  %v349_v1 = vsel %vm339_vm0, %v330_v6, -1e+30  ;;  %v329_v2 = vmul.f32 %v2568_v38, %v276_v11 }
 0x192   :  { %2196 = vpow2.f32 %v368_v7  ;;  %v374_v16 = vmul.f32 1.442695, %v349_v1  ;;  %454 = vmax.xlane.f32.xlu1 %v2596_v12  ;;  %v2105_v17 = vpop.f32.mrf.mxu0 }
 0x193   :  { %v2602_v5 = vpop.eup %2184  ;;  %v348_v21 = vsel %vm339_vm0, %v329_v2, -1e+30  ;;  %v332_v22 = vmul.f32 %v2105_v17, %v2568_v38 }
 0x194   :  { %2198 = vpow2.f32 %v374_v16  ;;  %v372_v26 = vmul.f32 1.442695, %v348_v21  ;;  %452 = vmax.xlane.f32.xlu0 %v2602_v5  ;;  %v286_v27 = vpop.f32.mrf.mxu0 }
 0x195   :  { %v2608_v28 = vpop.eup %2186  ;;  %v351_v8 = vsel %vm339_vm0, %v332_v22, -1e+30  ;;  %v331_v9 = vmul.f32 %v2568_v38, %v286_v27 }
 0x196   :  { %2200 = vpow2.f32 %v372_v26  ;;  %v378_v29 = vmul.f32 1.442695, %v351_v8  ;;  %458 = vmax.xlane.f32.xlu1 %v2608_v28  ;;  %v2108_v30 = vpop.f32.mrf.mxu0 }
 0x197   :  { %v2614_v31 = vpop.eup %2188  ;;  %v350_v32 = vsel %vm339_vm0, %v331_v9, -1e+30  ;;  %v334_v13 = vmul.f32 %v2108_v30, %v2568_v38 }
 0x198   :  { %2202 = vpow2.f32 %v378_v29  ;;  %v376_v33 = vmul.f32 1.442695, %v350_v32  ;;  %456 = vmax.xlane.f32.xlu0 %v2614_v31  ;;  %v296_v14 = vpop.f32.mrf.mxu0 }
 0x199   :  { %v2620_v34 = vpop.eup %2190  ;;  %v353_v35 = vsel %vm339_vm0, %v334_v13, -1e+30  ;;  %v333_v18 = vmul.f32 %v2568_v38, %v296_v14 }
 0x19a   :  { %2204 = vpow2.f32 %v376_v33  ;;  %v382_v36 = vmul.f32 1.442695, %v353_v35  ;;  %462 = vmax.xlane.f32.xlu1 %v2620_v34  ;;  %v2111_v19 = vpop.f32.mrf.mxu0 }
 0x19b   :  { %v2626_v37 = vpop.eup %2192  ;;  %v352_v23 = vsel %vm339_vm0, %v333_v18, -1e+30  ;;  %v336_v39 = vmul.f32 %v2111_v19, %v2568_v38 }
 0x19c   :  { %4304 = vst [vmem:[#allocation12_spill] sm:$0xff] %v2626_v37  ;;  %2206 = vpow2.f32 %v382_v36  ;;  %v380_v20 = vmul.f32 1.442695, %v352_v23  ;;  %460 = vmax.xlane.f32.xlu0 %v2626_v37  ;;  %v306_v25 = vpop.f32.mrf.mxu0 }
 0x19d   :  { %v2632_v40 = vpop.eup %2194  ;;  %v355_v15 = vsel %vm339_vm0, %v336_v39, -1e+30  ;;  %v335_v41 = vmul.f32 %v2568_v38, %v306_v25 }
 0x19e   :  { %4305 = vst [vmem:[#allocation13_spill] sm:$0xff] %v2632_v40  ;;  %2208 = vpow2.f32 %v380_v20  ;;  %v386_v10 = vmul.f32 1.442695, %v355_v15  ;;  %466 = vmax.xlane.f32.xlu1 %v2632_v40 }
 0x19f   :  { %v2638_v42 = vpop.eup %2196  ;;  %v354_v43 = vsel %vm339_vm0, %v335_v41, -1e+30 }
 0x1a0   :  { %4306 = vst [vmem:[#allocation14_spill] sm:$0xff] %v2638_v42  ;;  %2210 = vpow2.f32 %v386_v10  ;;  %v384_v44 = vmul.f32 1.442695, %v354_v43  ;;  %464 = vmax.xlane.f32.xlu0 %v2638_v42 }
 0x1a1   :  { %v2643_v45 = vpop.eup %2198 }
 0x1a2   :  { %4307 = vst [vmem:[#allocation15_spill] sm:$0xff] %v2643_v45  ;;  %2212 = vpow2.f32 %v384_v44  ;;  %470 = vmax.xlane.f32.xlu1 %v2643_v45 }
 0x1a3   :  { %v2646_v46 = vpop.eup %2200 }
 0x1a4   :  { %4308 = vst [vmem:[#allocation16_spill] sm:$0xff] %v2646_v46  ;;  %468 = vmax.xlane.f32.xlu0 %v2646_v46 }
 0x1a5   :  { %v2649_v38 = vpop.eup %2202 }
 0x1a6   :  { %4309 = vst [vmem:[#allocation17_spill] sm:$0xff] %v2649_v38  ;;  %474 = vmax.xlane.f32.xlu1 %v2649_v38 }
 0x1a7   :  { %v2652_v47 = vpop.eup %2204 }
 0x1a8   :  { %4310 = vst [vmem:[#allocation18_spill] sm:$0xff] %v2652_v47  ;;  %472 = vmax.xlane.f32.xlu0 %v2652_v47 }
 0x1a9   :  { %v2655_v48 = vpop.eup %2206 }
 0x1aa   :  { %4311 = vst [vmem:[#allocation19_spill] sm:$0xff] %v2655_v48  ;;  %478 = vmax.xlane.f32.xlu1 %v2655_v48 }
 0x1ab   :  { %v2658_v49 = vpop.eup %2208 }
 0x1ac   :  { %4312 = vst [vmem:[#allocation20_spill] sm:$0xff] %v2658_v49  ;;  %476 = vmax.xlane.f32.xlu0 %v2658_v49 }
 0x1ad   :  { %v2661_v50 = vpop.eup %2210 }
 0x1ae   :  { %4313 = vst [vmem:[#allocation21_spill] sm:$0xff] %v2661_v50  ;;  %482 = vmax.xlane.f32.xlu1 %v2661_v50 }
 0x1af   :  { %v2664_v51 = vpop.eup %2212 }
 0x1b0   :  { %4314 = vst [vmem:[#allocation22_spill] sm:$0xff] %v2664_v51  ;;  %480 = vmax.xlane.f32.xlu0 %v2664_v51 }
 0x21b   :  { %v2667_v52 = vpop.xlane.xlu1 %454 }
 0x21c   :  { %4315 = vst [vmem:[#allocation23_spill] sm:$0xff] %v2667_v52  ;;  %vm485_vm1 = vcmp.ge.f32.partialorder %v2596_v12, %v2667_v52 }
 0x21d   :  { %v2671_v53 = vpop.xlane.xlu0 %452  ;;  %v2674_v54 = vsel %vm485_vm1, %v2566_v24, 128 }
 0x21e   :  { %4316 = vst [vmem:[#allocation24_spill] sm:$0xff] %v2671_v53  ;;  %v531_v55 = vshra.s32 %v2674_v54, 16  ;;  %vm484_vm2 = vcmp.ge.f32.partialorder %v2602_v5, %v2671_v53 }
 0x21f   :  { %v2679_v56 = vpop.xlane.xlu1 %458  ;;  %v2682_v57 = vsel %vm484_vm2, %v2566_v24, 128 }
 0x220   :  { %4317 = vst [vmem:[#allocation25_spill] sm:$0xff] %v2679_v56  ;;  %v2684_v58 = vcvt.s32.f32 %v531_v55  ;;  %v517_v59 = vshra.s32 %v2682_v57, 16  ;;  %vm487_vm3 = vcmp.ge.f32.partialorder %v2608_v28, %v2679_v56 }
 0x221   :  { %v2689_v60 = vpop.xlane.xlu0 %456  ;;  %v2692_v61 = vsel %vm487_vm3, %v2566_v24, 128 }
 0x222   :  { %4318 = vst [vmem:[#allocation26_spill] sm:$0xff] %v2689_v60  ;;  %534 = vmin.xlane.f32.xlu1 %v2684_v58  ;;  %v2695_v62 = vcvt.s32.f32 %v517_v59  ;;  %v559_v63 = vshra.s32 %v2692_v61, 16  ;;  %vm486_vm4 = vcmp.ge.f32.partialorder %v2614_v31, %v2689_v60 }
 0x223   :  { %v2700_v0 = vpop.xlane.xlu1 %462  ;;  %v2703_v3 = vsel %vm486_vm4, %v2566_v24, 128 }
 0x224   :  { %4319 = vst [vmem:[#allocation27_spill] sm:$0xff] %v2700_v0  ;;  %520 = vmin.xlane.f32.xlu0 %v2695_v62  ;;  %v2706_v4 = vcvt.s32.f32 %v559_v63  ;;  %v545_v6 = vshra.s32 %v2703_v3, 16  ;;  %vm489_vm5 = vcmp.ge.f32.partialorder %v2620_v34, %v2700_v0 }
 0x225   :  { %v2711_v7 = vpop.xlane.xlu0 %460  ;;  %v2714_v11 = vsel %vm489_vm5, %v2566_v24, 128 }
 0x226   :  { %4320 = vst [vmem:[#allocation28_spill] sm:$0xff] %v2711_v7  ;;  %562 = vmin.xlane.f32.xlu1 %v2706_v4  ;;  %v2717_v1 = vcvt.s32.f32 %v545_v6  ;;  %v587_v2 = vshra.s32 %v2714_v11, 16  ;;  %vm488_vm6 = vcmp.ge.f32.partialorder %v2626_v37, %v2711_v7 }
 0x227   :  { %v2722_v16 = vpop.xlane.xlu1 %466  ;;  %v2725_v17 = vsel %vm488_vm6, %v2566_v24, 128 }
 0x228   :  { %4321 = vst [vmem:[#allocation29_spill] sm:$0xff] %v2722_v16  ;;  %548 = vmin.xlane.f32.xlu0 %v2717_v1  ;;  %v2728_v21 = vcvt.s32.f32 %v587_v2  ;;  %v573_v22 = vshra.s32 %v2725_v17, 16  ;;  %vm491_vm7 = vcmp.ge.f32.partialorder %v2632_v40, %v2722_v16 }
 0x229   :  { %v2733_v26 = vpop.xlane.xlu0 %464  ;;  %v2736_v27 = vsel %vm491_vm7, %v2566_v24, 128 }
 0x22a   :  { %4322 = vst [vmem:[#allocation30_spill] sm:$0xff] %v2733_v26  ;;  %590 = vmin.xlane.f32.xlu1 %v2728_v21  ;;  %v2739_v8 = vcvt.s32.f32 %v573_v22  ;;  %v615_v9 = vshra.s32 %v2736_v27, 16  ;;  %vm490_vm8 = vcmp.ge.f32.partialorder %v2638_v42, %v2733_v26 }
 0x22b   :  { %v2744_v29 = vpop.xlane.xlu1 %470  ;;  %v2747_v30 = vsel %vm490_vm8, %v2566_v24, 128 }
 0x22c   :  { %4323 = vst [vmem:[#allocation31_spill] sm:$0xff] %v2744_v29  ;;  %576 = vmin.xlane.f32.xlu0 %v2739_v8  ;;  %v2750_v32 = vcvt.s32.f32 %v615_v9  ;;  %v601_v13 = vshra.s32 %v2747_v30, 16  ;;  %vm493_vm9 = vcmp.ge.f32.partialorder %v2643_v45, %v2744_v29  ;;  %v558_v29 = vand.u32 65535, %v2692_v61 }
 0x22d   :  { %v2755_v33 = vpop.xlane.xlu0 %468  ;;  %v2758_v14 = vsel %vm493_vm9, %v2566_v24, 128 }
 0x22e   :  { %4324 = vst [vmem:[#allocation32_spill] sm:$0xff] %v2755_v33  ;;  %618 = vmin.xlane.f32.xlu1 %v2750_v32  ;;  %v2761_v35 = vcvt.s32.f32 %v601_v13  ;;  %v643_v18 = vshra.s32 %v2758_v14, 16  ;;  %vm492_vm10 = vcmp.ge.f32.partialorder %v2646_v46, %v2755_v33  ;;  %v560_v7 = vcvt.s32.f32 %v558_v29 }
 0x22f   :  { %v2766_v36 = vpop.xlane.xlu1 %474  ;;  %v2769_v19 = vsel %vm492_vm10, %v2566_v24, 128 }
 0x230   :  { %4325 = vst [vmem:[#allocation33_spill] sm:$0xff] %v2766_v36  ;;  %604 = vmin.xlane.f32.xlu0 %v2761_v35  ;;  %v2772_v23 = vcvt.s32.f32 %v643_v18  ;;  %v629_v39 = vshra.s32 %v2769_v19, 16  ;;  %vm495_vm11 = vcmp.ge.f32.partialorder %v2649_v38, %v2766_v36  ;;  %v516_v36 = vand.u32 65535, %v2682_v57 }
 0x231   :  { %v2777_v20 = vpop.xlane.xlu0 %472  ;;  %v2780_v25 = vsel %vm495_vm11, %v2566_v24, 128 }
 0x232   :  { %4326 = vst [vmem:[#allocation34_spill] sm:$0xff] %v2777_v20  ;;  %646 = vmin.xlane.f32.xlu1 %v2772_v23  ;;  %v2783_v15 = vcvt.s32.f32 %v629_v39  ;;  %v671_v41 = vshra.s32 %v2780_v25, 16  ;;  %vm494_vm12 = vcmp.ge.f32.partialorder %v2652_v47, %v2777_v20  ;;  %v518_v16 = vcvt.s32.f32 %v516_v36 }
 0x233   :  { %v2788_v10 = vpop.xlane.xlu1 %478  ;;  %v2791_v43 = vsel %vm494_vm12, %v2566_v24, 128 }
 0x234   :  { %4327 = vst [vmem:[#allocation35_spill] sm:$0xff] %v2788_v10  ;;  %632 = vmin.xlane.f32.xlu0 %v2783_v15  ;;  %v2794_v44 = vcvt.s32.f32 %v671_v41  ;;  %v657_v55 = vshra.s32 %v2791_v43, 16  ;;  %vm497_vm13 = vcmp.ge.f32.partialorder %v2655_v48, %v2788_v10 }
 0x235   :  { %v2799_v59 = vpop.xlane.xlu0 %476  ;;  %v2802_v63 = vsel %vm497_vm13, %v2566_v24, 128 }
 0x236   :  { %4328 = vst [vmem:[#allocation36_spill] sm:$0xff] %v2799_v59  ;;  %674 = vmin.xlane.f32.xlu1 %v2794_v44  ;;  %v2805_v6 = vcvt.s32.f32 %v657_v55  ;;  %v699_v2 = vshra.s32 %v2802_v63, 16  ;;  %vm496_vm14 = vcmp.ge.f32.partialorder %v2658_v49, %v2799_v59 }
 0x237   :  { %v2810_v22 = vpop.xlane.xlu1 %482  ;;  %v2813_v9 = vsel %vm496_vm14, %v2566_v24, 128 }
 0x238   :  { %4329 = vst [vmem:[#allocation37_spill] sm:$0xff] %v2810_v22  ;;  %660 = vmin.xlane.f32.xlu0 %v2805_v6  ;;  %v2816_v13 = vcvt.s32.f32 %v699_v2  ;;  %v685_v18 = vshra.s32 %v2813_v9, 16  ;;  %vm499_vm15 = vcmp.ge.f32.partialorder %v2661_v50, %v2810_v22 }
 0x239   :  { %v2821_v39 = vpop.xlane.xlu0 %480  ;;  %v2824_v41 = vsel %vm499_vm15, %v2566_v24, 128 }
 0x23a   :  { %4330 = vst [vmem:[#allocation38_spill] sm:$0xff] %v2821_v39  ;;  %702 = vmin.xlane.f32.xlu1 %v2816_v13  ;;  %v2827_v55 = vcvt.s32.f32 %v685_v18  ;;  %v727_v59 = vshra.s32 %v2824_v41, 16  ;;  %vm498_vm0 = vcmp.ge.f32.partialorder %v2664_v51, %v2821_v39  ;;  %v530_v18 = vand.u32 65535, %v2674_v54 }
 0x23b   :  { %v2833_v2 = vsel %vm498_vm0, %v2566_v24, 128 }
 0x23c   :  { %688 = vmin.xlane.f32.xlu0 %v2827_v55  ;;  %v2836_v22 = vcvt.s32.f32 %v727_v59  ;;  %v713_v10 = vshra.s32 %v2833_v2, 16  ;;  %v532_v33 = vcvt.s32.f32 %v530_v18  ;;  %v586_v18 = vand.u32 65535, %v2714_v11 }
 0x23d   :  { %v614_v11 = vand.u32 65535, %v2736_v27  ;;  %v642_v27 = vand.u32 65535, %v2758_v14  ;;  %v670_v14 = vand.u32 65535, %v2780_v25  ;;  %v698_v25 = vand.u32 65535, %v2802_v63 }
 0x23e   :  { %730 = vmin.xlane.f32.xlu1 %v2836_v22  ;;  %v2840_v20 = vcvt.s32.f32 %v713_v10  ;;  %v544_v10 = vand.u32 65535, %v2703_v3  ;;  %v572_v3 = vand.u32 65535, %v2725_v17  ;;  %v600_v17 = vand.u32 65535, %v2747_v30 }
 0x23f   :  { %v628_v30 = vand.u32 65535, %v2769_v19  ;;  %v656_v19 = vand.u32 65535, %v2791_v43  ;;  %v684_v43 = vand.u32 65535, %v2813_v9  ;;  %v726_v63 = vand.u32 65535, %v2824_v41 }
 0x240   :  { %716 = vmin.xlane.f32.xlu0 %v2840_v20  ;;  %v574_v29 = vcvt.s32.f32 %v572_v3  ;;  %v712_v9 = vand.u32 65535, %v2833_v2 }
 0x2ab   :  { %v2845_v39 = vpop.xlane.xlu1 %534 }
 0x2ac   :  { %vm536_vm1 = vcmp.eq.f32.partialorder %v2684_v58, %v2845_v39 }
 0x2ad   :  { %v2850_v59 = vpop.xlane.xlu0 %520  ;;  %v537_v26 = vsel %vm536_vm1, %v532_v33, inf  ;;  %v546_v33 = vcvt.s32.f32 %v544_v10  ;;  %v616_v10 = vcvt.s32.f32 %v614_v11  ;;  %v672_v11 = vcvt.s32.f32 %v670_v14 }
 0x2ae   :  { %538 = vmin.xlane.f32.xlu1 %v537_v26  ;;  %vm522_vm2 = vcmp.eq.f32.partialorder %v2695_v62, %v2850_v59  ;;  %v588_v26 = vcvt.s32.f32 %v586_v18  ;;  %v602_v18 = vcvt.s32.f32 %v600_v17 }
 0x2af   :  { %v2855_v54 = vpop.xlane.xlu1 %562  ;;  %v523_v57 = vsel %vm522_vm2, %v518_v16, inf }
 0x2b0   :  { %524 = vmin.xlane.f32.xlu0 %v523_v57  ;;  %vm564_vm3 = vcmp.eq.f32.partialorder %v2706_v4, %v2855_v54 }
 0x2b1   :  { %v2860_v58 = vpop.xlane.xlu0 %548  ;;  %v565_v61 = vsel %vm564_vm3, %v560_v7, inf }
 0x2b2   :  { %566 = vmin.xlane.f32.xlu1 %v565_v61  ;;  %vm550_vm4 = vcmp.eq.f32.partialorder %v2717_v1, %v2860_v58 }
 0x2b3   :  { %v2865_v62 = vpop.xlane.xlu1 %590  ;;  %v551_v16 = vsel %vm550_vm4, %v546_v33, inf  ;;  %v644_v33 = vcvt.s32.f32 %v642_v27  ;;  %v686_v27 = vcvt.s32.f32 %v684_v43 }
 0x2b4   :  { %552 = vmin.xlane.f32.xlu0 %v551_v16  ;;  %vm592_vm5 = vcmp.eq.f32.partialorder %v2728_v21, %v2865_v62  ;;  %v630_v16 = vcvt.s32.f32 %v628_v30  ;;  %v714_v30 = vcvt.s32.f32 %v712_v9 }
 0x2b5   :  { %v2870_v4 = vpop.xlane.xlu0 %576  ;;  %v593_v7 = vsel %vm592_vm5, %v588_v26, inf }
 0x2b6   :  { %594 = vmin.xlane.f32.xlu1 %v593_v7  ;;  %vm578_vm6 = vcmp.eq.f32.partialorder %v2739_v8, %v2870_v4 }
 0x2b7   :  { %v2875_v1 = vpop.xlane.xlu1 %618  ;;  %v579_v36 = vsel %vm578_vm6, %v574_v29, inf  ;;  %v658_v29 = vcvt.s32.f32 %v656_v19 }
 0x2b8   :  { %580 = vmin.xlane.f32.xlu0 %v579_v36  ;;  %vm620_vm7 = vcmp.eq.f32.partialorder %v2750_v32, %v2875_v1  ;;  %v700_v36 = vcvt.s32.f32 %v698_v25  ;;  %v625_v9 = vcvt.f32.s32 %v2875_v1 }
 0x2b9   :  { %v2880_v21 = vpop.xlane.xlu0 %604  ;;  %v621_v57 = vsel %vm620_vm7, %v616_v10, inf }
 0x2ba   :  { %622 = vmin.xlane.f32.xlu1 %v621_v57  ;;  %vm606_vm8 = vcmp.eq.f32.partialorder %v2761_v35, %v2880_v21 }
 0x2bb   :  { %v2885_v8 = vpop.xlane.xlu1 %646  ;;  %v607_v61 = vsel %vm606_vm8, %v602_v18, inf  ;;  %v728_v18 = vcvt.s32.f32 %v726_v63 }
 0x2bc   :  { %608 = vmin.xlane.f32.xlu0 %v607_v61  ;;  %vm648_vm9 = vcmp.eq.f32.partialorder %v2772_v23, %v2885_v8  ;;  %v527_v61 = vcvt.f32.s32 %v2850_v59 }
 0x2bd   :  { %v2890_v32 = vpop.xlane.xlu0 %632  ;;  %v649_v3 = vsel %vm648_vm9, %v644_v33, inf }
 0x2be   :  { %650 = vmin.xlane.f32.xlu1 %v649_v3  ;;  %vm634_vm10 = vcmp.eq.f32.partialorder %v2783_v15, %v2890_v32  ;;  %v569_v3 = vcvt.f32.s32 %v2855_v54 }
 0x2bf   :  { %v2895_v35 = vpop.xlane.xlu1 %674  ;;  %v635_v26 = vsel %vm634_vm10, %v630_v16, inf }
 0x2c0   :  { %636 = vmin.xlane.f32.xlu0 %v635_v26  ;;  %vm676_vm11 = vcmp.eq.f32.partialorder %v2794_v44, %v2895_v35  ;;  %v528_v26 = vshll.u32 %v527_v61, 16 }
 0x2c1   :  { %v2900_v23 = vpop.xlane.xlu0 %660  ;;  %v677_v7 = vsel %vm676_vm11, %v672_v11, inf }
 0x2c2   :  { %678 = vmin.xlane.f32.xlu1 %v677_v7  ;;  %vm662_vm12 = vcmp.eq.f32.partialorder %v2805_v6, %v2900_v23  ;;  %v597_v7 = vcvt.f32.s32 %v2865_v62 }
 0x2c3   :  { %v2905_v15 = vpop.xlane.xlu1 %702  ;;  %v663_v17 = vsel %vm662_vm12, %v658_v29, inf  ;;  %v570_v29 = vshll.u32 %v569_v3, 16 }
 0x2c4   :  { %664 = vmin.xlane.f32.xlu0 %v663_v17  ;;  %vm704_vm13 = vcmp.eq.f32.partialorder %v2816_v13, %v2905_v15  ;;  %v583_v17 = vcvt.f32.s32 %v2870_v4 }
 0x2c5   :  { %v2910_v44 = vpop.xlane.xlu0 %688  ;;  %v705_v10 = vsel %vm704_vm13, %v700_v36, inf  ;;  %v4208_v36 = vmov 0.0  }
 0x2c6   :  { %706 = vmin.xlane.f32.xlu1 %v705_v10  ;;  %vm690_vm14 = vcmp.eq.f32.partialorder %v2827_v55, %v2910_v44  ;;  %v541_v55 = vcvt.f32.s32 %v2845_v39 }
 0x2c7   :  { %v2915_v6 = vpop.xlane.xlu1 %730  ;;  %v691_v57 = vsel %vm690_vm14, %v686_v27, inf  ;;  %v598_v27 = vshll.u32 %v597_v7, 16 }
 0x2c8   :  { %692 = vmin.xlane.f32.xlu0 %v691_v57  ;;  %vm732_vm15 = vcmp.eq.f32.partialorder %v2836_v22, %v2915_v6  ;;  %v542_v14 = vshll.u32 %v541_v55, 16  ;;  %v555_v22 = vcvt.f32.s32 %v2860_v58  ;;  %v611_v55 = vcvt.f32.s32 %v2880_v21 }
 0x2c9   :  { %v2919_v41 = vpop.xlane.xlu0 %716  ;;  %v733_v13 = vsel %vm732_vm15, %v728_v18, inf }
 0x2ca   :  { %734 = vmin.xlane.f32.xlu1 %v733_v13  ;;  %vm718_vm0 = vcmp.eq.f32.partialorder %v2840_v20, %v2919_v41  ;;  %v556_v59 = vshll.u32 %v555_v22, 16  ;;  %v626_v22 = vshll.u32 %v625_v9, 16 }
 0x2cb   :  { %v719_v2 = vsel %vm718_vm0, %v714_v30, inf }
 0x2cc   :  { %720 = vmin.xlane.f32.xlu0 %v719_v2  ;;  %v584_v2 = vshll.u32 %v583_v17, 16 }
 0x337   :  { %v539_v33 = vpop.xlane.xlu1 %538 }
 0x338   :  { %v540_v16 = vcvt.f32.s32 %v539_v33 }
 0x339   :  { %v525_v19 = vpop.xlane.xlu0 %524 }
 0x33a   :  { %v543_v11 = vadd.s32 %v542_v14, %v540_v16  ;;  %v526_v25 = vcvt.f32.s32 %v525_v19  ;;  %v653_v19 = vcvt.f32.s32 %v2885_v8 }
 0x33b   :  { %v567_v20 = vpop.xlane.xlu1 %566 }
 0x33c   :  { %vm741_vm1 = vcmp.eq.s32.totalorder %v2566_v24, %v543_v11  ;;  %v529_v39 = vadd.s32 %v528_v26, %v526_v25  ;;  %v568_v43 = vcvt.f32.s32 %v567_v20 }
 0x33d   :  { %v2931_v54 = vsel %vm741_vm1, 1.0, %v4208_v36  ;;  %v553_v58 = vpop.xlane.xlu0 %552 }
 0x33e   :  { %4331 = vst [vmem:[#allocation39_spill] sm:$0xff] %v2931_v54  ;;  %vm740_vm2 = vcmp.eq.s32.totalorder %v2566_v24, %v529_v39  ;;  %v571_v63 = vadd.s32 %v570_v29, %v568_v43  ;;  %v554_v10 = vcvt.f32.s32 %v553_v58  ;;  %v805_v62 = vsub.f32 1.0, %v2931_v54 }
 0x33f   :  { %v2937_v57 = vsel %vm740_vm2, 1.0, %v4208_v36  ;;  %v595_v18 = vpop.xlane.xlu1 %594  ;;  %v612_v29 = vshll.u32 %v611_v55, 16  ;;  %v639_v39 = vcvt.f32.s32 %v2890_v32  ;;  %v667_v55 = vcvt.f32.s32 %v2900_v23 }
 0x340   :  { %4332 = vst [vmem:[#allocation40_spill] sm:$0xff] %v2937_v57  ;;  %vm743_vm3 = vcmp.eq.s32.totalorder %v2566_v24, %v571_v63  ;;  %v557_v4 = vadd.s32 %v556_v59, %v554_v10  ;;  %v596_v13 = vcvt.f32.s32 %v595_v18  ;;  %v2941_v30 = vmul.f32 %v2596_v12, %v805_v62 }
 0x341   :  { %v2945_v61 = vsel %vm743_vm3, 1.0, %v4208_v36  ;;  %v581_v33 = vpop.xlane.xlu0 %580  ;;  %v804_v1 = vsub.f32 1.0, %v2937_v57  ;;  %v654_v10 = vshll.u32 %v653_v19, 16  ;;  %v681_v62 = vcvt.f32.s32 %v2895_v35 }
 0x342   :  { %4333 = vst [vmem:[#allocation41_spill] sm:$0xff] %v2945_v61  ;;  %vm742_vm4 = vcmp.eq.s32.totalorder %v2566_v24, %v557_v4  ;;  %v599_v14 = vadd.s32 %v598_v27, %v596_v13  ;;  %v582_v3 = vcvt.f32.s32 %v581_v33  ;;  %838 = vmax.xlane.f32.xlu1 %v2941_v30  ;;  %v807_v16 = vsub.f32 1.0, %v2945_v61 }
 0x343   :  { %v2953_v26 = vsel %vm742_vm4, 1.0, %v4208_v36  ;;  %v623_v21 = vpop.xlane.xlu1 %622  ;;  %v2956_v11 = vmul.f32 %v2602_v5, %v804_v1  ;;  %v709_v19 = vcvt.f32.s32 %v2905_v15 }
 0x344   :  { %4334 = vst [vmem:[#allocation42_spill] sm:$0xff] %v2953_v26  ;;  %vm745_vm5 = vcmp.eq.s32.totalorder %v2566_v24, %v599_v14  ;;  %v585_v25 = vadd.s32 %v584_v2, %v582_v3  ;;  %v624_v7 = vcvt.f32.s32 %v623_v21  ;;  %v2960_v20 = vmul.f32 %v2608_v28, %v807_v16 }
 0x345   :  { %v2964_v43 = vsel %vm745_vm5, 1.0, %v4208_v36  ;;  %836 = vmax.xlane.f32.xlu0 %v2956_v11  ;;  %v609_v8 = vpop.xlane.xlu0 %608  ;;  %v806_v59 = vsub.f32 1.0, %v2953_v26  ;;  %v640_v2 = vshll.u32 %v639_v39, 16 }
 0x346   :  { %4335 = vst [vmem:[#allocation43_spill] sm:$0xff] %v2964_v43  ;;  %vm744_vm6 = vcmp.eq.s32.totalorder %v2566_v24, %v585_v25  ;;  %v627_v17 = vadd.s32 %v626_v22, %v624_v7  ;;  %v610_v58 = vcvt.f32.s32 %v609_v8  ;;  %842 = vmax.xlane.f32.xlu1 %v2960_v20  ;;  %v809_v63 = vsub.f32 1.0, %v2964_v43 }
 0x347   :  { %v2973_v32 = vsel %vm744_vm6, 1.0, %v4208_v36  ;;  %v651_v27 = vpop.xlane.xlu1 %650  ;;  %v2976_v9 = vmul.f32 %v2614_v31, %v806_v59  ;;  %v682_v22 = vshll.u32 %v681_v62, 16  ;;  %v668_v8 = vshll.u32 %v667_v55, 16 }
 0x348   :  { %4336 = vst [vmem:[#allocation44_spill] sm:$0xff] %v2973_v32  ;;  %vm747_vm7 = vcmp.eq.s32.totalorder %v2566_v24, %v627_v17  ;;  %v613_v18 = vadd.s32 %v612_v29, %v610_v58  ;;  %v652_v4 = vcvt.f32.s32 %v651_v27  ;;  %v2980_v13 = vmul.f32 %v2620_v34, %v809_v63 }
 0x349   :  { %v2984_v33 = vsel %vm747_vm7, 1.0, %v4208_v36  ;;  %840 = vmax.xlane.f32.xlu0 %v2976_v9  ;;  %v637_v35 = vpop.xlane.xlu0 %636  ;;  %v808_v1 = vsub.f32 1.0, %v2973_v32  ;;  %v695_v59 = vcvt.f32.s32 %v2910_v44  ;;  %v710_v27 = vshll.u32 %v709_v19, 16 }
 0x34a   :  { %4337 = vst [vmem:[#allocation45_spill] sm:$0xff] %v2984_v33  ;;  %vm746_vm8 = vcmp.eq.s32.totalorder %v2566_v24, %v613_v18  ;;  %v655_v14 = vadd.s32 %v654_v10, %v652_v4  ;;  %v638_v3 = vcvt.f32.s32 %v637_v35  ;;  %846 = vmax.xlane.f32.xlu1 %v2980_v13  ;;  %v811_v16 = vsub.f32 1.0, %v2984_v33 }
 0x34b   :  { %v2993_v23 = vsel %vm746_vm8, 1.0, %v4208_v36  ;;  %v679_v21 = vpop.xlane.xlu1 %678  ;;  %v2996_v25 = vmul.f32 %v2626_v37, %v808_v1  ;;  %v737_v18 = vcvt.f32.s32 %v2915_v6 }
 0x34c   :  { %4338 = vst [vmem:[#allocation46_spill] sm:$0xff] %v2993_v23  ;;  %vm749_vm9 = vcmp.eq.s32.totalorder %v2566_v24, %v655_v14  ;;  %v641_v7 = vadd.s32 %v640_v2, %v638_v3  ;;  %v680_v29 = vcvt.f32.s32 %v679_v21  ;;  %v3000_v39 = vmul.f32 %v2632_v40, %v811_v16 }
 0x34d   :  { %v3004_v17 = vsel %vm749_vm9, 1.0, %v4208_v36  ;;  %844 = vmax.xlane.f32.xlu0 %v2996_v25  ;;  %v665_v15 = vpop.xlane.xlu0 %664  ;;  %v810_v58 = vsub.f32 1.0, %v2993_v23  ;;  %v696_v14 = vshll.u32 %v695_v59, 16  ;;  %v723_v3 = vcvt.f32.s32 %v2919_v41 }
 0x34e   :  { %4339 = vst [vmem:[#allocation47_spill] sm:$0xff] %v3004_v17  ;;  %vm748_vm10 = vcmp.eq.s32.totalorder %v2566_v24, %v641_v7  ;;  %v683_v63 = vadd.s32 %v682_v22, %v680_v29  ;;  %v666_v10 = vcvt.f32.s32 %v665_v15  ;;  %850 = vmax.xlane.f32.xlu1 %v3000_v39  ;;  %v813_v62 = vsub.f32 1.0, %v3004_v17 }
 0x34f   :  { %v3013_v44 = vsel %vm748_vm10, 1.0, %v4208_v36  ;;  %v707_v4 = vpop.xlane.xlu1 %706  ;;  %v3016_v2 = vmul.f32 %v2638_v42, %v810_v58  ;;  %v738_v29 = vshll.u32 %v737_v18, 16 }
 0x350   :  { %4340 = vst [vmem:[#allocation48_spill] sm:$0xff] %v3013_v44  ;;  %vm751_vm11 = vcmp.eq.s32.totalorder %v2566_v24, %v683_v63  ;;  %v669_v55 = vadd.s32 %v668_v8, %v666_v10  ;;  %v708_v35 = vcvt.f32.s32 %v707_v4  ;;  %v3020_v1 = vmul.f32 %v2643_v45, %v813_v62 }
 0x351   :  { %v3024_v16 = vsel %vm751_vm11, 1.0, %v4208_v36  ;;  %848 = vmax.xlane.f32.xlu0 %v3016_v2  ;;  %v693_v6 = vpop.xlane.xlu0 %692  ;;  %v812_v22 = vsub.f32 1.0, %v3013_v44  ;;  %v724_v10 = vshll.u32 %v723_v3, 16 }
 0x352   :  { %4341 = vst [vmem:[#allocation49_spill] sm:$0xff] %v3024_v16  ;;  %vm750_vm12 = vcmp.eq.s32.totalorder %v2566_v24, %v669_v55  ;;  %v711_v19 = vadd.s32 %v710_v27, %v708_v35  ;;  %v694_v21 = vcvt.f32.s32 %v693_v6  ;;  %854 = vmax.xlane.f32.xlu1 %v3020_v1  ;;  %v815_v7 = vsub.f32 1.0, %v3024_v16 }
 0x353   :  { %v3032_v8 = vsel %vm750_vm12, 1.0, %v4208_v36  ;;  %v735_v41 = vpop.xlane.xlu1 %734  ;;  %v3035_v59 = vmul.f32 %v2646_v46, %v812_v22 }
 0x354   :  { %4342 = vst [vmem:[#allocation50_spill] sm:$0xff] %v3032_v8  ;;  %vm753_vm13 = vcmp.eq.s32.totalorder %v2566_v24, %v711_v19  ;;  %v697_v15 = vadd.s32 %v696_v14, %v694_v21  ;;  %v736_v58 = vcvt.f32.s32 %v735_v41  ;;  %v3039_v63 = vmul.f32 %v2649_v38, %v815_v7 }
 0x355   :  { %v3042_v62 = vsel %vm753_vm13, 1.0, %v4208_v36  ;;  %852 = vmax.xlane.f32.xlu0 %v3035_v59  ;;  %v721_v27 = vpop.xlane.xlu0 %720  ;;  %v814_v18 = vsub.f32 1.0, %v3032_v8 }
 0x356   :  { %4343 = vst [vmem:[#allocation51_spill] sm:$0xff] %v3042_v62  ;;  %vm752_vm14 = vcmp.eq.s32.totalorder %v2566_v24, %v697_v15  ;;  %v739_v4 = vadd.s32 %v738_v29, %v736_v58  ;;  %v722_v55 = vcvt.f32.s32 %v721_v27  ;;  %858 = vmax.xlane.f32.xlu1 %v3039_v63  ;;  %v817_v35 = vsub.f32 1.0, %v3042_v62 }
 0x357   :  { %v3050_v14 = vsel %vm752_vm14, 1.0, %v4208_v36  ;;  %v3053_v3 = vmul.f32 %v2652_v47, %v814_v18 }
 0x358   :  { %4344 = vst [vmem:[#allocation52_spill] sm:$0xff] %v3050_v14  ;;  %vm755_vm15 = vcmp.eq.s32.totalorder %v2566_v24, %v739_v4  ;;  %v725_v6 = vadd.s32 %v724_v10, %v722_v55  ;;  %v3057_v22 = vmul.f32 %v2655_v48, %v817_v35  ;;  %v816_v19 = vsub.f32 1.0, %v3050_v14 }
 0x359   :  { %v3061_v21 = vsel %vm755_vm15, 1.0, %v4208_v36  ;;  %856 = vmax.xlane.f32.xlu0 %v3053_v3 }
 0x35a   :  { %4345 = vst [vmem:[#allocation53_spill] sm:$0xff] %v3061_v21  ;;  %vm754_vm0 = vcmp.eq.s32.totalorder %v2566_v24, %v725_v6  ;;  %862 = vmax.xlane.f32.xlu1 %v3057_v22  ;;  %v3067_v7 = vmul.f32 %v2658_v49, %v816_v19  ;;  %v819_v29 = vsub.f32 1.0, %v3061_v21 }
 0x35b   :  { %v3071_v41 = vsel %vm754_vm0, 1.0, %v4208_v36 }
 0x35c   :  { %4346 = vst [vmem:[#allocation54_spill] sm:$0xff] %v3071_v41  ;;  %v3074_v15 = vmul.f32 %v2661_v50, %v819_v29  ;;  %v818_v58 = vsub.f32 1.0, %v3071_v41 }
 0x35d   :  { %860 = vmax.xlane.f32.xlu0 %v3067_v7 }
 0x35e   :  { %866 = vmax.xlane.f32.xlu1 %v3074_v15  ;;  %v3080_v10 = vmul.f32 %v2664_v51, %v818_v58 }
 0x361   :  { %864 = vmax.xlane.f32.xlu0 %v3080_v10 }
 0x3cb   :  { %v3083_v27 = vpop.xlane.xlu1 %838 }
 0x3cc   :  { %4347 = vst [vmem:[#allocation55_spill] sm:$0xff] %v3083_v27  ;;  %vm869_vm1 = vcmp.ge.f32.partialorder %v2941_v30, %v3083_v27 }
 0x3cd   :  { %v3088_v18 = vsel %vm869_vm1, %v2566_v24, 128 }
 0x3ce   :  { %v3090_v4 = vpop.xlane.xlu0 %836  ;;  %v915_v55 = vshra.s32 %v3088_v18, 16  ;;  %v914_v38 = vand.u32 65535, %v3088_v18 }
 0x3cf   :  { %4348 = vst [vmem:[#allocation56_spill] sm:$0xff] %v3090_v4  ;;  %vm868_vm2 = vcmp.ge.f32.partialorder %v2956_v11, %v3090_v4  ;;  %v3095_v35 = vpop.xlane.xlu1 %842 }
 0x3d0   :  { %4349 = vst [vmem:[#allocation57_spill] sm:$0xff] %v3095_v35  ;;  %vm871_vm3 = vcmp.ge.f32.partialorder %v2960_v20, %v3095_v35  ;;  %v3099_v6 = vcvt.s32.f32 %v915_v55  ;;  %v3102_v19 = vsel %vm868_vm2, %v2566_v24, 128 }
 0x3d1   :  { %v901_v29 = vshra.s32 %v3102_v19, 16  ;;  %v3106_v58 = vsel %vm871_vm3, %v2566_v24, 128 }
 0x3d2   :  { %v3108_v36 = vpop.xlane.xlu0 %840  ;;  %918 = vmin.xlane.f32.xlu1 %v3099_v6  ;;  %v943_v41 = vshra.s32 %v3106_v58, 16 }
 0x3d3   :  { %4350 = vst [vmem:[#allocation58_spill] sm:$0xff] %v3108_v36  ;;  %vm870_vm4 = vcmp.ge.f32.partialorder %v2976_v9, %v3108_v36  ;;  %v3114_v21 = vpop.xlane.xlu1 %846  ;;  %v3116_v55 = vcvt.s32.f32 %v901_v29 }
 0x3d4   :  { %4351 = vst [vmem:[#allocation59_spill] sm:$0xff] %v3114_v21  ;;  %vm873_vm5 = vcmp.ge.f32.partialorder %v2980_v13, %v3114_v21  ;;  %v3120_v14 = vcvt.s32.f32 %v943_v41  ;;  %v3123_v62 = vsel %vm870_vm4, %v2566_v24, 128 }
 0x3d5   :  { %904 = vmin.xlane.f32.xlu0 %v3116_v55  ;;  %v929_v8 = vshra.s32 %v3123_v62, 16  ;;  %v3128_v16 = vsel %vm873_vm5, %v2566_v24, 128  ;;  %v928_v42 = vand.u32 65535, %v3123_v62 }
 0x3d6   :  { %v3130_v44 = vpop.xlane.xlu0 %844  ;;  %946 = vmin.xlane.f32.xlu1 %v3120_v14  ;;  %v971_v29 = vshra.s32 %v3128_v16, 16  ;;  %v970_v37 = vand.u32 65535, %v3128_v16 }
 0x3d7   :  { %4352 = vst [vmem:[#allocation60_spill] sm:$0xff] %v3130_v44  ;;  %vm872_vm6 = vcmp.ge.f32.partialorder %v2996_v25, %v3130_v44  ;;  %v3136_v41 = vpop.xlane.xlu1 %850  ;;  %v3138_v17 = vcvt.s32.f32 %v929_v8 }
 0x3d8   :  { %4353 = vst [vmem:[#allocation61_spill] sm:$0xff] %v3136_v41  ;;  %vm875_vm7 = vcmp.ge.f32.partialorder %v3000_v39, %v3136_v41  ;;  %v3142_v23 = vcvt.s32.f32 %v971_v29  ;;  %v3145_v33 = vsel %vm872_vm6, %v2566_v24, 128 }
 0x3d9   :  { %932 = vmin.xlane.f32.xlu0 %v3138_v17  ;;  %v957_v32 = vshra.s32 %v3145_v33, 16  ;;  %v3150_v43 = vsel %vm875_vm7, %v2566_v24, 128  ;;  %v956_v62 = vand.u32 65535, %v3145_v33 }
 0x3da   :  { %v3152_v26 = vpop.xlane.xlu0 %848  ;;  %974 = vmin.xlane.f32.xlu1 %v3142_v23  ;;  %v999_v8 = vshra.s32 %v3150_v43, 16  ;;  %v998_v16 = vand.u32 65535, %v3150_v43 }
 0x3db   :  { %4354 = vst [vmem:[#allocation62_spill] sm:$0xff] %v3152_v26  ;;  %vm874_vm8 = vcmp.ge.f32.partialorder %v3016_v2, %v3152_v26  ;;  %v3158_v29 = vpop.xlane.xlu1 %854  ;;  %v3160_v61 = vcvt.s32.f32 %v957_v32 }
 0x3dc   :  { %4355 = vst [vmem:[#allocation63_spill] sm:$0xff] %v3158_v29  ;;  %vm877_vm9 = vcmp.ge.f32.partialorder %v3020_v1, %v3158_v29  ;;  %v3164_v57 = vcvt.s32.f32 %v999_v8  ;;  %v3167_v54 = vsel %vm874_vm8, %v2566_v24, 128 }
 0x3dd   :  { %960 = vmin.xlane.f32.xlu0 %v3160_v61  ;;  %v985_v41 = vshra.s32 %v3167_v54, 16  ;;  %v3172_v44 = vsel %vm877_vm9, %v2566_v24, 128  ;;  %v984_v33 = vand.u32 65535, %v3167_v54 }
 0x3de   :  { %v3174_v26 = vpop.xlane.xlu0 %852  ;;  %1002 = vmin.xlane.f32.xlu1 %v3164_v57  ;;  %v1027_v32 = vshra.s32 %v3172_v44, 16  ;;  %v1026_v43 = vand.u32 65535, %v3172_v44 }
 0x3df   :  { %4356 = vst [vmem:[#allocation64_spill] sm:$0xff] %v3174_v26  ;;  %vm876_vm10 = vcmp.ge.f32.partialorder %v3035_v59, %v3174_v26  ;;  %v3180_v8 = vpop.xlane.xlu1 %858  ;;  %v3182_v29 = vcvt.s32.f32 %v985_v41 }
 0x3e0   :  { %4357 = vst [vmem:[#allocation65_spill] sm:$0xff] %v3180_v8  ;;  %vm879_vm11 = vcmp.ge.f32.partialorder %v3039_v63, %v3180_v8  ;;  %v3186_v21 = vcvt.s32.f32 %v1027_v32  ;;  %v3189_v0 = vsel %vm876_vm10, %v2566_v24, 128 }
 0x3e1   :  { %988 = vmin.xlane.f32.xlu0 %v3182_v29  ;;  %v1013_v36 = vshra.s32 %v3189_v0, 16  ;;  %v3194_v60 = vsel %vm879_vm11, %v2566_v24, 128  ;;  %v1012_v54 = vand.u32 65535, %v3189_v0 }
 0x3e2   :  { %v3196_v26 = vpop.xlane.xlu0 %856  ;;  %1030 = vmin.xlane.f32.xlu1 %v3186_v21  ;;  %v1055_v41 = vshra.s32 %v3194_v60, 16  ;;  %v1054_v44 = vand.u32 65535, %v3194_v60 }
 0x3e3   :  { %4358 = vst [vmem:[#allocation66_spill] sm:$0xff] %v3196_v26  ;;  %vm878_vm12 = vcmp.ge.f32.partialorder %v3053_v3, %v3196_v26  ;;  %v3202_v32 = vpop.xlane.xlu1 %862  ;;  %v3204_v8 = vcvt.s32.f32 %v1013_v36 }
 0x3e4   :  { %4359 = vst [vmem:[#allocation67_spill] sm:$0xff] %v3202_v32  ;;  %vm881_vm13 = vcmp.ge.f32.partialorder %v3057_v22, %v3202_v32  ;;  %v3208_v35 = vcvt.s32.f32 %v1055_v41  ;;  %v3211_v56 = vsel %vm878_vm12, %v2566_v24, 128 }
 0x3e5   :  { %1016 = vmin.xlane.f32.xlu0 %v3204_v8  ;;  %v1041_v4 = vshra.s32 %v3211_v56, 16  ;;  %v3216_v53 = vsel %vm881_vm13, %v2566_v24, 128  ;;  %v1040_v0 = vand.u32 65535, %v3211_v56 }
 0x3e6   :  { %v3218_v26 = vpop.xlane.xlu0 %860  ;;  %1058 = vmin.xlane.f32.xlu1 %v3208_v35  ;;  %v1083_v36 = vshra.s32 %v3216_v53, 16  ;;  %v1082_v60 = vand.u32 65535, %v3216_v53 }
 0x3e7   :  { %4360 = vst [vmem:[#allocation68_spill] sm:$0xff] %v3218_v26  ;;  %vm880_vm14 = vcmp.ge.f32.partialorder %v3067_v7, %v3218_v26  ;;  %v3224_v41 = vpop.xlane.xlu1 %866  ;;  %v3226_v32 = vcvt.s32.f32 %v1041_v4 }
 0x3e8   :  { %4361 = vst [vmem:[#allocation69_spill] sm:$0xff] %v3224_v41  ;;  %vm883_vm15 = vcmp.ge.f32.partialorder %v3074_v15, %v3224_v41  ;;  %v3230_v27 = vcvt.s32.f32 %v1083_v36  ;;  %v3233_v52 = vsel %vm880_vm14, %v2566_v24, 128 }
 0x3e9   :  { %v3236_v51 = vsel %vm883_vm15, %v2566_v24, 128  ;;  %1044 = vmin.xlane.f32.xlu0 %v3226_v32  ;;  %v1069_v50 = vshra.s32 %v3233_v52, 16  ;;  %v1068_v56 = vand.u32 65535, %v3233_v52 }
 0x3ea   :  { %v3240_v26 = vpop.xlane.xlu0 %864  ;;  %1086 = vmin.xlane.f32.xlu1 %v3230_v27  ;;  %v1111_v4 = vshra.s32 %v3236_v51, 16  ;;  %v1110_v53 = vand.u32 65535, %v3236_v51 }
 0x3eb   :  { %4362 = vst [vmem:[#allocation70_spill] sm:$0xff] %v3240_v26  ;;  %vm882_vm0 = vcmp.ge.f32.partialorder %v3080_v10, %v3240_v26  ;;  %v3246_v36 = vcvt.s32.f32 %v1069_v50  ;;  %v900_v50 = vand.u32 65535, %v3102_v19  ;;  %v942_v26 = vand.u32 65535, %v3106_v58 }
 0x3ec   :  { %v3249_v41 = vsel %vm882_vm0, %v2566_v24, 128  ;;  %v3251_v49 = vcvt.s32.f32 %v1111_v4  ;;  %v916_v4 = vcvt.s32.f32 %v914_v38 }
 0x3ed   :  { %1072 = vmin.xlane.f32.xlu0 %v3246_v36  ;;  %v1097_v48 = vshra.s32 %v3249_v41, 16  ;;  %v944_v19 = vcvt.s32.f32 %v942_v26  ;;  %v972_v26 = vcvt.s32.f32 %v970_v37  ;;  %v1000_v37 = vcvt.s32.f32 %v998_v16 }
 0x3ee   :  { %1114 = vmin.xlane.f32.xlu1 %v3251_v49  ;;  %v1014_v16 = vcvt.s32.f32 %v1012_v54  ;;  %v1096_v52 = vand.u32 65535, %v3249_v41 }
 0x3ef   :  { %v3256_v47 = vcvt.s32.f32 %v1097_v48  ;;  %v902_v48 = vcvt.s32.f32 %v900_v50 }
 0x3f0   :  { %v1098_v41 = vcvt.s32.f32 %v1096_v52 }
 0x3f1   :  { %1100 = vmin.xlane.f32.xlu0 %v3256_v47 }
 0x45b   :  { %v3262_v46 = vpop.xlane.xlu1 %918 }
 0x45c   :  { %vm920_vm1 = vcmp.eq.f32.partialorder %v3099_v6, %v3262_v46 }
 0x45d   :  { %v921_v45 = vsel %vm920_vm1, %v916_v4, inf }
 0x45e   :  { %v3267_v40 = vpop.xlane.xlu0 %904  ;;  %922 = vmin.xlane.f32.xlu1 %v921_v45  ;;  %v930_v45 = vcvt.s32.f32 %v928_v42  ;;  %v958_v42 = vcvt.s32.f32 %v956_v62 }
 0x45f   :  { %v3270_v18 = vpop.xlane.xlu1 %946  ;;  %vm906_vm2 = vcmp.eq.f32.partialorder %v3116_v55, %v3267_v40 }
 0x460   :  { %vm948_vm3 = vcmp.eq.f32.partialorder %v3120_v14, %v3270_v18  ;;  %v907_v38 = vsel %vm906_vm2, %v902_v48, inf }
 0x461   :  { %908 = vmin.xlane.f32.xlu0 %v907_v38  ;;  %v949_v6 = vsel %vm948_vm3, %v944_v19, inf  ;;  %v986_v38 = vcvt.s32.f32 %v984_v33  ;;  %v1042_v33 = vcvt.s32.f32 %v1040_v0 }
 0x462   :  { %v3277_v58 = vpop.xlane.xlu0 %932  ;;  %950 = vmin.xlane.f32.xlu1 %v949_v6  ;;  %v1028_v6 = vcvt.s32.f32 %v1026_v43 }
 0x463   :  { %vm934_vm4 = vcmp.eq.f32.partialorder %v3138_v17, %v3277_v58  ;;  %v3282_v50 = vpop.xlane.xlu1 %974 }
 0x464   :  { %vm976_vm5 = vcmp.eq.f32.partialorder %v3142_v23, %v3282_v50  ;;  %v935_v14 = vsel %vm934_vm4, %v930_v45, inf }
 0x465   :  { %936 = vmin.xlane.f32.xlu0 %v935_v14  ;;  %v977_v55 = vsel %vm976_vm5, %v972_v26, inf  ;;  %v1056_v26 = vcvt.s32.f32 %v1054_v44  ;;  %v911_v44 = vcvt.f32.s32 %v3267_v40 }
 0x466   :  { %v3287_v4 = vpop.xlane.xlu0 %960  ;;  %978 = vmin.xlane.f32.xlu1 %v977_v55 }
 0x467   :  { %vm962_vm6 = vcmp.eq.f32.partialorder %v3160_v61, %v3287_v4  ;;  %v3292_v17 = vpop.xlane.xlu1 %1002 }
 0x468   :  { %vm1004_vm7 = vcmp.eq.f32.partialorder %v3164_v57, %v3292_v17  ;;  %v963_v23 = vsel %vm962_vm6, %v958_v42, inf  ;;  %v1084_v42 = vcvt.s32.f32 %v1082_v60  ;;  %v912_v60 = vshll.u32 %v911_v44, 16 }
 0x469   :  { %964 = vmin.xlane.f32.xlu0 %v963_v23  ;;  %v1005_v48 = vsel %vm1004_vm7, %v1000_v37, inf  ;;  %v1070_v23 = vcvt.s32.f32 %v1068_v56 }
 0x46a   :  { %v3297_v19 = vpop.xlane.xlu0 %988  ;;  %1006 = vmin.xlane.f32.xlu1 %v1005_v48 }
 0x46b   :  { %vm990_vm8 = vcmp.eq.f32.partialorder %v3182_v29, %v3297_v19  ;;  %v3302_v61 = vpop.xlane.xlu1 %1030 }
 0x46c   :  { %vm1032_vm9 = vcmp.eq.f32.partialorder %v3186_v21, %v3302_v61  ;;  %v991_v57 = vsel %vm990_vm8, %v986_v38, inf }
 0x46d   :  { %992 = vmin.xlane.f32.xlu0 %v991_v57  ;;  %v1033_v62 = vsel %vm1032_vm9, %v1028_v6, inf }
 0x46e   :  { %v3307_v45 = vpop.xlane.xlu0 %1016  ;;  %1034 = vmin.xlane.f32.xlu1 %v1033_v62 }
 0x46f   :  { %vm1018_vm10 = vcmp.eq.f32.partialorder %v3204_v8, %v3307_v45  ;;  %v3312_v29 = vpop.xlane.xlu1 %1058 }
 0x470   :  { %vm1060_vm11 = vcmp.eq.f32.partialorder %v3208_v35, %v3312_v29  ;;  %v1019_v21 = vsel %vm1018_vm10, %v1014_v16, inf }
 0x471   :  { %1020 = vmin.xlane.f32.xlu0 %v1019_v21  ;;  %v1061_v14 = vsel %vm1060_vm11, %v1056_v26, inf  ;;  %v939_v26 = vcvt.f32.s32 %v3277_v58  ;;  %v981_v21 = vcvt.f32.s32 %v3282_v50 }
 0x472   :  { %v3317_v55 = vpop.xlane.xlu0 %1044  ;;  %1062 = vmin.xlane.f32.xlu1 %v1061_v14 }
 0x473   :  { %vm1046_vm12 = vcmp.eq.f32.partialorder %v3226_v32, %v3317_v55  ;;  %v3322_v8 = vpop.xlane.xlu1 %1086  ;;  %v1112_v32 = vcvt.s32.f32 %v1110_v53  ;;  %v940_v52 = vshll.u32 %v939_v26, 16  ;;  %v982_v50 = vshll.u32 %v981_v21, 16 }
 0x474   :  { %vm1088_vm13 = vcmp.eq.f32.partialorder %v3230_v27, %v3322_v8  ;;  %v1047_v35 = vsel %vm1046_vm12, %v1042_v33, inf  ;;  %v4363_v33 = vmov 0.0  }
 0x475   :  { %1048 = vmin.xlane.f32.xlu0 %v1047_v35  ;;  %v1089_v43 = vsel %vm1088_vm13, %v1084_v42, inf  ;;  %v1009_v42 = vcvt.f32.s32 %v3292_v17  ;;  %v995_v17 = vcvt.f32.s32 %v3297_v19 }
 0x476   :  { %v3327_v37 = vpop.xlane.xlu0 %1072  ;;  %1090 = vmin.xlane.f32.xlu1 %v1089_v43 }
 0x477   :  { %vm1074_vm14 = vcmp.eq.f32.partialorder %v3246_v36, %v3327_v37  ;;  %v3331_v51 = vpop.xlane.xlu1 %1114  ;;  %v925_v36 = vcvt.f32.s32 %v3262_v46 }
 0x478   :  { %vm1116_vm15 = vcmp.eq.f32.partialorder %v3251_v49, %v3331_v51  ;;  %v1075_v48 = vsel %vm1074_vm14, %v1070_v23, inf  ;;  %v953_v49 = vcvt.f32.s32 %v3270_v18  ;;  %v967_v18 = vcvt.f32.s32 %v3287_v4 }
 0x479   :  { %1076 = vmin.xlane.f32.xlu0 %v1075_v48  ;;  %v1117_v27 = vsel %vm1116_vm15, %v1112_v32, inf  ;;  %v926_v57 = vshll.u32 %v925_v36, 16 }
 0x47a   :  { %v3335_v54 = vpop.xlane.xlu0 %1100  ;;  %1118 = vmin.xlane.f32.xlu1 %v1117_v27  ;;  %v954_v56 = vshll.u32 %v953_v49, 16  ;;  %v968_v44 = vshll.u32 %v967_v18, 16 }
 0x47b   :  { %vm1102_vm0 = vcmp.eq.f32.partialorder %v3256_v47, %v3335_v54 }
 0x47c   :  { %v1103_v38 = vsel %vm1102_vm0, %v1098_v41, inf }
 0x47d   :  { %1104 = vmin.xlane.f32.xlu0 %v1103_v38 }
 0x4e7   :  { %v923_v6 = vpop.xlane.xlu1 %922 }
 0x4e8   :  { %v924_v62 = vcvt.f32.s32 %v923_v6  ;;  %v1010_v6 = vshll.u32 %v1009_v42, 16 }
 0x4ea   :  { %v927_v0 = vadd.s32 %v926_v57, %v924_v62  ;;  %v909_v16 = vpop.xlane.xlu0 %908 }
 0x4eb   :  { %v910_v14 = vcvt.f32.s32 %v909_v16  ;;  %v951_v47 = vpop.xlane.xlu1 %950 }
 0x4ec   :  { %vm1125_vm1 = vcmp.eq.s32.totalorder %v2566_v24, %v927_v0  ;;  %v952_v46 = vcvt.f32.s32 %v951_v47  ;;  %v1037_v0 = vcvt.f32.s32 %v3302_v61 }
 0x4ed   :  { %v3346_v40 = vsel %vm1125_vm1, 1.0, %v4363_v33  ;;  %v913_v53 = vadd.s32 %v912_v60, %v910_v14  ;;  %v996_v14 = vshll.u32 %v995_v17, 16 }
 0x4ee   :  { %4364 = vst [vmem:[#allocation71_spill] sm:$0xff] %v3346_v40  ;;  %v955_v35 = vadd.s32 %v954_v56, %v952_v46  ;;  %v937_v43 = vpop.xlane.xlu0 %936  ;;  %v1285_v58 = vsub.f32 1.0, %v3346_v40  ;;  %v1065_v46 = vcvt.f32.s32 %v3312_v29  ;;  %v1038_v42 = vshll.u32 %v1037_v0, 16 }
 0x4ef   :  { %vm1124_vm2 = vcmp.eq.s32.totalorder %v2566_v24, %v913_v53  ;;  %v938_v23 = vcvt.f32.s32 %v937_v43  ;;  %v979_v32 = vpop.xlane.xlu1 %978 }
 0x4f0   :  { %v3353_v48 = vsel %vm1124_vm2, 1.0, %v4363_v33  ;;  %vm1127_vm3 = vcmp.eq.s32.totalorder %v2566_v24, %v955_v35  ;;  %v980_v27 = vcvt.f32.s32 %v979_v32  ;;  %v3357_v4 = vmul.f32 %v1285_v58, %v2941_v30 }
 0x4f1   :  { %4365 = vst [vmem:[#allocation72_spill] sm:$0xff] %v3353_v48  ;;  %v3361_v41 = vsel %vm1127_vm3, 1.0, %v4363_v33  ;;  %v941_v38 = vadd.s32 %v940_v52, %v938_v23  ;;  %v1284_v36 = vsub.f32 1.0, %v3353_v48  ;;  %v1066_v17 = vshll.u32 %v1065_v46, 16 }
 0x4f2   :  { %4366 = vst [vmem:[#allocation73_spill] sm:$0xff] %v3361_v41  ;;  %v983_v57 = vadd.s32 %v982_v50, %v980_v27  ;;  %v965_v49 = vpop.xlane.xlu0 %964  ;;  %1318 = vmax.xlane.f32.xlu1 %v3357_v4  ;;  %v1287_v62 = vsub.f32 1.0, %v3361_v41  ;;  %v1051_v50 = vcvt.f32.s32 %v3317_v55  ;;  %v4418_v41 = vld [vmem:[#allocation32_spill] sm:$0xff] }
 0x4f3   :  { %vm1126_vm4 = vcmp.eq.s32.totalorder %v2566_v24, %v941_v38  ;;  %v966_v30 = vcvt.f32.s32 %v965_v49  ;;  %v1007_v19 = vpop.xlane.xlu1 %1006  ;;  %v3369_v16 = vmul.f32 %v1284_v36, %v2956_v11  ;;  %v1023_v11 = vcvt.f32.s32 %v3307_v45 }
 0x4f4   :  { %v3372_v60 = vsel %vm1126_vm4, 1.0, %v4363_v33  ;;  %vm1129_vm5 = vcmp.eq.s32.totalorder %v2566_v24, %v983_v57  ;;  %v1008_v26 = vcvt.f32.s32 %v1007_v19  ;;  %v3376_v21 = vmul.f32 %v1287_v62, %v2960_v20 }
 0x4f5   :  { %4367 = vst [vmem:[#allocation74_spill] sm:$0xff] %v3372_v60  ;;  %v3379_v47 = vsel %vm1129_vm5, 1.0, %v4363_v33  ;;  %v969_v61 = vadd.s32 %v968_v44, %v966_v30  ;;  %1316 = vmax.xlane.f32.xlu0 %v3369_v16  ;;  %v1286_v56 = vsub.f32 1.0, %v3372_v60  ;;  %v1024_v27 = vshll.u32 %v1023_v11, 16  ;;  %v2345_v60 = vld [vmem:[#allocation5 + $0x60] sm:$0xff] }
 0x4f6   :  { %4368 = vst [vmem:[#allocation75_spill] sm:$0xff] %v3379_v47  ;;  %v1011_v53 = vadd.s32 %v1010_v6, %v1008_v26  ;;  %v993_v18 = vpop.xlane.xlu0 %992  ;;  %1322 = vmax.xlane.f32.xlu1 %v3376_v21  ;;  %v1289_v20 = vsub.f32 1.0, %v3379_v47  ;;  %v1052_v30 = vshll.u32 %v1051_v50, 16 }
 0x4f7   :  { %vm1128_vm6 = vcmp.eq.s32.totalorder %v2566_v24, %v969_v61  ;;  %v994_v35 = vcvt.f32.s32 %v993_v18  ;;  %v1035_v43 = vpop.xlane.xlu1 %1034  ;;  %v3389_v58 = vmul.f32 %v1286_v56, %v2976_v9 }
 0x4f8   :  { %v3392_v52 = vsel %vm1128_vm6, 1.0, %v4363_v33  ;;  %vm1131_vm7 = vcmp.eq.s32.totalorder %v2566_v24, %v1011_v53  ;;  %v1036_v45 = vcvt.f32.s32 %v1035_v43  ;;  %v3396_v29 = vmul.f32 %v1289_v20, %v2980_v13 }
 0x4f9   :  { %4369 = vst [vmem:[#allocation76_spill] sm:$0xff] %v3392_v52  ;;  %v3400_v23 = vsel %vm1131_vm7, 1.0, %v4363_v33  ;;  %v997_v32 = vadd.s32 %v996_v14, %v994_v35  ;;  %1320 = vmax.xlane.f32.xlu0 %v3389_v58  ;;  %v1288_v9 = vsub.f32 1.0, %v3392_v52  ;;  %v1093_v13 = vcvt.f32.s32 %v3322_v8  ;;  %v4385_v52 = vld [vmem:[#allocation17_spill] sm:$0xff] }
 0x4fa   :  { %4370 = vst [vmem:[#allocation77_spill] sm:$0xff] %v3400_v23  ;;  %v1039_v38 = vadd.s32 %v1038_v42, %v1036_v45  ;;  %v1021_v36 = vpop.xlane.xlu0 %1020  ;;  %1326 = vmax.xlane.f32.xlu1 %v3396_v29  ;;  %v1291_v44 = vsub.f32 1.0, %v3400_v23  ;;  %v1121_v14 = vcvt.f32.s32 %v3331_v51 }
 0x4fb   :  { %vm1130_vm8 = vcmp.eq.s32.totalorder %v2566_v24, %v997_v32  ;;  %v1022_v55 = vcvt.f32.s32 %v1021_v36  ;;  %v1063_v6 = vpop.xlane.xlu1 %1062  ;;  %v3409_v57 = vmul.f32 %v1288_v9, %v2996_v25  ;;  %v1079_v25 = vcvt.f32.s32 %v3327_v37 }
 0x4fc   :  { %v3412_v49 = vsel %vm1130_vm8, 1.0, %v4363_v33  ;;  %vm1133_vm9 = vcmp.eq.s32.totalorder %v2566_v24, %v1039_v38  ;;  %v1064_v62 = vcvt.f32.s32 %v1063_v6  ;;  %v3416_v0 = vmul.f32 %v1291_v44, %v3000_v39 }
 0x4fd   :  { %4371 = vst [vmem:[#allocation78_spill] sm:$0xff] %v3412_v49  ;;  %v3419_v19 = vsel %vm1133_vm9, 1.0, %v4363_v33  ;;  %v1025_v8 = vadd.s32 %v1024_v27, %v1022_v55  ;;  %1324 = vmax.xlane.f32.xlu0 %v3409_v57  ;;  %v1290_v26 = vsub.f32 1.0, %v3412_v49  ;;  %v1094_v11 = vshll.u32 %v1093_v13, 16 }
 0x4fe   :  { %4372 = vst [vmem:[#allocation79_spill] sm:$0xff] %v3419_v19  ;;  %v1067_v61 = vadd.s32 %v1066_v17, %v1064_v62  ;;  %v1049_v56 = vpop.xlane.xlu0 %1048  ;;  %1330 = vmax.xlane.f32.xlu1 %v3416_v0  ;;  %v1293_v39 = vsub.f32 1.0, %v3419_v19  ;;  %v1080_v45 = vshll.u32 %v1079_v25, 16  ;;  %v1107_v27 = vcvt.f32.s32 %v3335_v54 }
 0x4ff   :  { %vm1132_vm10 = vcmp.eq.s32.totalorder %v2566_v24, %v1025_v8  ;;  %v1050_v46 = vcvt.f32.s32 %v1049_v56  ;;  %v1091_v53 = vpop.xlane.xlu1 %1090  ;;  %v3429_v18 = vmul.f32 %v1290_v26, %v3016_v2  ;;  %v1122_v2 = vshll.u32 %v1121_v14, 16 }
 0x500   :  { %v3432_v20 = vsel %vm1132_vm10, 1.0, %v4363_v33  ;;  %vm1135_vm11 = vcmp.eq.s32.totalorder %v2566_v24, %v1067_v61  ;;  %v1092_v37 = vcvt.f32.s32 %v1091_v53  ;;  %v3436_v51 = vmul.f32 %v1293_v39, %v3020_v1 }
 0x501   :  { %4373 = vst [vmem:[#allocation80_spill] sm:$0xff] %v3432_v20  ;;  %v3439_v42 = vsel %vm1135_vm11, 1.0, %v4363_v33  ;;  %v1053_v35 = vadd.s32 %v1052_v30, %v1050_v46  ;;  %1328 = vmax.xlane.f32.xlu0 %v3429_v18  ;;  %v1292_v43 = vsub.f32 1.0, %v3432_v20  ;;  %v1108_v8 = vshll.u32 %v1107_v27, 16 }
 0x502   :  { %4374 = vst [vmem:[#allocation81_spill] sm:$0xff] %v3439_v42  ;;  %v1095_v50 = vadd.s32 %v1094_v11, %v1092_v37  ;;  %v1077_v32 = vpop.xlane.xlu0 %1076  ;;  %1334 = vmax.xlane.f32.xlu1 %v3436_v51  ;;  %v1295_v9 = vsub.f32 1.0, %v3439_v42 }
 0x503   :  { %vm1134_vm12 = vcmp.eq.s32.totalorder %v2566_v24, %v1053_v35  ;;  %v1078_v1 = vcvt.f32.s32 %v1077_v32  ;;  %v1119_v17 = vpop.xlane.xlu1 %1118  ;;  %v3448_v38 = vmul.f32 %v1292_v43, %v3035_v59 }
 0x504   :  { %v3451_v36 = vsel %vm1134_vm12, 1.0, %v4363_v33  ;;  %vm1137_vm13 = vcmp.eq.s32.totalorder %v2566_v24, %v1095_v50  ;;  %v1120_v44 = vcvt.f32.s32 %v1119_v17  ;;  %v3455_v13 = vmul.f32 %v1295_v9, %v3039_v63 }
 0x505   :  { %4375 = vst [vmem:[#allocation82_spill] sm:$0xff] %v3451_v36  ;;  %v3458_v55 = vsel %vm1137_vm13, 1.0, %v4363_v33  ;;  %v1081_v54 = vadd.s32 %v1080_v45, %v1078_v1  ;;  %1332 = vmax.xlane.f32.xlu0 %v3448_v38  ;;  %v1294_v6 = vsub.f32 1.0, %v3451_v36 }
 0x506   :  { %4376 = vst [vmem:[#allocation83_spill] sm:$0xff] %v3458_v55  ;;  %v1123_v62 = vadd.s32 %v1122_v2, %v1120_v44  ;;  %v1105_v59 = vpop.xlane.xlu0 %1104  ;;  %1338 = vmax.xlane.f32.xlu1 %v3455_v13  ;;  %v1297_v30 = vsub.f32 1.0, %v3458_v55 }
 0x507   :  { %vm1136_vm14 = vcmp.eq.s32.totalorder %v2566_v24, %v1081_v54  ;;  %v1106_v26 = vcvt.f32.s32 %v1105_v59  ;;  %v3466_v63 = vmul.f32 %v1294_v6, %v3053_v3 }
 0x508   :  { %v3469_v25 = vsel %vm1136_vm14, 1.0, %v4363_v33  ;;  %vm1139_vm15 = vcmp.eq.s32.totalorder %v2566_v24, %v1123_v62  ;;  %v3473_v14 = vmul.f32 %v1297_v30, %v3057_v22 }
 0x509   :  { %4377 = vst [vmem:[#allocation84_spill] sm:$0xff] %v3469_v25  ;;  %v3476_v61 = vsel %vm1139_vm15, 1.0, %v4363_v33  ;;  %v1109_v56 = vadd.s32 %v1108_v8, %v1106_v26  ;;  %1336 = vmax.xlane.f32.xlu0 %v3466_v63  ;;  %v1296_v39 = vsub.f32 1.0, %v3469_v25 }
 0x50a   :  { %4378 = vst [vmem:[#allocation85_spill] sm:$0xff] %v3476_v61  ;;  %1342 = vmax.xlane.f32.xlu1 %v3473_v14  ;;  %v1299_v3 = vsub.f32 1.0, %v3476_v61 }
 0x50b   :  { %vm1138_vm0 = vcmp.eq.s32.totalorder %v2566_v24, %v1109_v56  ;;  %v3484_v11 = vmul.f32 %v1296_v39, %v3067_v7 }
 0x50c   :  { %v3487_v22 = vsel %vm1138_vm0, 1.0, %v4363_v33  ;;  %v3490_v46 = vmul.f32 %v1299_v3, %v3074_v15 }
 0x50d   :  { %4379 = vst [vmem:[#allocation86_spill] sm:$0xff] %v3487_v22  ;;  %1340 = vmax.xlane.f32.xlu0 %v3484_v11  ;;  %v1298_v53 = vsub.f32 1.0, %v3487_v22 }
 0x50e   :  { %1346 = vmax.xlane.f32.xlu1 %v3490_v46 }
 0x50f   :  { %v3496_v37 = vmul.f32 %v1298_v53, %v3080_v10 }
 0x511   :  { %1344 = vmax.xlane.f32.xlu0 %v3496_v37 }
 0x57b   :  { %v3499_v35 = vpop.xlane.xlu1 %1318 }
 0x57c   :  { %vm1349_vm1 = vcmp.ge.f32.partialorder %v3357_v4, %v3499_v35 }
 0x57d   :  { %v3504_v7 = vsel %vm1349_vm1, %v2566_v24, 128 }
 0x57e   :  { %v1395_v15 = vshra.s32 %v3504_v7, 16  ;;  %v3507_v43 = vpop.xlane.xlu0 %1316 }
 0x57f   :  { %vm1348_vm2 = vcmp.ge.f32.partialorder %v3369_v16, %v3507_v43  ;;  %v3511_v45 = vpop.xlane.xlu1 %1322 }
 0x580   :  { %v3514_v10 = vsel %vm1348_vm2, %v2566_v24, 128  ;;  %vm1351_vm3 = vcmp.ge.f32.partialorder %v3376_v21, %v3511_v45  ;;  %v3518_v2 = vcvt.s32.f32 %v1395_v15 }
 0x581   :  { %v1381_v4 = vshra.s32 %v3514_v10, 16  ;;  %v3522_v50 = vsel %vm1351_vm3, %v2566_v24, 128 }
 0x582   :  { %v1423_v32 = vshra.s32 %v3522_v50, 16  ;;  %v3525_v9 = vpop.xlane.xlu0 %1320  ;;  %1398 = vmin.xlane.f32.xlu1 %v3518_v2 }
 0x583   :  { %vm1350_vm4 = vcmp.ge.f32.partialorder %v3389_v58, %v3525_v9  ;;  %v3530_v16 = vpop.xlane.xlu1 %1326  ;;  %v3532_v27 = vcvt.s32.f32 %v1381_v4 }
 0x584   :  { %v3535_v21 = vsel %vm1350_vm4, %v2566_v24, 128  ;;  %vm1353_vm5 = vcmp.ge.f32.partialorder %v3396_v29, %v3530_v16  ;;  %v3539_v1 = vcvt.s32.f32 %v1423_v32 }
 0x585   :  { %v1409_v17 = vshra.s32 %v3535_v21, 16  ;;  %v3543_v44 = vsel %vm1353_vm5, %v2566_v24, 128  ;;  %1384 = vmin.xlane.f32.xlu0 %v3532_v27 }
 0x586   :  { %v1451_v58 = vshra.s32 %v3543_v44, 16  ;;  %v3547_v54 = vpop.xlane.xlu0 %1324  ;;  %1426 = vmin.xlane.f32.xlu1 %v3539_v1 }
 0x587   :  { %vm1352_vm6 = vcmp.ge.f32.partialorder %v3409_v57, %v3547_v54  ;;  %v3552_v6 = vpop.xlane.xlu1 %1330  ;;  %v3554_v29 = vcvt.s32.f32 %v1409_v17 }
 0x588   :  { %v3557_v62 = vsel %vm1352_vm6, %v2566_v24, 128  ;;  %vm1355_vm7 = vcmp.ge.f32.partialorder %v3416_v0, %v3552_v6  ;;  %v3561_v59 = vcvt.s32.f32 %v1451_v58 }
 0x589   :  { %v1437_v30 = vshra.s32 %v3557_v62, 16  ;;  %v3565_v8 = vsel %vm1355_vm7, %v2566_v24, 128  ;;  %1412 = vmin.xlane.f32.xlu0 %v3554_v29 }
 0x58a   :  { %v1479_v57 = vshra.s32 %v3565_v8, 16  ;;  %v3569_v26 = vpop.xlane.xlu0 %1328  ;;  %1454 = vmin.xlane.f32.xlu1 %v3561_v59 }
 0x58b   :  { %vm1354_vm8 = vcmp.ge.f32.partialorder %v3429_v18, %v3569_v26  ;;  %v3574_v56 = vpop.xlane.xlu1 %1334  ;;  %v3576_v0 = vcvt.s32.f32 %v1437_v30 }
 0x58c   :  { %v3579_v39 = vsel %vm1354_vm8, %v2566_v24, 128  ;;  %vm1357_vm9 = vcmp.ge.f32.partialorder %v3436_v51, %v3574_v56  ;;  %v3583_v3 = vcvt.s32.f32 %v1479_v57 }
 0x58d   :  { %v1465_v53 = vshra.s32 %v3579_v39, 16  ;;  %v3587_v15 = vsel %vm1357_vm9, %v2566_v24, 128  ;;  %1440 = vmin.xlane.f32.xlu0 %v3576_v0 }
 0x58e   :  { %v1507_v18 = vshra.s32 %v3587_v15, 16  ;;  %v3591_v4 = vpop.xlane.xlu0 %1332  ;;  %1482 = vmin.xlane.f32.xlu1 %v3583_v3 }
 0x58f   :  { %vm1356_vm10 = vcmp.ge.f32.partialorder %v3448_v38, %v3591_v4  ;;  %v3596_v32 = vpop.xlane.xlu1 %1338  ;;  %v3598_v51 = vcvt.s32.f32 %v1465_v53 }
 0x590   :  { %v3601_v17 = vsel %vm1356_vm10, %v2566_v24, 128  ;;  %vm1359_vm11 = vcmp.ge.f32.partialorder %v3455_v13, %v3596_v32  ;;  %v3605_v58 = vcvt.s32.f32 %v1507_v18 }
 0x591   :  { %v1493_v30 = vshra.s32 %v3601_v17, 16  ;;  %v3609_v57 = vsel %vm1359_vm11, %v2566_v24, 128  ;;  %1468 = vmin.xlane.f32.xlu0 %v3598_v51 }
 0x592   :  { %v1535_v38 = vshra.s32 %v3609_v57, 16  ;;  %v3613_v22 = vpop.xlane.xlu0 %1336  ;;  %1510 = vmin.xlane.f32.xlu1 %v3605_v58 }
 0x593   :  { %vm1358_vm12 = vcmp.ge.f32.partialorder %v3466_v63, %v3613_v22  ;;  %v3618_v53 = vpop.xlane.xlu1 %1342  ;;  %v3620_v13 = vcvt.s32.f32 %v1493_v30 }
 0x594   :  { %v3623_v18 = vsel %vm1358_vm12, %v2566_v24, 128  ;;  %vm1361_vm13 = vcmp.ge.f32.partialorder %v3473_v14, %v3618_v53  ;;  %v3627_v61 = vcvt.s32.f32 %v1535_v38 }
 0x595   :  { %v1521_v25 = vshra.s32 %v3623_v18, 16  ;;  %v3631_v33 = vsel %vm1361_vm13, %v2566_v24, 128  ;;  %1496 = vmin.xlane.f32.xlu0 %v3620_v13 }
 0x596   :  { %v1563_v63 = vshra.s32 %v3631_v33, 16  ;;  %v3635_v55 = vpop.xlane.xlu0 %1340  ;;  %1538 = vmin.xlane.f32.xlu1 %v3627_v61 }
 0x597   :  { %vm1360_vm14 = vcmp.ge.f32.partialorder %v3484_v11, %v3635_v55  ;;  %v3640_v30 = vpop.xlane.xlu1 %1346  ;;  %v3642_v14 = vcvt.s32.f32 %v1521_v25 }
 0x598   :  { %v3645_v38 = vsel %vm1360_vm14, %v2566_v24, 128  ;;  %vm1363_vm15 = vcmp.ge.f32.partialorder %v3490_v46, %v3640_v30  ;;  %v3649_v36 = vcvt.s32.f32 %v1563_v63 }
 0x599   :  { %v1549_v42 = vshra.s32 %v3645_v38, 16  ;;  %v3653_v20 = vsel %vm1363_vm15, %v2566_v24, 128  ;;  %1524 = vmin.xlane.f32.xlu0 %v3642_v14 }
 0x59a   :  { %v1591_v11 = vshra.s32 %v3653_v20, 16  ;;  %v3657_v19 = vpop.xlane.xlu0 %1344  ;;  %1566 = vmin.xlane.f32.xlu1 %v3649_v36 }
 0x59b   :  { %vm1362_vm0 = vcmp.ge.f32.partialorder %v3496_v37, %v3657_v19  ;;  %v3662_v25 = vcvt.s32.f32 %v1549_v42  ;;  %v4380_v42 = vld [vmem:[#allocation12_spill] sm:$0xff]  ;;  %v4381_v37 = vld [vmem:[#allocation13_spill] sm:$0xff] }
 0x59c   :  { %v3665_v46 = vsel %vm1362_vm0, %v2566_v24, 128  ;;  %v3667_v63 = vcvt.s32.f32 %v1591_v11  ;;  %v4382_v11 = vld [vmem:[#allocation14_spill] sm:$0xff]  ;;  %v4384_v24 = vld [vmem:[#allocation16_spill] sm:$0xff] }
 0x59d   :  { %v1577_v49 = vshra.s32 %v3665_v46, 16  ;;  %1552 = vmin.xlane.f32.xlu0 %v3662_v25 }
 0x59e   :  { %1594 = vmin.xlane.f32.xlu1 %v3667_v63 }
 0x59f   :  { %v3672_v23 = vcvt.s32.f32 %v1577_v49  ;;  %v4383_v49 = vld [vmem:[#allocation15_spill] sm:$0xff] }
 0x5a1   :  { %1580 = vmin.xlane.f32.xlu0 %v3672_v23 }
 0x5a2   :  { %390 = vadd.xlane.f32.xlu1 %v2596_v12  ;;  %v4386_v12 = vld [vmem:[#allocation18_spill] sm:$0xff] }
 0x5a5   :  { %388 = vadd.xlane.f32.xlu0 %v2602_v5  ;;  %v4387_v5 = vld [vmem:[#allocation19_spill] sm:$0xff] }
 0x5a6   :  { %394 = vadd.xlane.f32.xlu1 %v2608_v28  ;;  %v4388_v28 = vld [vmem:[#allocation20_spill] sm:$0xff] }
 0x5a9   :  { %392 = vadd.xlane.f32.xlu0 %v2614_v31  ;;  %v4389_v31 = vld [vmem:[#allocation21_spill] sm:$0xff] }
 0x5aa   :  { %398 = vadd.xlane.f32.xlu1 %v2620_v34  ;;  %v4390_v34 = vld [vmem:[#allocation22_spill] sm:$0xff] }
 0x5ad   :  { %396 = vadd.xlane.f32.xlu0 %v4380_v42  ;;  %v2342_v42 = vld [vmem:[#allocation5 + $0x78] sm:$0xff] }
 0x5ae   :  { %402 = vadd.xlane.f32.xlu1 %v4381_v37  ;;  %v2343_v37 = vld [vmem:[#allocation5 + $0x70] sm:$0xff] }
 0x5af   :  { %v1827_v47 = vpack.c.bf16 %v2342_v42, %v2343_v37 }
 0x5b1   :  { %400 = vadd.xlane.f32.xlu0 %v4382_v11  ;;  %v2344_v11 = vld [vmem:[#allocation5 + $0x68] sm:$0xff]  ;;  %2112 = vmatprep.subr.bf16.mxu1 %v1827_v47 }
 0x5b2   :  { %406 = vadd.xlane.f32.xlu1 %v4383_v49  ;;  %v1826_v49 = vpack.c.bf16 %v2344_v11, %v2345_v60  ;;  %2113 = vmatpush3.bf16.msra.mxu1 %v1827_v47  ;;  %v1408_v47 = vand.u32 65535, %v3535_v21  ;;  %v1436_v21 = vand.u32 65535, %v3557_v62  ;;  %v1464_v62 = vand.u32 65535, %v3579_v39 }
 0x5b3   :  { %v1492_v39 = vand.u32 65535, %v3601_v17  ;;  %v2349_v17 = vld [vmem:[#allocation5 + $0x48] sm:$0xff] }
 0x5b4   :  { %2114 = vmatprep.subr.bf16.mxu1 %v1826_v49 }
 0x5b5   :  { %404 = vadd.xlane.f32.xlu0 %v4384_v24  ;;  %v2346_v24 = vld [vmem:[#allocation5 + $0x50] sm:$0xff] }
 0x5b6   :  { %410 = vadd.xlane.f32.xlu1 %v4385_v52  ;;  %v2347_v52 = vld [vmem:[#allocation5 + $0x58] sm:$0xff]  ;;  %2115 = vmatpush3.bf16.msra.mxu1 %v1826_v49  ;;  %v1450_v49 = vand.u32 65535, %v3543_v44  ;;  %v1478_v44 = vand.u32 65535, %v3565_v8  ;;  %v1506_v8 = vand.u32 65535, %v3587_v15  ;;  %v1534_v15 = vand.u32 65535, %v3609_v57 }
 0x5b7   :  { %v1494_v57 = vcvt.s32.f32 %v1492_v39 }
 0x5b9   :  { %408 = vadd.xlane.f32.xlu0 %v4386_v12  ;;  %v1825_v12 = vpack.c.bf16 %v2347_v52, %v2346_v24  ;;  %v1410_v52 = vcvt.s32.f32 %v1408_v47 }
 0x5ba   :  { %414 = vadd.xlane.f32.xlu1 %v4387_v5  ;;  %v1394_v5 = vand.u32 65535, %v3504_v7 }
 0x5bb   :  { %2116 = vmatprep.subr.bf16.mxu1 %v1825_v12 }
 0x5bc   :  { %2117 = vmatpush3.bf16.msra.mxu1 %v1825_v12  ;;  %v1396_v42 = vcvt.s32.f32 %v1394_v5  ;;  %v1452_v12 = vcvt.s32.f32 %v1450_v49  ;;  %v1508_v49 = vcvt.s32.f32 %v1506_v8  ;;  %v1590_v8 = vand.u32 65535, %v3653_v20 }
 0x5bd   :  { %412 = vadd.xlane.f32.xlu0 %v4388_v28  ;;  %v1380_v28 = vand.u32 65535, %v3514_v10 }
 0x5be   :  { %418 = vadd.xlane.f32.xlu1 %v4389_v31  ;;  %v1422_v31 = vand.u32 65535, %v3522_v50 }
 0x5bf   :  { %v1382_v11 = vcvt.s32.f32 %v1380_v28 }
 0x5c0   :  { %v1424_v10 = vcvt.s32.f32 %v1422_v31  ;;  %v1438_v31 = vcvt.s32.f32 %v1436_v21  ;;  %v1520_v21 = vand.u32 65535, %v3623_v18 }
 0x5c1   :  { %416 = vadd.xlane.f32.xlu0 %v4390_v34 }
 0x60b   :  { %v3694_v34 = vpop.xlane.xlu1 %1398 }
 0x60c   :  { %vm1400_vm1 = vcmp.eq.f32.partialorder %v3518_v2, %v3694_v34 }
 0x60d   :  { %v1401_v60 = vsel %vm1400_vm1, %v1396_v42, inf  ;;  %v1480_v42 = vcvt.s32.f32 %v1478_v44 }
 0x60e   :  { %v3699_v37 = vpop.xlane.xlu0 %1384  ;;  %1402 = vmin.xlane.f32.xlu1 %v1401_v60 }
 0x60f   :  { %vm1386_vm2 = vcmp.eq.f32.partialorder %v3532_v27, %v3699_v37  ;;  %v3704_v7 = vpop.xlane.xlu1 %1426 }
 0x610   :  { %vm1428_vm3 = vcmp.eq.f32.partialorder %v3539_v1, %v3704_v7  ;;  %v1387_v50 = vsel %vm1386_vm2, %v1382_v11, inf  ;;  %v1466_v11 = vcvt.s32.f32 %v1464_v62  ;;  %v2350_v62 = vld [vmem:[#allocation5 + $0x30] sm:$0xff] }
 0x611   :  { %1388 = vmin.xlane.f32.xlu0 %v1387_v50  ;;  %v1429_v2 = vsel %vm1428_vm3, %v1424_v10, inf  ;;  %v2348_v50 = vld [vmem:[#allocation5 + $0x40] sm:$0xff] }
 0x612   :  { %v3709_v24 = vpop.xlane.xlu0 %1412  ;;  %1430 = vmin.xlane.f32.xlu1 %v1429_v2  ;;  %v1824_v2 = vpack.c.bf16 %v2349_v17, %v2348_v50  ;;  %v2354_v17 = vld [vmem:[#allocation5 + $0x10] sm:$0xff] }
 0x613   :  { %vm1414_vm4 = vcmp.eq.f32.partialorder %v3554_v29, %v3709_v24  ;;  %v3714_v27 = vpop.xlane.xlu1 %1454 }
 0x614   :  { %vm1456_vm5 = vcmp.eq.f32.partialorder %v3561_v59, %v3714_v27  ;;  %v1415_v1 = vsel %vm1414_vm4, %v1410_v52, inf  ;;  %2118 = vmatprep.subr.bf16.mxu1 %v1824_v2 }
 0x615   :  { %1416 = vmin.xlane.f32.xlu0 %v1415_v1  ;;  %v1457_v5 = vsel %vm1456_vm5, %v1452_v12, inf  ;;  %2119 = vmatpush3.bf16.msra.mxu1 %v1824_v2  ;;  %v1548_v1 = vand.u32 65535, %v3645_v38  ;;  %v2355_v2 = vld [vmem:[#allocation5 + $0x18] sm:$0xff] }
 0x616   :  { %v3719_v28 = vpop.xlane.xlu0 %1440  ;;  %1458 = vmin.xlane.f32.xlu1 %v1457_v5 }
 0x617   :  { %vm1442_vm6 = vcmp.eq.f32.partialorder %v3576_v0, %v3719_v28  ;;  %v3724_v29 = vpop.xlane.xlu1 %1482  ;;  %v1550_v20 = vcvt.s32.f32 %v1548_v1 }
 0x618   :  { %vm1484_vm7 = vcmp.eq.f32.partialorder %v3583_v3, %v3724_v29  ;;  %v1443_v59 = vsel %vm1442_vm6, %v1438_v31, inf  ;;  %v2351_v31 = vld [vmem:[#allocation5 + $0x38] sm:$0xff] }
 0x619   :  { %1444 = vmin.xlane.f32.xlu0 %v1443_v59  ;;  %v1485_v60 = vsel %vm1484_vm7, %v1480_v42, inf }
 0x61a   :  { %v3729_v47 = vpop.xlane.xlu0 %1468  ;;  %1486 = vmin.xlane.f32.xlu1 %v1485_v60  ;;  %v1576_v60 = vand.u32 65535, %v3665_v46 }
 0x61b   :  { %4391 = vst [vmem:[#allocation12_spill] sm:$0xff] %v3729_v47  ;;  %vm1470_vm8 = vcmp.eq.f32.partialorder %v3598_v51, %v3729_v47  ;;  %v3734_v0 = vpop.xlane.xlu1 %1510  ;;  %v1562_v51 = vand.u32 65535, %v3631_v33  ;;  %v1522_v33 = vcvt.s32.f32 %v1520_v21  ;;  %v1821_v21 = vpack.c.bf16 %v2355_v2, %v2354_v17  ;;  %v4409_v17 = vld [vmem:[#allocation59_spill] sm:$0xff]  ;;  %v4420_v2 = vld [vmem:[#allocation33_spill] sm:$0xff]  ;;  %v4430_v47 = vld [vmem:[#allocation38_spill] sm:$0xff] }
 0x61c   :  { %4392 = vst [vmem:[#allocation13_spill] sm:$0xff] %v3734_v0  ;;  %vm1512_vm9 = vcmp.eq.f32.partialorder %v3605_v58, %v3734_v0  ;;  %v1471_v3 = vsel %vm1470_vm8, %v1466_v11, inf  ;;  %v1536_v58 = vcvt.s32.f32 %v1534_v15  ;;  %v2352_v11 = vld [vmem:[#allocation5 + $0x20] sm:$0xff]  ;;  %v2353_v15 = vld [vmem:[#allocation5 + $0x28] sm:$0xff]  ;;  %v1578_v50 = vcvt.s32.f32 %v1576_v60 }
 0x61d   :  { %1472 = vmin.xlane.f32.xlu0 %v1471_v3  ;;  %v1513_v10 = vsel %vm1512_vm9, %v1508_v49, inf  ;;  %v4427_v0 = vld [vmem:[#allocation68_spill] sm:$0xff] }
 0x61e   :  { %v3739_v52 = vpop.xlane.xlu0 %1496  ;;  %1514 = vmin.xlane.f32.xlu1 %v1513_v10 }
 0x61f   :  { %4393 = vst [vmem:[#allocation14_spill] sm:$0xff] %v3739_v52  ;;  %vm1498_vm10 = vcmp.eq.f32.partialorder %v3620_v13, %v3739_v52  ;;  %v3744_v44 = vpop.xlane.xlu1 %1538  ;;  %v1823_v13 = vpack.c.bf16 %v2351_v31, %v2350_v62  ;;  %v4426_v52 = vld [vmem:[#allocation36_spill] sm:$0xff] }
 0x620   :  { %4394 = vst [vmem:[#allocation15_spill] sm:$0xff] %v3744_v44  ;;  %vm1540_vm11 = vcmp.eq.f32.partialorder %v3627_v61, %v3744_v44  ;;  %v1499_v12 = vsel %vm1498_vm10, %v1494_v57, inf  ;;  %v1564_v61 = vcvt.s32.f32 %v1562_v51  ;;  %v2357_v57 = vld [vmem:[#allocation5 + $0x8] sm:$0xff]  ;;  %v4425_v44 = vld [vmem:[#allocation67_spill] sm:$0xff] }
 0x621   :  { %1500 = vmin.xlane.f32.xlu0 %v1499_v12  ;;  %v1541_v18 = vsel %vm1540_vm11, %v1536_v58, inf  ;;  %2120 = vmatprep.subr.bf16.mxu1 %v1823_v13 }
 0x622   :  { %v3749_v5 = vpop.xlane.xlu0 %1524  ;;  %1542 = vmin.xlane.f32.xlu1 %v1541_v18  ;;  %2121 = vmatpush3.bf16.msra.mxu1 %v1823_v13  ;;  %v4400_v13 = vld [vmem:[#allocation23_spill] sm:$0xff] }
 0x623   :  { %4395 = vst [vmem:[#allocation16_spill] sm:$0xff] %v3749_v5  ;;  %vm1526_vm12 = vcmp.eq.f32.partialorder %v3642_v14, %v3749_v5  ;;  %v3754_v42 = vpop.xlane.xlu1 %1566  ;;  %v1822_v14 = vpack.c.bf16 %v2353_v15, %v2352_v11  ;;  %v4405_v11 = vld [vmem:[#allocation57_spill] sm:$0xff]  ;;  %v4424_v5 = vld [vmem:[#allocation35_spill] sm:$0xff] }
 0x624   :  { %4396 = vst [vmem:[#allocation17_spill] sm:$0xff] %v3754_v42  ;;  %vm1568_vm13 = vcmp.eq.f32.partialorder %v3649_v36, %v3754_v42  ;;  %v1527_v59 = vsel %vm1526_vm12, %v1522_v33, inf  ;;  %v1592_v36 = vcvt.s32.f32 %v1590_v8  ;;  %v4401_v8 = vld [vmem:[#allocation55_spill] sm:$0xff] }
 0x625   :  { %1528 = vmin.xlane.f32.xlu0 %v1527_v59  ;;  %v1569_v38 = vsel %vm1568_vm13, %v1564_v61, inf  ;;  %2122 = vmatprep.subr.bf16.mxu1 %v1822_v14  ;;  %v1173_v61 = vsub.f32 %v4401_v8, %v4400_v13  ;;  %v4402_v59 = vld [vmem:[#allocation24_spill] sm:$0xff]  ;;  %v4416_v8 = vld [vmem:[#allocation31_spill] sm:$0xff] }
 0x626   :  { %v3759_v39 = vpop.xlane.xlu0 %1552  ;;  %1570 = vmin.xlane.f32.xlu1 %v1569_v38  ;;  %2123 = vmatpush3.bf16.msra.mxu1 %v1822_v14  ;;  %v4403_v38 = vld [vmem:[#allocation56_spill] sm:$0xff]  ;;  %v1652_v42 = vsub.f32 %v3507_v43, %v4402_v59 }
 0x627   :  { %4397 = vst [vmem:[#allocation18_spill] sm:$0xff] %v3759_v39  ;;  %vm1554_vm14 = vcmp.eq.f32.partialorder %v3662_v25, %v3759_v39  ;;  %v3763_v49 = vpop.xlane.xlu1 %1594  ;;  %2124 = vmatprep.subr.bf16.mxu1 %v1821_v21  ;;  %v1172_v60 = vsub.f32 %v4403_v38, %v4402_v59  ;;  %v4428_v38 = vld [vmem:[#allocation37_spill] sm:$0xff]  ;;  %v1665_v39 = vsub.f32 %v3618_v53, %v4424_v5 }
 0x628   :  { %4398 = vst [vmem:[#allocation19_spill] sm:$0xff] %v3763_v49  ;;  %vm1596_vm15 = vcmp.eq.f32.partialorder %v3667_v63, %v3763_v49  ;;  %v1555_v3 = vsel %vm1554_vm14, %v1550_v20, inf  ;;  %v2356_v63 = vld [vmem:[#allocation5] sm:$0xff]  ;;  %v4404_v20 = vld [vmem:[#allocation25_spill] sm:$0xff] }
 0x629   :  { %1556 = vmin.xlane.f32.xlu0 %v1555_v3  ;;  %v1597_v46 = vsel %vm1596_vm15, %v1592_v36, inf  ;;  %v1820_v51 = vpack.c.bf16 %v2357_v57, %v2356_v63  ;;  %v1175_v15 = vsub.f32 %v4405_v11, %v4404_v20  ;;  %v4406_v36 = vld [vmem:[#allocation26_spill] sm:$0xff]  ;;  %v4421_v49 = vld [vmem:[#allocation65_spill] sm:$0xff] }
 0x62a   :  { %v3767_v10 = vpop.xlane.xlu0 %1580  ;;  %1598 = vmin.xlane.f32.xlu1 %v1597_v46  ;;  %2125 = vmatpush3.bf16.msra.mxu1 %v1821_v21  ;;  %v4407_v3 = vld [vmem:[#allocation58_spill] sm:$0xff]  ;;  %v4410_v21 = vld [vmem:[#allocation28_spill] sm:$0xff] }
 0x62b   :  { %4399 = vst [vmem:[#allocation20_spill] sm:$0xff] %v3767_v10  ;;  %vm1582_vm0 = vcmp.eq.f32.partialorder %v3672_v23, %v3767_v10  ;;  %2126 = vmatprep.subr.bf16.mxu1 %v1820_v51  ;;  %v391_v58 = vpop.xlane.xlu1 %390  ;;  %v1174_v46 = vsub.f32 %v4407_v3, %v4406_v36  ;;  %v4422_v63 = vld [vmem:[#allocation34_spill] sm:$0xff] }
 0x62c   :  { %v1583_v25 = vsel %vm1582_vm0, %v1578_v50, inf  ;;  %2214 = vrcp.f32 %v391_v58  ;;  %v4408_v50 = vld [vmem:[#allocation27_spill] sm:$0xff]  ;;  %v4429_v58 = vld [vmem:[#allocation69_spill] sm:$0xff] }
 0x62d   :  { %1584 = vmin.xlane.f32.xlu0 %v1583_v25  ;;  %v4411_v25 = vld [vmem:[#allocation60_spill] sm:$0xff] }
 0x62e   :  { %2127 = vmatpush3.bf16.msra.mxu1 %v1820_v51  ;;  %v389_v12 = vpop.xlane.xlu0 %388  ;;  %v4412_v51 = vld [vmem:[#allocation29_spill] sm:$0xff] }
 0x62f   :  { %v395_v18 = vpop.xlane.xlu1 %394  ;;  %2216 = vrcp.f32 %v389_v12  ;;  %v1655_v12 = vsub.f32 %v3511_v45, %v4404_v20  ;;  %v1659_v43 = vsub.f32 %v3552_v6, %v4412_v51 }
 0x630   :  { %2218 = vrcp.f32 %v395_v18  ;;  %v4414_v18 = vld [vmem:[#allocation30_spill] sm:$0xff] }
 0x631   :  { %v1658_v45 = vsub.f32 %v3569_v26, %v4414_v18 }
 0x632   :  { %v393_v1 = vpop.xlane.xlu0 %392 }
 0x633   :  { %v399_v33 = vpop.xlane.xlu1 %398  ;;  %2220 = vrcp.f32 %v393_v1  ;;  %v4431_v1 = vld [vmem:[#allocation70_spill] sm:$0xff] }
 0x634   :  { %2222 = vrcp.f32 %v399_v33  ;;  %v1653_v33 = vsub.f32 %v3499_v35, %v4400_v13  ;;  %v1654_v35 = vsub.f32 %v3525_v9, %v4406_v36  ;;  %v1661_v9 = vsub.f32 %v3574_v56, %v4416_v8 }
 0x635   :  { %v1419_v36 = vcvt.f32.s32 %v3709_v24 }
 0x636   :  { %v397_v62 = vpop.xlane.xlu0 %396 }
 0x637   :  { %v403_v31 = vpop.xlane.xlu1 %402  ;;  %2224 = vrcp.f32 %v397_v62 }
 0x639   :  { %v2215_v14 = vpop.eup %2214 }
 0x63a   :  { %v401_v23 = vpop.xlane.xlu0 %400  ;;  %v1189_v48 = vmul.f32 %v2215_v14, %v1173_v61  ;;  %v1669_v62 = vmul.f32 %v2215_v14, %v1653_v33  ;;  %v1656_v61 = vsub.f32 %v3547_v54, %v4410_v21  ;;  %v1664_v54 = vsub.f32 %v3635_v55, %v4426_v52 }
 0x63b   :  { %v407_v57 = vpop.xlane.xlu1 %406  ;;  %2226 = vrcp.f32 %v401_v23  ;;  %v1657_v23 = vsub.f32 %v3530_v16, %v4408_v50 }
 0x63c   :  { %v2217_v10 = vpop.eup %2216  ;;  %2228 = vrcp.f32 %v403_v31  ;;  %v1206_v20 = vmul.f32 1.442695, %v1189_v48 }
 0x63d   :  { %v1188_v13 = vmul.f32 %v2217_v10, %v1172_v60  ;;  %2230 = vrcp.f32 %v407_v57  ;;  %v2219_v11 = vpop.eup %2218  ;;  %v1668_v59 = vmul.f32 %v2217_v10, %v1652_v42  ;;  %v1686_v42 = vmul.f32 1.442695, %v1669_v62 }
 0x63e   :  { %v405_v40 = vpop.xlane.xlu0 %404  ;;  %v1405_v10 = vcvt.f32.s32 %v3694_v34  ;;  %v1191_v33 = vmul.f32 %v2219_v11, %v1175_v15  ;;  %v1671_v48 = vmul.f32 %v2219_v11, %v1655_v12  ;;  %v1391_v15 = vcvt.f32.s32 %v3699_v37 }
 0x63f   :  { %v411_v31 = vpop.xlane.xlu1 %410  ;;  %2232 = vrcp.f32 %v405_v40  ;;  %v1204_v57 = vmul.f32 1.442695, %v1188_v13  ;;  %v1684_v3 = vmul.f32 1.442695, %v1668_v59  ;;  %v1433_v11 = vcvt.f32.s32 %v3704_v7 }
 0x640   :  { %v2221_v16 = vpop.eup %2220  ;;  %2234 = vrcp.f32 %v411_v31  ;;  %v3837_v12 = vshll.u32 %v1405_v10, 16  ;;  %v1210_v31 = vmul.f32 1.442695, %v1191_v33  ;;  %v1461_v37 = vcvt.f32.s32 %v3714_v27 }
 0x641   :  { %v2223_v60 = vpop.eup %2222  ;;  %v1190_v40 = vmul.f32 %v2221_v16, %v1174_v46  ;;  %v1670_v62 = vmul.f32 %v2221_v16, %v1654_v35  ;;  %v1690_v46 = vmul.f32 1.442695, %v1671_v48  ;;  %v3845_v10 = vshll.u32 %v1391_v15, 16 }
 0x642   :  { %v409_v14 = vpop.xlane.xlu0 %408  ;;  %v1673_v16 = vmul.f32 %v2223_v60, %v1657_v23  ;;  %v3854_v23 = vshll.u32 %v1419_v36, 16  ;;  %v3856_v15 = vshll.u32 %v1461_v37, 16 }
 0x643   :  { %2236 = vrcp.f32 %v409_v14  ;;  %v415_v13 = vpop.xlane.xlu1 %414  ;;  %v1208_v35 = vmul.f32 1.442695, %v1190_v40  ;;  %v1688_v7 = vmul.f32 1.442695, %v1670_v62 }
 0x644   :  { %2238 = vpow2.f32 %v1206_v20  ;;  %v2225_v59 = vpop.eup %2224  ;;  %v4432_v20 = vsub.f32 %v4409_v17, %v4408_v50  ;;  %v1447_v50 = vcvt.f32.s32 %v3719_v28  ;;  %v1489_v17 = vcvt.f32.s32 %v3724_v29 }
 0x645   :  { %2240 = vpow2.f32 %v1686_v42  ;;  %v1672_v48 = vmul.f32 %v2225_v59, %v1656_v61 }
 0x646   :  { %2242 = vpow2.f32 %v1204_v57  ;;  %v413_v14 = vpop.xlane.xlu0 %412  ;;  %v1193_v34 = vmul.f32 %v2223_v60, %v4432_v20  ;;  %v4433_v57 = vsub.f32 %v4411_v25, %v4410_v21  ;;  %v1694_v21 = vmul.f32 1.442695, %v1673_v16  ;;  %v4434_v25 = vld [vmem:[#allocation62_spill] sm:$0xff]  ;;  %v4441_v16 = vld [vmem:[#allocation13_spill] sm:$0xff] }
 0x647   :  { %2244 = vpow2.f32 %v1684_v3  ;;  %v3850_v3 = vshll.u32 %v1433_v11, 16  ;;  %v419_v40 = vpop.xlane.xlu1 %418  ;;  %v4435_v62 = vsub.f32 %v4434_v25, %v4414_v18  ;;  %v4436_v11 = vld [vmem:[#allocation12_spill] sm:$0xff]  ;;  %v3867_v61 = vshll.u32 %v1489_v17, 16 }
 0x648   :  { %2246 = vrcp.f32 %v415_v13  ;;  %v2227_v42 = vpop.eup %2226  ;;  %v1192_v33 = vmul.f32 %v2225_v59, %v4433_v57  ;;  %v1214_v60 = vmul.f32 1.442695, %v1193_v34  ;;  %v1475_v28 = vcvt.f32.s32 %v4436_v11  ;;  %v4439_v59 = vld [vmem:[#allocation63_spill] sm:$0xff] }
 0x649   :  { %2248 = vrcp.f32 %v413_v14  ;;  %v2229_v24 = vpop.eup %2228  ;;  %v1194_v13 = vmul.f32 %v2227_v42, %v4435_v62  ;;  %v3865_v34 = vshll.u32 %v1447_v50, 16  ;;  %v4440_v20 = vsub.f32 %v4439_v59, %v4416_v8  ;;  %v4442_v50 = vld [vmem:[#allocation14_spill] sm:$0xff]  ;;  %v4452_v8 = vld [vmem:[#allocation17_spill] sm:$0xff] }
 0x64a   :  { %2250 = vpow2.f32 %v1210_v31  ;;  %v2231_v27 = vpop.eup %2230  ;;  %v1212_v29 = vmul.f32 1.442695, %v1192_v33  ;;  %v4437_v31 = vld [vmem:[#allocation61_spill] sm:$0xff]  ;;  %v1517_v57 = vcvt.f32.s32 %v4441_v16  ;;  %v1675_v33 = vmul.f32 %v2229_v24, %v1659_v43  ;;  %v417_v25 = vpop.xlane.xlu0 %416 }
 0x64b   :  { %2252 = vpow2.f32 %v1690_v46  ;;  %v4438_v36 = vsub.f32 %v4437_v31, %v4412_v51  ;;  %v1197_v37 = vmul.f32 %v2231_v27, %v4440_v20  ;;  %v1503_v11 = vcvt.f32.s32 %v4442_v50  ;;  %v4449_v50 = vld [vmem:[#allocation16_spill] sm:$0xff] }
 0x64c   :  { %2254 = vpow2.f32 %v1208_v35  ;;  %v2233_v46 = vpop.eup %2232  ;;  %v1216_v17 = vmul.f32 1.442695, %v1194_v13  ;;  %v1674_v31 = vmul.f32 %v2227_v42, %v1658_v45  ;;  %v4446_v13 = vsub.f32 %v4421_v49, %v4420_v2 }
 0x64d   :  { %2256 = vpow2.f32 %v1688_v7  ;;  %v1195_v14 = vmul.f32 %v2229_v24, %v4438_v36  ;;  %v2235_v35 = vpop.eup %2234  ;;  %v1692_v7 = vmul.f32 1.442695, %v1672_v48  ;;  %v3882_v36 = vshll.u32 %v1475_v28, 16  ;;  %v4443_v48 = vld [vmem:[#allocation64_spill] sm:$0xff]  ;;  %v4445_v24 = vld [vmem:[#allocation15_spill] sm:$0xff]  ;;  %v4447_v28 = vld [vmem:[#allocation66_spill] sm:$0xff] }
 0x64e   :  { %2258 = vrcp.f32 %v419_v40  ;;  %v4444_v6 = vsub.f32 %v4443_v48, %v4418_v41  ;;  %v1545_v59 = vcvt.f32.s32 %v4445_v24  ;;  %v1199_v26 = vmul.f32 %v2235_v35, %v4446_v13 }
 0x64f   :  { %2260 = vpow2.f32 %v1214_v60  ;;  %v1218_v60 = vmul.f32 1.442695, %v1195_v14  ;;  %v3895_v45 = vshll.u32 %v1517_v57, 16  ;;  %v1698_v42 = vmul.f32 1.442695, %v1675_v33 }
 0x650   :  { %v2237_v62 = vpop.eup %2236  ;;  %2262 = vpow2.f32 %v1694_v21  ;;  %v1196_v51 = vmul.f32 %v2233_v46, %v4444_v6  ;;  %v1222_v21 = vmul.f32 1.442695, %v1197_v37  ;;  %v3902_v16 = vshll.u32 %v1503_v11, 16 }
 0x651   :  { %v3880_v40 = vpop.eup %2238  ;;  %2264 = vpow2.f32 %v1212_v29  ;;  %v4448_v29 = vsub.f32 %v4447_v28, %v4422_v63  ;;  %v1696_v37 = vmul.f32 1.442695, %v1674_v31  ;;  %v1677_v49 = vmul.f32 %v2231_v27, %v1661_v9 }
 0x652   :  { %v3887_v43 = vpop.eup %2240  ;;  %2266 = vrcp.f32 %v417_v25  ;;  %v1531_v57 = vcvt.f32.s32 %v4449_v50  ;;  %v4450_v33 = vsub.f32 %v3591_v4, %v4418_v41  ;;  %v3911_v24 = vshll.u32 %v1545_v59, 16  ;;  %v4454_v4 = vld [vmem:[#allocation18_spill] sm:$0xff] }
 0x653   :  { %v3893_v18 = vpop.eup %2242  ;;  %2268 = vpow2.f32 %v1692_v7  ;;  %v1198_v14 = vmul.f32 %v2237_v62, %v4448_v29  ;;  %v1220_v7 = vmul.f32 1.442695, %v1196_v51  ;;  %v1226_v11 = vmul.f32 1.442695, %v1199_v26 }
 0x654   :  { %v3900_v20 = vpop.eup %2244  ;;  %2270 = vpow2.f32 %v1216_v17  ;;  %v1676_v48 = vmul.f32 %v2233_v46, %v4450_v33  ;;  %v4451_v17 = vsub.f32 %v3596_v32, %v4420_v2  ;;  %v1573_v9 = vcvt.f32.s32 %v4452_v8 }
 0x655   :  { %v2247_v25 = vpop.eup %2246  ;;  %2272 = vpow2.f32 %v1218_v60  ;;  %v1224_v27 = vmul.f32 1.442695, %v1198_v14  ;;  %v4453_v60 = vsub.f32 %v3613_v22, %v4422_v63  ;;  %v1559_v46 = vcvt.f32.s32 %v4454_v4 }
 0x656   :  { %v2249_v6 = vpop.eup %2248  ;;  %2274 = vpow2.f32 %v1222_v21  ;;  %v1679_v31 = vmul.f32 %v2235_v35, %v4451_v17  ;;  %v1702_v59 = vmul.f32 1.442695, %v1677_v49  ;;  %v4455_v21 = vsub.f32 %v4425_v44, %v4424_v5 }
 0x657   :  { %v2251_v56 = vpop.eup %2250  ;;  %2276 = vpow2.f32 %v1698_v42  ;;  %v1678_v51 = vmul.f32 %v2237_v62, %v4453_v60  ;;  %v3926_v35 = vshll.u32 %v1531_v57, 16  ;;  %v1700_v13 = vmul.f32 1.442695, %v1676_v48  ;;  %v4457_v62 = vld [vmem:[#allocation19_spill] sm:$0xff]  ;;  %v4458_v48 = vld [vmem:[#allocation20_spill] sm:$0xff] }
 0x658   :  { %v3920_v41 = vpop.eup %2252  ;;  %2278 = vpow2.f32 %v1696_v37  ;;  %v1201_v32 = vmul.f32 %v2247_v25, %v4455_v21  ;;  %v4456_v26 = vsub.f32 %v4427_v0, %v4426_v52  ;;  %v1601_v42 = vcvt.f32.s32 %v4457_v62  ;;  %v4464_v62 = vld [vmem:[#allocation73_spill] sm:$0xff] }
 0x659   :  { %v2255_v2 = vpop.eup %2254  ;;  %2280 = vpow2.f32 %v1220_v7  ;;  %v1706_v28 = vmul.f32 1.442695, %v1679_v31  ;;  %v1236_v29 = vadd.f32 1.0, %v3893_v18  ;;  %v3935_v44 = vshll.u32 %v1573_v9, 16 }
 0x65a   :  { %v1200_v22 = vmul.f32 %v2249_v6, %v4456_v26  ;;  %v3931_v63 = vpop.eup %2256  ;;  %2282 = vpow2.f32 %v1226_v11  ;;  %v1704_v37 = vmul.f32 1.442695, %v1678_v51  ;;  %v1237_v49 = vadd.f32 1.0, %v3880_v40 }
 0x65b   :  { %v2259_v14 = vpop.eup %2258  ;;  %2284 = vpow2.f32 %v1224_v27  ;;  %v3938_v57 = vshll.u32 %v1559_v46, 16  ;;  %v1230_v0 = vmul.f32 1.442695, %v1201_v32  ;;  %v1238_v7 = vadd.f32 1.0, %v2255_v2 }
 0x65c   :  { %v2261_v50 = vpop.eup %2260  ;;  %2286 = vpow2.f32 %v1702_v59  ;;  %v1587_v11 = vcvt.f32.s32 %v4458_v48  ;;  %v1681_v17 = vmul.f32 %v2247_v25, %v1665_v39  ;;  %v1228_v31 = vmul.f32 1.442695, %v1200_v22  ;;  %v4460_v59 = vld [vmem:[#allocation71_spill] sm:$0xff]  ;;  %v4461_v25 = vld [vmem:[#allocation72_spill] sm:$0xff] }
 0x65d   :  { %v3940_v33 = vpop.eup %2262  ;;  %2288 = vpow2.f32 %v1700_v13  ;;  %v3946_v9 = vshll.u32 %v1601_v42, 16  ;;  %v4459_v27 = vsub.f32 %v4429_v58, %v4428_v38  ;;  %v1716_v51 = vadd.f32 %v3900_v20, %v1236_v29  ;;  %v4465_v29 = vld [vmem:[#allocation39_spill] sm:$0xff] }
 0x65e   :  { %v2265_v8 = vpop.eup %2264  ;;  %2290 = vpow2.f32 %v1706_v28  ;;  %v1680_v46 = vmul.f32 %v2249_v6, %v1664_v54  ;;  %v1253_v53 = vmul.f32 %v3880_v40, %v4460_v59  ;;  %v1717_v5 = vadd.f32 %v3887_v43, %v1237_v49  ;;  %v4468_v59 = vld [vmem:[#allocation41_spill] sm:$0xff] }
 0x65f   :  { %v1203_v60 = vmul.f32 %v2259_v14, %v4459_v27  ;;  %v2267_v4 = vpop.eup %2266  ;;  %2292 = vpow2.f32 %v1704_v37  ;;  %v1252_v58 = vmul.f32 %v3893_v18, %v4461_v25  ;;  %v1239_v21 = vadd.f32 1.0, %v2251_v56 }
 0x660   :  { %v3958_v39 = vpop.eup %2268  ;;  %2294 = vpow2.f32 %v1230_v0  ;;  %v1718_v32 = vadd.f32 %v3931_v63, %v1238_v7  ;;  %v3963_v26 = vshll.u32 %v1587_v11, 16  ;;  %v1710_v22 = vmul.f32 1.442695, %v1681_v17  ;;  %v4466_v7 = vld [vmem:[#allocation40_spill] sm:$0xff] }
 0x661   :  { %v2271_v13 = vpop.eup %2270  ;;  %2296 = vpow2.f32 %v1228_v31  ;;  %v1240_v55 = vadd.f32 1.0, %v2265_v8  ;;  %v1234_v54 = vmul.f32 1.442695, %v1203_v60  ;;  %v4463_v40 = vsub.f32 %v4431_v1, %v4430_v47 }
 0x662   :  { %4462 = vst [vmem:[#allocation21_spill] sm:$0xff] %v3963_v26  ;;  %v2273_v52 = vpop.eup %2272  ;;  %2298 = vrcp.f32 %v1716_v51  ;;  %v1255_v42 = vmul.f32 %v2251_v56, %v4464_v62  ;;  %v1708_v18 = vmul.f32 1.442695, %v1680_v46  ;;  %v3970_v37 = vadd.f32 %v4465_v29, %v1253_v53  ;;  %v4467_v56 = vld [vmem:[#allocation74_spill] sm:$0xff] }
 0x663   :  { %v1202_v6 = vmul.f32 %v2267_v4, %v4463_v40  ;;  %v2275_v28 = vpop.eup %2274  ;;  %2300 = vrcp.f32 %v1717_v5  ;;  %v1241_v49 = vadd.f32 1.0, %v2261_v50  ;;  %v3975_v48 = vadd.f32 %v4466_v7, %v1252_v58 }
 0x664   :  { %v3972_v0 = vpop.eup %2276  ;;  %v1719_v11 = vadd.f32 %v3920_v41, %v1239_v21  ;;  %2302 = vrcp.f32 %v1718_v32  ;;  %v1242_v1 = vadd.f32 1.0, %v2271_v13  ;;  %v1254_v31 = vmul.f32 %v2255_v2, %v4467_v56  ;;  %v4470_v32 = vld [vmem:[#allocation75_spill] sm:$0xff] }
 0x665   :  { %v3978_v17 = vpop.eup %2278  ;;  %2304 = vpow2.f32 %v1710_v22  ;;  %v1720_v27 = vadd.f32 %v3958_v39, %v1240_v55  ;;  %v1243_v60 = vadd.f32 1.0, %v2273_v52  ;;  %v1232_v46 = vmul.f32 1.442695, %v1202_v6  ;;  %v4472_v6 = vld [vmem:[#allocation76_spill] sm:$0xff] }
 0x666   :  { %v2281_v51 = vpop.eup %2280  ;;  %2306 = vpow2.f32 %v1234_v54  ;;  %v3983_v53 = vadd.f32 %v4468_v59, %v1255_v42  ;;  %v1245_v5 = vadd.f32 1.0, %v2275_v28  ;;  %v4469_v58 = vsub.f32 %v3640_v30, %v4428_v38 }
 0x667   :  { %v2283_v25 = vpop.eup %2282  ;;  %2308 = vpow2.f32 %v1708_v18  ;;  %v1257_v22 = vmul.f32 %v2261_v50, %v4470_v32  ;;  %v1721_v2 = vadd.f32 %v3940_v33, %v1241_v49  ;;  %v4471_v55 = vsub.f32 %v3657_v19, %v4430_v47  ;;  %v4473_v18 = vld [vmem:[#allocation77_spill] sm:$0xff]  ;;  %v4474_v49 = vld [vmem:[#allocation42_spill] sm:$0xff]  ;;  %v4478_v32 = vld [vmem:[#allocation44_spill] sm:$0xff] }
 0x668   :  { %v1683_v21 = vmul.f32 %v2259_v14, %v4469_v58  ;;  %v2285_v40 = vpop.eup %2284  ;;  %2310 = vrcp.f32 %v1719_v11  ;;  %v1256_v62 = vmul.f32 %v2265_v8, %v4472_v6  ;;  %v1722_v42 = vadd.f32 %v3978_v17, %v1242_v1  ;;  %v4475_v11 = vld [vmem:[#allocation43_spill] sm:$0xff] }
 0x669   :  { %v1682_v54 = vmul.f32 %v2267_v4, %v4471_v55  ;;  %v3995_v29 = vpop.eup %2286  ;;  %2312 = vrcp.f32 %v1720_v27  ;;  %v1259_v30 = vmul.f32 %v2273_v52, %v4473_v18  ;;  %v1723_v38 = vadd.f32 %v3972_v0, %v1243_v60  ;;  %v4476_v60 = vld [vmem:[#allocation78_spill] sm:$0xff]  ;;  %v4479_v55 = vld [vmem:[#allocation45_spill] sm:$0xff]  ;;  %v4480_v18 = vld [vmem:[#allocation80_spill] sm:$0xff] }
 0x66a   :  { %v1244_v14 = vadd.f32 1.0, %v2281_v51  ;;  %v3999_v50 = vpop.eup %2288  ;;  %2314 = vpow2.f32 %v1232_v46  ;;  %v4002_v7 = vadd.f32 %v4474_v49, %v1254_v31  ;;  %v1725_v19 = vadd.f32 %v3995_v29, %v1245_v5  ;;  %v4477_v46 = vld [vmem:[#allocation79_spill] sm:$0xff] }
 0x66b   :  { %v1247_v47 = vadd.f32 1.0, %v2283_v25  ;;  %v4005_v8 = vpop.eup %2290  ;;  %v1714_v4 = vmul.f32 1.442695, %v1683_v21  ;;  %v4008_v1 = vadd.f32 %v4475_v11, %v1257_v22  ;;  %2316 = vrcp.f32 %v1721_v2  ;;  %v4482_v11 = vld [vmem:[#allocation82_spill] sm:$0xff] }
 0x66c   :  { %v1246_v52 = vadd.f32 1.0, %v2285_v40  ;;  %v4010_v56 = vpop.eup %2292  ;;  %v1712_v27 = vmul.f32 1.442695, %v1682_v54  ;;  %v1258_v59 = vmul.f32 %v2271_v13, %v4476_v60  ;;  %2318 = vrcp.f32 %v1722_v42  ;;  %v4481_v54 = vld [vmem:[#allocation81_spill] sm:$0xff] }
 0x66d   :  { %v1261_v31 = vmul.f32 %v2275_v28, %v4477_v46  ;;  %v2295_v58 = vpop.eup %2294  ;;  %v4015_v5 = vadd.f32 %v4478_v32, %v1256_v62  ;;  %v4018_v6 = vadd.f32 %v4479_v55, %v1259_v30  ;;  %2320 = vrcp.f32 %v1723_v38  ;;  %v4484_v32 = vld [vmem:[#allocation47_spill] sm:$0xff] }
 0x66e   :  { %v1724_v21 = vadd.f32 %v3999_v50, %v1244_v14  ;;  %v2297_v22 = vpop.eup %2296  ;;  %v1260_v49 = vmul.f32 %v2281_v51, %v4480_v18  ;;  %2322 = vrcp.f32 %v1725_v19  ;;  %v1263_v13 = vmul.f32 %v2283_v25, %v4481_v54  ;;  %v4483_v14 = vld [vmem:[#allocation46_spill] sm:$0xff]  ;;  %v4486_v54 = vld [vmem:[#allocation48_spill] sm:$0xff] }
 0x66f   :  { %v1727_v42 = vadd.f32 %v4005_v8, %v1247_v47  ;;  %v4024_v28 = vpop.eup %2298  ;;  %2324 = vpow2.f32 %v1714_v4  ;;  %v1262_v60 = vmul.f32 %v2285_v40, %v4482_v11  ;;  %v1726_v30 = vadd.f32 %v4010_v56, %v1246_v52  ;;  %v4487_v11 = vld [vmem:[#allocation49_spill] sm:$0xff] }
 0x670   :  { %v2301_v38 = vpop.eup %2300  ;;  %2326 = vpow2.f32 %v1712_v27  ;;  %v4029_v46 = vadd.f32 %v4483_v14, %v1258_v59  ;;  %v4032_v51 = vadd.f32 %v4484_v32, %v1261_v31  ;;  %v1249_v19 = vadd.f32 1.0, %v2295_v58  ;;  %v4488_v32 = vld [vmem:[#allocation11_spill] sm:$0xff] }
 0x671   :  { %v4034_v25 = vpop.eup %2302  ;;  %2328 = vrcp.f32 %v1724_v21  ;;  %v1248_v4 = vadd.f32 1.0, %v2297_v22  ;;  %v4041_v59 = vadd.f32 %v4486_v54, %v1260_v49  ;;  %v4044_v31 = vadd.f32 %v4487_v11, %v1263_v13  ;;  %v4492_v49 = vld [vmem:[#allocation84_spill] sm:$0xff] }
 0x672   :  { %v4038_v18 = vpop.eup %2304  ;;  %2330 = vrcp.f32 %v1727_v42  ;;  %v4055_v54 = vmul.f32 %v2297_v22, %v4492_v49 }
 0x673   :  { %v2307_v14 = vpop.eup %2306  ;;  %2332 = vrcp.f32 %v1726_v30  ;;  %v1729_v13 = vadd.f32 %v4038_v18, %v1249_v19 }
 0x674   :  { %4493 = vst [vmem:[#allocation23_spill] sm:$0xff] %v4055_v54  ;;  %v1251_v19 = vadd.f32 1.0, %v2307_v14 }
 0x675   :  { %2334 = vrcp.f32 %v1729_v13 }
 0x697   :  { %v1403_v2 = vpop.xlane.xlu1 %1402 }
 0x698   :  { %v1404_v62 = vcvt.f32.s32 %v1403_v2  ;;  %v4485_v2 = vld [vmem:[#allocation83_spill] sm:$0xff] }
 0x699   :  { %v1265_v40 = vmul.f32 %v2295_v58, %v4485_v2  ;;  %v4050_v58 = vpop.eup %2308  ;;  %v4491_v2 = vmov 0.0  }
 0x69a   :  { %v1407_v47 = vadd.s32 %v3837_v12, %v1404_v62  ;;  %v1389_v55 = vpop.xlane.xlu0 %1388  ;;  %v4489_v62 = vld [vmem:[#allocation50_spill] sm:$0xff]  ;;  %v2311_v42 = vpop.eup %2310  ;;  %v1728_v30 = vadd.f32 %v4050_v58, %v1248_v4 }
 0x69b   :  { %v1390_v52 = vcvt.f32.s32 %v1389_v55  ;;  %v1431_v27 = vpop.xlane.xlu1 %1430  ;;  %v4048_v21 = vadd.f32 %v4489_v62, %v1262_v60  ;;  %v4494_v60 = vld [vmem:[#allocation51_spill] sm:$0xff] }
 0x69c   :  { %vm1605_vm1 = vcmp.eq.s32.totalorder %v4488_v32, %v1407_v47  ;;  %v1432_v12 = vcvt.f32.s32 %v1431_v27  ;;  %v4061_v62 = vadd.f32 %v4494_v60, %v1265_v40  ;;  %2336 = vrcp.f32 %v1728_v30 }
 0x69d   :  { %4490 = vst [vmem:[#allocation22_spill] sm:$0xff] %v4048_v21  ;;  %v1993_v55 = vsel %vm1605_vm1, 1.0, %v4491_v2  ;;  %v1393_v26 = vadd.s32 %v3845_v10, %v1390_v52  ;;  %v4064_v21 = vpop.eup %2312  ;;  %v4495_v52 = vld [vmem:[#allocation85_spill] sm:$0xff] }
 0x69e   :  { %v1435_v11 = vadd.s32 %v3850_v3, %v1432_v12  ;;  %v1417_v47 = vpop.xlane.xlu0 %1416  ;;  %v1733_v27 = vmul.f32 %v3887_v43, %v1993_v55  ;;  %v4068_v49 = vmul.f32 %v2307_v14, %v4495_v52  ;;  %v4070_v54 = vpop.eup %2314 }
 0x69f   :  { %vm1604_vm2 = vcmp.eq.s32.totalorder %v4488_v32, %v1393_v26  ;;  %v1418_v10 = vcvt.f32.s32 %v1417_v47  ;;  %v1459_v22 = vpop.xlane.xlu1 %1458  ;;  %v2317_v4 = vpop.eup %2316 }
 0x6a0   :  { %4496 = vst [vmem:[#allocation55_spill] sm:$0xff] %v4068_v49  ;;  %v1992_v3 = vsel %vm1604_vm2, 1.0, %v4491_v2  ;;  %vm1607_vm3 = vcmp.eq.s32.totalorder %v4488_v32, %v1435_v11  ;;  %v1460_v43 = vcvt.f32.s32 %v1459_v22  ;;  %v1749_v40 = vadd.f32 %v1733_v27, %v3970_v37  ;;  %v4078_v47 = vpop.eup %2318 }
 0x6a1   :  { %v1995_v12 = vsel %vm1607_vm3, 1.0, %v4491_v2  ;;  %v1421_v26 = vadd.s32 %v3854_v23, %v1418_v10  ;;  %v1732_v55 = vmul.f32 %v3900_v20, %v1992_v3  ;;  %v2321_v11 = vpop.eup %2320  ;;  %v1250_v23 = vadd.f32 1.0, %v4070_v54 }
 0x6a2   :  { %v1735_v14 = vmul.f32 %v3920_v41, %v1995_v12  ;;  %v1463_v60 = vadd.s32 %v3856_v15, %v1460_v43  ;;  %v1445_v52 = vpop.xlane.xlu0 %1444  ;;  %v1797_v49 = vmul.f32 %v2301_v38, %v1749_v40  ;;  %v4085_v20 = vpop.eup %2322 }
 0x6a3   :  { %vm1606_vm4 = vcmp.eq.s32.totalorder %v4488_v32, %v1421_v26  ;;  %v1446_v37 = vcvt.f32.s32 %v1445_v52  ;;  %v1487_v27 = vpop.xlane.xlu1 %1486  ;;  %v1748_v22 = vadd.f32 %v1732_v55, %v3975_v48  ;;  %v4090_v38 = vpop.eup %2324 }
 0x6a4   :  { %v1994_v13 = vsel %vm1606_vm4, 1.0, %v4491_v2  ;;  %vm1609_vm5 = vcmp.eq.s32.totalorder %v4488_v32, %v1463_v60  ;;  %v1488_v41 = vcvt.f32.s32 %v1487_v27  ;;  %v1751_v15 = vadd.f32 %v1735_v14, %v3983_v53  ;;  %v4096_v43 = vpop.eup %2326 }
 0x6a5   :  { %v1734_v30 = vmul.f32 %v3931_v63, %v1994_v13  ;;  %v1997_v10 = vsel %vm1609_vm5, 1.0, %v4491_v2  ;;  %v1449_v3 = vadd.s32 %v3865_v34, %v1446_v37  ;;  %v1796_v48 = vmul.f32 %v4024_v28, %v1748_v22  ;;  %v4101_v14 = vpop.eup %2328 }
 0x6a6   :  { %v1737_v40 = vmul.f32 %v3940_v33, %v1997_v10  ;;  %v1491_v12 = vadd.s32 %v3867_v61, %v1488_v41  ;;  %v1473_v26 = vpop.xlane.xlu0 %1472  ;;  %v1799_v55 = vmul.f32 %v2311_v42, %v1751_v15  ;;  %v1731_v53 = vadd.f32 %v4090_v38, %v1251_v19  ;;  %v4105_v28 = vpop.eup %2330 }
 0x6a7   :  { %vm1608_vm6 = vcmp.eq.s32.totalorder %v4488_v32, %v1449_v3  ;;  %v1474_v63 = vcvt.f32.s32 %v1473_v26  ;;  %v1515_v60 = vpop.xlane.xlu1 %1514  ;;  %v1812_v52 = vpack.c.bf16 %v1797_v49, %v1796_v48  ;;  %v1750_v34 = vadd.f32 %v1734_v30, %v4002_v7  ;;  %v4110_v42 = vpop.eup %2332 }
 0x6a8   :  { %v1996_v37 = vsel %vm1608_vm6, 1.0, %v4491_v2  ;;  %vm1611_vm7 = vcmp.eq.s32.totalorder %v4488_v32, %v1491_v12  ;;  %v1516_v61 = vcvt.f32.s32 %v1515_v60  ;;  %v1753_v33 = vadd.f32 %v1737_v40, %v4008_v1  ;;  %v2335_v40 = vpop.eup %2334 }
 0x6a9   :  { %v1736_v19 = vmul.f32 %v3958_v39, %v1996_v37  ;;  %v1999_v27 = vsel %vm1611_vm7, 1.0, %v4491_v2  ;;  %v1477_v22 = vadd.s32 %v3882_v36, %v1474_v63  ;;  %2128 = vmatprep.mubr.bf16.mxu1 %v1812_v52  ;;  %v1798_v7 = vmul.f32 %v4034_v25, %v1750_v34  ;;  %v4130_v63 = vpop.eup %2336 }
 0x6aa   :  { %v1739_v49 = vmul.f32 %v3972_v0, %v1999_v27  ;;  %v1519_v13 = vadd.s32 %v3895_v45, %v1516_v61  ;;  %v1501_v41 = vpop.xlane.xlu0 %1500  ;;  %v1801_v15 = vmul.f32 %v2317_v4, %v1753_v33  ;;  %v1730_v30 = vadd.f32 %v4096_v43, %v1250_v23 }
 0x6ab   :  { %vm1610_vm8 = vcmp.eq.s32.totalorder %v4488_v32, %v1477_v22  ;;  %v1502_v1 = vcvt.f32.s32 %v1501_v41  ;;  %v1543_v10 = vpop.xlane.xlu1 %1542  ;;  %v1813_v39 = vpack.c.bf16 %v1799_v55, %v1798_v7  ;;  %v1752_v3 = vadd.f32 %v1736_v19, %v4015_v5 }
 0x6ac   :  { %v1998_v36 = vsel %vm1610_vm8, 1.0, %v4491_v2  ;;  %vm1613_vm9 = vcmp.eq.s32.totalorder %v4488_v32, %v1519_v13  ;;  %v1544_v25 = vcvt.f32.s32 %v1543_v10  ;;  %v1755_v0 = vadd.f32 %v1739_v49, %v4018_v6  ;;  %v4499_v10 = vld [vmem:[#allocation22_spill] sm:$0xff] }
 0x6ad   :  { %v1738_v45 = vmul.f32 %v3978_v17, %v1998_v36  ;;  %v2001_v4 = vsel %vm1613_vm9, 1.0, %v4491_v2  ;;  %v1505_v23 = vadd.s32 %v3902_v16, %v1502_v1  ;;  %2129 = vmatmul.mubr.bf16.vlgmr.msra.gmra.mxu1 %v1813_v39  ;;  %v1800_v48 = vmul.f32 %v4064_v21, %v1752_v3  ;;  %v4501_v36 = vld [vmem:[#allocation21_spill] sm:$0xff] }
 0x6ae   :  { %v1741_v12 = vmul.f32 %v3995_v29, %v2001_v4  ;;  %v1547_v5 = vadd.s32 %v3911_v24, %v1544_v25  ;;  %v1529_v26 = vpop.xlane.xlu0 %1528  ;;  %v1803_v55 = vmul.f32 %v2321_v11, %v1755_v0  ;;  %2338 = vrcp.f32 %v1731_v53 }
 0x6af   :  { %vm1612_vm10 = vcmp.eq.s32.totalorder %v4488_v32, %v1505_v23  ;;  %v1530_v17 = vcvt.f32.s32 %v1529_v26  ;;  %v1571_v6 = vpop.xlane.xlu1 %1570  ;;  %v1814_v60 = vpack.c.bf16 %v1801_v15, %v1800_v48  ;;  %v1754_v16 = vadd.f32 %v1738_v45, %v4029_v46  ;;  %v4497_v15 = vld [vmem:[#allocation23_spill] sm:$0xff] }
 0x6b0   :  { %v2000_v52 = vsel %vm1612_vm10, 1.0, %v4491_v2  ;;  %vm1615_vm11 = vcmp.eq.s32.totalorder %v4488_v32, %v1547_v5  ;;  %v1572_v21 = vcvt.f32.s32 %v1571_v6  ;;  %v1757_v29 = vadd.f32 %v1741_v12, %v4032_v51  ;;  %v4502_v48 = vld [vmem:[#allocation55_spill] sm:$0xff]  ;;  %v4503_v12 = vld [vmem:[#allocation53_spill] sm:$0xff] }
 0x6b1   :  { %v1740_v24 = vmul.f32 %v3999_v50, %v2000_v52  ;;  %v2003_v11 = vsel %vm1615_vm11, 1.0, %v4491_v2  ;;  %v1533_v53 = vadd.s32 %v3926_v35, %v1530_v17  ;;  %2132 = vmatprep.mubr.bf16.mxu1 %v1814_v60  ;;  %v1802_v34 = vmul.f32 %v4078_v47, %v1754_v16 }
 0x6b2   :  { %v1743_v37 = vmul.f32 %v4005_v8, %v2003_v11  ;;  %v1575_v46 = vadd.s32 %v3935_v44, %v1572_v21  ;;  %v1557_v61 = vpop.xlane.xlu0 %1556  ;;  %v1805_v33 = vmul.f32 %v4085_v20, %v1757_v29  ;;  %2340 = vrcp.f32 %v1730_v30  ;;  %v4498_v30 = vld [vmem:[#allocation52_spill] sm:$0xff] }
 0x6b3   :  { %vm1614_vm12 = vcmp.eq.s32.totalorder %v4488_v32, %v1533_v53  ;;  %v1558_v51 = vcvt.f32.s32 %v1557_v61  ;;  %v1599_v19 = vpop.xlane.xlu1 %1598  ;;  %v1815_v50 = vpack.c.bf16 %v1803_v55, %v1802_v34  ;;  %v1756_v27 = vadd.f32 %v1740_v24, %v4041_v59  ;;  %v4504_v55 = vld [vmem:[#allocation54_spill] sm:$0xff] }
 0x6b4   :  { %v2002_v35 = vsel %vm1614_vm12, 1.0, %v4491_v2  ;;  %vm1617_vm13 = vcmp.eq.s32.totalorder %v4488_v32, %v1575_v46  ;;  %v1600_v47 = vcvt.f32.s32 %v1599_v19  ;;  %v1759_v8 = vadd.f32 %v1743_v37, %v4044_v31 }
 0x6b5   :  { %v1742_v44 = vmul.f32 %v4010_v56, %v2002_v35  ;;  %v2005_v22 = vsel %vm1617_vm13, 1.0, %v4491_v2  ;;  %v1561_v20 = vadd.s32 %v3938_v57, %v1558_v51  ;;  %2133 = vmatmul.mubr.bf16.gmra.mxu1 %v1815_v50  ;;  %v1804_v7 = vmul.f32 %v4101_v14, %v1756_v27  ;;  %v4500_v14 = vld [vmem:[#allocation86_spill] sm:$0xff] }
 0x6b6   :  { %v1745_v49 = vmul.f32 %v4038_v18, %v2005_v22  ;;  %v1603_v59 = vadd.s32 %v3946_v9, %v1600_v47  ;;  %v1585_v13 = vpop.xlane.xlu0 %1584  ;;  %v1807_v41 = vmul.f32 %v4105_v28, %v1759_v8  ;;  %v1280_v1 = vadd.f32 %v4498_v30, %v4497_v15 }
 0x6b7   :  { %vm1616_vm14 = vcmp.eq.s32.totalorder %v4488_v32, %v1561_v20  ;;  %v1586_v56 = vcvt.f32.s32 %v1585_v13  ;;  %v1816_v31 = vpack.c.bf16 %v1805_v33, %v1804_v7  ;;  %v1758_v39 = vadd.f32 %v1742_v44, %v4499_v10 }
 0x6b8   :  { %v2004_v57 = vsel %vm1616_vm14, 1.0, %v4491_v2  ;;  %vm1619_vm15 = vcmp.eq.s32.totalorder %v4488_v32, %v1603_v59  ;;  %v1266_v18 = vmul.f32 %v4070_v54, %v4500_v14  ;;  %v1761_v9 = vadd.f32 %v1745_v49, %v4061_v62 }
 0x6b9   :  { %v1744_v28 = vmul.f32 %v4050_v58, %v2004_v57  ;;  %v2007_v3 = vsel %vm1619_vm15, 1.0, %v4491_v2  ;;  %v1589_v25 = vadd.s32 %v4501_v36, %v1586_v56  ;;  %2136 = vmatprep.mubr.bf16.mxu1 %v1816_v31  ;;  %v1806_v0 = vmul.f32 %v4110_v42, %v1758_v39 }
 0x6ba   :  { %v1747_v45 = vmul.f32 %v4090_v38, %v2007_v3  ;;  %v1809_v4 = vmul.f32 %v2335_v40, %v1761_v9  ;;  %v1283_v5 = vadd.f32 %v4503_v12, %v4502_v48  ;;  %v1282_v17 = vadd.f32 %v4504_v55, %v1266_v18 }
 0x6bb   :  { %v2339_v23 = vpop.eup %2338  ;;  %vm1618_vm0 = vcmp.eq.s32.totalorder %v4488_v32, %v1589_v25  ;;  %v1817_v54 = vpack.c.bf16 %v1807_v41, %v1806_v0  ;;  %v1760_v62 = vadd.f32 %v1744_v28, %v1280_v1 }
 0x6bc   :  { %v2006_v58 = vsel %vm1618_vm0, 1.0, %v4491_v2  ;;  %v1763_v26 = vadd.f32 %v1747_v45, %v1283_v5 }
 0x6bd   :  { %v1746_v6 = vmul.f32 %v4096_v43, %v2006_v58  ;;  %2137 = vmatmul.mubr.bf16.gmra.mxu1 %v1817_v54  ;;  %v1808_v42 = vmul.f32 %v4130_v63, %v1760_v62 }
 0x6be   :  { %v1811_v52 = vmul.f32 %v2339_v23, %v1763_v26 }
 0x6bf   :  { %v2341_v38 = vpop.eup %2340  ;;  %v1762_v40 = vadd.f32 %v1746_v6, %v1282_v17  ;;  %v1818_v60 = vpack.c.bf16 %v1809_v4, %v1808_v42 }
 0x6c1   :  { %2140 = vmatprep.mubr.bf16.mxu1 %v1818_v60  ;;  %v1810_v16 = vmul.f32 %v2341_v38, %v1762_v40 }
 0x6c3   :  { %v1819_v21 = vpack.c.bf16 %v1811_v52, %v1810_v16 }
 0x6c5   :  { %2141 = vmatmul.mubr.bf16.gmra.mxu1 %v1819_v21 }
 0x76d   :  { %v2130_v32 = vpop.f32.mrf.mxu1 }
 0x76e   :  { %1927 = vst [vmem:[#allocation7 + $0x10] sm:$0xff] %v2130_v32 }
 0x76f   :  { %v1862_v29 = vpop.f32.mrf.mxu1 }
 0x770   :  { %1925 = vst [vmem:[#allocation7] sm:$0xff] %v1862_v29 }
 0x771   :  { %v2131_v2 = vpop.f32.mrf.mxu1 }
 0x772   :  { %1928 = vst [vmem:[#allocation7 + $0x18] sm:$0xff] %v2131_v2 }
 0x773   :  { %v1865_v24 = vpop.f32.mrf.mxu1 }
 0x774   :  { %1926 = vst [vmem:[#allocation7 + $0x8] sm:$0xff] %v1865_v24 }
 0x775   :  { %v2134_v43 = vpop.f32.mrf.mxu1 }
 0x776   :  { %1931 = vst [vmem:[#allocation7 + $0x30] sm:$0xff] %v2134_v43 }
 0x777   :  { %v1878_v11 = vpop.f32.mrf.mxu1 }
 0x778   :  { %1929 = vst [vmem:[#allocation7 + $0x20] sm:$0xff] %v1878_v11 }
 0x779   :  { %v2135_v63 = vpop.f32.mrf.mxu1 }
 0x77a   :  { %1932 = vst [vmem:[#allocation7 + $0x38] sm:$0xff] %v2135_v63 }
 0x77b   :  { %v1881_v53 = vpop.f32.mrf.mxu1 }
 0x77c   :  { %1930 = vst [vmem:[#allocation7 + $0x28] sm:$0xff] %v1881_v53 }
 0x77d   :  { %v2138_v34 = vpop.f32.mrf.mxu1 }
 0x77e   :  { %1935 = vst [vmem:[#allocation7 + $0x50] sm:$0xff] %v2138_v34 }
 0x77f   :  { %v1894_v37 = vpop.f32.mrf.mxu1 }
 0x780   :  { %1933 = vst [vmem:[#allocation7 + $0x40] sm:$0xff] %v1894_v37 }
 0x781   :  { %v2139_v46 = vpop.f32.mrf.mxu1 }
 0x782   :  { %1936 = vst [vmem:[#allocation7 + $0x58] sm:$0xff] %v2139_v46 }
 0x783   :  { %v1897_v61 = vpop.f32.mrf.mxu1 }
 0x784   :  { %1934 = vst [vmem:[#allocation7 + $0x48] sm:$0xff] %v1897_v61 }
 0x785   :  { %v2142_v33 = vpop.f32.mrf.mxu1 }
 0x786   :  { %1939 = vst [vmem:[#allocation7 + $0x70] sm:$0xff] %v2142_v33 }
 0x787   :  { %v1910_v51 = vpop.f32.mrf.mxu1 }
 0x788   :  { %1937 = vst [vmem:[#allocation7 + $0x60] sm:$0xff] %v1910_v51 }
 0x789   :  { %v2143_v19 = vpop.f32.mrf.mxu1 }
 0x78a   :  { %1940 = vst [vmem:[#allocation7 + $0x78] sm:$0xff] %v2143_v19 }
 0x78b   :  { %v1913_v50 = vpop.f32.mrf.mxu1 }
 0x78c   :  { %1938 = vst [vmem:[#allocation7 + $0x68] sm:$0xff] %v1913_v50 }
 0x78d   :  { %2409 = shalt.err (!%p2406_p0)
}
 0x78e   :  { %1952 = dma.vmem_to_hbm [thread:$0]  %s1947_s1, 2048, %s4185_s2, [#allocation4], %s2426_s18, %s2426_s18, %s2427_s19  }
 0x78f   :  { %2422 = dma.done.wait [#allocation4], 2048  }
 0x790   :  { %2423 = vsyncadd [#allocation4], 4294965248 }
 0x791   :  { %1956 = vsyncpa [#allocation3], 1 }
 0x792   :  { %1957 = vsyncpa [#allocation6], 1 }
 0x793   :  { %1958 = vsyncpa [#allocation4], 1 }

// kernel: tpu_custom_call.1
= control target key start
LH: loop header
LB: loop body
LE: loop exit
PB: predicated region body
PF: predicated region fallthrough
CT: control target
= control target key end

     0   :  { %7 = vsyncpa [#allocation3], 0  ;;  %s4183_s0 = inlined_call_operand.hbm [shape: f32[1,128], index: 0, kind: input, shape index: {}]   ;;  %s4184_s1 = inlined_call_operand.hbm [shape: f32[128,128], index: 1, kind: input, shape index: {}]   ;;  %s4185_s2 = inlined_call_operand.hbm [shape: f32[128,128], index: 2, kind: output, shape index: {}]  }
   0x1   :  { %8 = vsyncpa [#allocation6], 0 }
   0x2   :  { %9 = vsyncpa [#allocation4], 0  ;;  %s2424_s9 = smov [#allocation2]   ;;  %s2425_s11 = smov [#allocation5]  }
   0x3   :  { %s16_s10 = sshll.u32 %s2424_s9, 4  ;;  %s25_s12 = sshll.u32 %s2425_s11, 4  ;;  %s17_s10 = int_to_ptr.vmem [resolvable:$true] %s16_s10  ;;  %s26_s12 = int_to_ptr.vmem [resolvable:$true] %s25_s12 }
   0x4   :  { %s2366_s13 = scalar_lea.vmem %s17_s10, 16  ;;  %s2370_s14 = scalar_lea.vmem %s17_s10, 32 }
   0x5   :  { %p2367_p0 = scmp.ne.s32.totalorder %s17_s10, %s2366_s13  ;;  %p2371_p1 = scmp.lt.s32.totalorder %s17_s10, %s17_s10 }
   0x6   :  { %p2372_p2 = scmp.lt.s32.totalorder %s2370_s14, %s2366_s13 }
   0x8   :  { %p2373_p3 = por %p2372_p2, %p2371_p1 }
   0xa   :  { %p2374_p4 = pnand %p2373_p3, %p2367_p0 }
   0xc   :  { %2377 = shalt.err (!%p2374_p4)
}
   0xd   :  { %19 = dma.hbm_to_vmem [thread:$0]  %s4183_s0, 16, %s17_s10, [#allocation3]  }
   0xe   :  { %s2386_s17 = scalar_lea.vmem %s26_s12, 2048  ;;  %p2391_p6 = scmp.lt.s32.totalorder %s26_s12, %s26_s12 }
   0xf   :  { %p2387_p5 = scmp.ne.s32.totalorder %s26_s12, %s2386_s17  ;;  %p2392_p7 = scmp.lt.s32.totalorder %s2386_s17, %s2386_s17 }
  0x11   :  { %p2393_p8 = por %p2392_p7, %p2391_p6 }
  0x13   :  { %p2394_p9 = pnand %p2393_p8, %p2387_p5 }
  0x15   :  { %2397 = shalt.err (!%p2394_p9)
}
  0x16   :  { %s2426_s18 = smov 128   ;;  %s2427_s19 = smov 8  }
  0x17   :  { %31 = dma.hbm_to_vmem [thread:$0]  %s4184_s1, 2048, %s26_s12, [#allocation6], %s2426_s18, %s2426_s18, %s2427_s19  }
  0x18   :  { %2418 = dma.done.wait [#allocation3], 16  }
  0x19   :  { %2419 = vsyncadd [#allocation3], 4294967280 }
  0x1a   :  { %2420 = dma.done.wait [#allocation6], 2048  }
  0x1b   :  { %2421 = vsyncadd [#allocation6], 4294965248  ;;  %v2454_v0 = vld [vmem:[#allocation5] sm:$0xff]  ;;  %v2456_v1 = vld [vmem:[#allocation5 + $0x10] sm:$0xff]  ;;  %s2429_s0 = smov [#allocation7]  }
  0x1c   :  { %v2458_v2 = vld [vmem:[#allocation5 + $0x8] sm:$0xff]  ;;  %v74_v3 = vmul.f32 %v2454_v0, %v2454_v0  ;;  %v76_v4 = vmul.f32 %v2456_v1, %v2456_v1  ;;  %v2464_v5 = vld [vmem:[#allocation5 + $0x18] sm:$0xff]  ;;  %v2470_v8 = vld [vmem:[#allocation5 + $0x20] sm:$0xff]  ;;  %s1946_s1 = sshll.u32 %s2429_s0, 4  ;;  %s1947_s1 = int_to_ptr.vmem [resolvable:$true] %s1946_s1 }
  0x1d   :  { %v75_v6 = vmul.f32 %v2458_v2, %v2458_v2  ;;  %v77_v7 = vmul.f32 %v2464_v5, %v2464_v5  ;;  %v2472_v9 = vld [vmem:[#allocation5 + $0x28] sm:$0xff]  ;;  %v2474_v10 = vld [vmem:[#allocation5 + $0x78] sm:$0xff]  ;;  %v78_v11 = vmul.f32 %v2470_v8, %v2470_v8  ;;  %v2481_v13 = vld [vmem:[#allocation5 + $0x30] sm:$0xff]  ;;  %s2398_s22 = scalar_lea.vmem %s1947_s1, 2048  ;;  %p2403_p11 = scmp.lt.s32.totalorder %s1947_s1, %s1947_s1 }
  0x1e   :  { %90 = vadd.xlane.f32.xlu0 %v74_v3  ;;  %94 = vadd.xlane.f32.xlu1 %v76_v4  ;;  %v79_v12 = vmul.f32 %v2472_v9, %v2472_v9  ;;  %v2483_v14 = vld [vmem:[#allocation5 + $0x38] sm:$0xff]  ;;  %v2485_v15 = vld [vmem:[#allocation5 + $0x70] sm:$0xff]  ;;  %v80_v16 = vmul.f32 %v2481_v13, %v2481_v13  ;;  %v2493_v18 = vld [vmem:[#allocation5 + $0x40] sm:$0xff]  ;;  %v89_v31 = vmul.f32 %v2474_v10, %v2474_v10  ;;  %p2399_p10 = scmp.ne.s32.totalorder %s1947_s1, %s2398_s22  ;;  %p2404_p12 = scmp.lt.s32.totalorder %s2398_s22, %s2398_s22 }
  0x1f   :  { %2056 = vmatprep.subr.mxu0 %v2474_v10  ;;  %v81_v17 = vmul.f32 %v2483_v14, %v2483_v14  ;;  %v2495_v19 = vld [vmem:[#allocation5 + $0x48] sm:$0xff]  ;;  %v82_v21 = vmul.f32 %v2493_v18, %v2493_v18  ;;  %v2505_v23 = vld [vmem:[#allocation5 + $0x50] sm:$0xff]  ;;  %v2507_v24 = vld [vmem:[#allocation5 + $0x58] sm:$0xff]  ;;  %v88_v30 = vmul.f32 %v2485_v15, %v2485_v15 }
  0x20   :  { %2057 = vmatpush3.xpose.msra.mxu0 %v2474_v10  ;;  %v2497_v20 = vld [vmem:[#allocation5 + $0x68] sm:$0xff]  ;;  %v83_v22 = vmul.f32 %v2495_v19, %v2495_v19  ;;  %v2509_v25 = vld [vmem:[#allocation5 + $0x60] sm:$0xff]  ;;  %v84_v26 = vmul.f32 %v2505_v23, %v2505_v23  ;;  %v85_v27 = vmul.f32 %v2507_v24, %v2507_v24  ;;  %p2405_p13 = por %p2404_p12, %p2403_p11 }
  0x21   :  { %2058 = vmatprep.subr.mxu0 %v2485_v15  ;;  %v86_v28 = vmul.f32 %v2509_v25, %v2509_v25  ;;  %v87_v29 = vmul.f32 %v2497_v20, %v2497_v20 }
  0x22   :  { %92 = vadd.xlane.f32.xlu0 %v75_v6  ;;  %96 = vadd.xlane.f32.xlu1 %v77_v7  ;;  %p2406_p0 = pnand %p2405_p13, %p2399_p10 }
  0x24   :  { %2059 = vmatpush3.xpose.msra.mxu0 %v2485_v15 }
  0x25   :  { %2060 = vmatprep.subr.mxu0 %v2497_v20 }
  0x26   :  { %98 = vadd.xlane.f32.xlu0 %v78_v11  ;;  %100 = vadd.xlane.f32.xlu1 %v79_v12 }
  0x28   :  { %2061 = vmatpush3.xpose.msra.mxu0 %v2497_v20 }
  0x29   :  { %2062 = vmatprep.subr.mxu0 %v2509_v25 }
  0x2a   :  { %102 = vadd.xlane.f32.xlu0 %v80_v16  ;;  %104 = vadd.xlane.f32.xlu1 %v81_v17 }
  0x2c   :  { %2063 = vmatpush3.xpose.msra.mxu0 %v2509_v25 }
  0x2d   :  { %2064 = vmatprep.subr.mxu0 %v2507_v24 }
  0x2e   :  { %106 = vadd.xlane.f32.xlu0 %v82_v21  ;;  %108 = vadd.xlane.f32.xlu1 %v83_v22 }
  0x30   :  { %2065 = vmatpush3.xpose.msra.mxu0 %v2507_v24 }
  0x31   :  { %2066 = vmatprep.subr.mxu0 %v2505_v23 }
  0x32   :  { %110 = vadd.xlane.f32.xlu0 %v84_v26  ;;  %112 = vadd.xlane.f32.xlu1 %v85_v27 }
  0x34   :  { %2067 = vmatpush3.xpose.msra.mxu0 %v2505_v23 }
  0x35   :  { %2068 = vmatprep.subr.mxu0 %v2495_v19 }
  0x36   :  { %114 = vadd.xlane.f32.xlu0 %v86_v28  ;;  %116 = vadd.xlane.f32.xlu1 %v87_v29 }
  0x38   :  { %2069 = vmatpush3.xpose.msra.mxu0 %v2495_v19 }
  0x39   :  { %2070 = vmatprep.subr.mxu0 %v2493_v18 }
  0x3a   :  { %118 = vadd.xlane.f32.xlu0 %v88_v30  ;;  %120 = vadd.xlane.f32.xlu1 %v89_v31 }
  0x3c   :  { %2071 = vmatpush3.xpose.msra.mxu0 %v2493_v18 }
  0x3d   :  { %2072 = vmatprep.subr.mxu0 %v2483_v14 }
  0x40   :  { %2073 = vmatpush3.xpose.msra.mxu0 %v2483_v14 }
  0x41   :  { %2074 = vmatprep.subr.mxu0 %v2481_v13 }
  0x44   :  { %2075 = vmatpush3.xpose.msra.mxu0 %v2481_v13 }
  0x45   :  { %2076 = vmatprep.subr.mxu0 %v2472_v9 }
  0x48   :  { %2077 = vmatpush3.xpose.msra.mxu0 %v2472_v9 }
  0x49   :  { %2078 = vmatprep.subr.mxu0 %v2470_v8 }
  0x4c   :  { %2079 = vmatpush3.xpose.msra.mxu0 %v2470_v8 }
  0x4d   :  { %2080 = vmatprep.subr.mxu0 %v2464_v5 }
  0x50   :  { %2081 = vmatpush3.xpose.msra.mxu0 %v2464_v5 }
  0x51   :  { %2082 = vmatprep.subr.mxu0 %v2456_v1 }
  0x54   :  { %2083 = vmatpush3.xpose.msra.mxu0 %v2456_v1 }
  0x55   :  { %2084 = vmatprep.subr.mxu0 %v2458_v2 }
  0x58   :  { %2085 = vmatpush3.xpose.msra.mxu0 %v2458_v2 }
  0x59   :  { %2086 = vmatprep.subr.mxu0 %v2454_v0 }
  0x5c   :  { %2087 = vmatpush3.xpose.msra.mxu0 %v2454_v0 }
  0xa7   :  { %v91_v32 = vpop.xlane.xlu0 %90  ;;  %v95_v33 = vpop.xlane.xlu1 %94 }
  0xa8   :  { %v122_v34 = vadd.f32 3.2e-05, %v91_v32  ;;  %v124_v35 = vadd.f32 3.2e-05, %v95_v33 }
  0xaa   :  { %2150 = vrsqrt.f32 %v122_v34 }
  0xab   :  { %2152 = vrsqrt.f32 %v124_v35  ;;  %v93_v36 = vpop.xlane.xlu0 %92  ;;  %v97_v37 = vpop.xlane.xlu1 %96 }
  0xac   :  { %v123_v38 = vadd.f32 3.2e-05, %v93_v36  ;;  %v125_v39 = vadd.f32 3.2e-05, %v97_v37 }
  0xae   :  { %2154 = vrsqrt.f32 %v123_v38  ;;  %v2568_v38 = vld [vmem:[#allocation2] ss:$0 sm:$0xff] }
  0xaf   :  { %2156 = vrsqrt.f32 %v125_v39  ;;  %v99_v40 = vpop.xlane.xlu0 %98  ;;  %v101_v41 = vpop.xlane.xlu1 %100 }
  0xb0   :  { %v126_v42 = vadd.f32 3.2e-05, %v99_v40  ;;  %v127_v43 = vadd.f32 3.2e-05, %v101_v41 }
  0xb2   :  { %2158 = vrsqrt.f32 %v126_v42 }
  0xb3   :  { %2160 = vrsqrt.f32 %v127_v43  ;;  %v103_v44 = vpop.xlane.xlu0 %102  ;;  %v105_v45 = vpop.xlane.xlu1 %104 }
  0xb4   :  { %v128_v46 = vadd.f32 3.2e-05, %v103_v44  ;;  %v129_v47 = vadd.f32 3.2e-05, %v105_v45 }
  0xb6   :  { %2162 = vrsqrt.f32 %v128_v46 }
  0xb7   :  { %v2151_v48 = vpop.eup %2150  ;;  %2164 = vrsqrt.f32 %v129_v47  ;;  %v107_v49 = vpop.xlane.xlu0 %106 }
  0xb8   :  { %v109_v50 = vpop.xlane.xlu1 %108  ;;  %v2153_v51 = vpop.eup %2152  ;;  %v154_v52 = vmul.f32 %v2151_v48, %v2454_v0  ;;  %v130_v53 = vadd.f32 3.2e-05, %v107_v49 }
  0xb9   :  { %v131_v54 = vadd.f32 3.2e-05, %v109_v50  ;;  %v156_v58 = vmul.f32 %v2153_v51, %v2456_v1 }
  0xba   :  { %2088 = vmatprep.mubr.f32.mxu0 %v154_v52  ;;  %2166 = vrsqrt.f32 %v130_v53 }
  0xbb   :  { %v2155_v55 = vpop.eup %2154  ;;  %2168 = vrsqrt.f32 %v131_v54  ;;  %v111_v56 = vpop.xlane.xlu0 %110 }
  0xbc   :  { %v113_v57 = vpop.xlane.xlu1 %112  ;;  %v2157_v59 = vpop.eup %2156  ;;  %v132_v60 = vadd.f32 3.2e-05, %v111_v56  ;;  %v155_v61 = vmul.f32 %v2155_v55, %v2458_v2 }
  0xbd   :  { %v133_v62 = vadd.f32 3.2e-05, %v113_v57  ;;  %v157_v63 = vmul.f32 %v2157_v59, %v2464_v5 }
  0xbe   :  { %2170 = vrsqrt.f32 %v132_v60  ;;  %2089 = vmatmul.mubr.f32.vlgmr.msra.gmra.mxu0 %v155_v61 }
  0xbf   :  { %v2159_v0 = vpop.eup %2158  ;;  %2172 = vrsqrt.f32 %v133_v62  ;;  %2091 = vmatprep.mubr.f32.mxu0 %v156_v58  ;;  %v115_v3 = vpop.xlane.xlu0 %114 }
  0xc0   :  { %v117_v4 = vpop.xlane.xlu1 %116  ;;  %v2161_v6 = vpop.eup %2160  ;;  %v134_v7 = vadd.f32 3.2e-05, %v115_v3  ;;  %v158_v12 = vmul.f32 %v2159_v0, %v2470_v8 }
  0xc1   :  { %v135_v11 = vadd.f32 3.2e-05, %v117_v4  ;;  %v159_v1 = vmul.f32 %v2161_v6, %v2472_v9 }
  0xc2   :  { %2174 = vrsqrt.f32 %v134_v7  ;;  %2092 = vmatmul.mubr.f32.gmra.mxu0 %v157_v63 }
  0xc3   :  { %v2163_v2 = vpop.eup %2162  ;;  %2176 = vrsqrt.f32 %v135_v11  ;;  %2094 = vmatprep.mubr.f32.mxu0 %v158_v12  ;;  %v119_v16 = vpop.xlane.xlu0 %118 }
  0xc4   :  { %v121_v17 = vpop.xlane.xlu1 %120  ;;  %v2165_v5 = vpop.eup %2164  ;;  %v136_v21 = vadd.f32 3.2e-05, %v119_v16  ;;  %v160_v26 = vmul.f32 %v2163_v2, %v2481_v13 }
  0xc5   :  { %v137_v22 = vadd.f32 3.2e-05, %v121_v17  ;;  %v161_v27 = vmul.f32 %v2165_v5, %v2483_v14 }
  0xc6   :  { %2178 = vrsqrt.f32 %v136_v21  ;;  %2095 = vmatmul.mubr.f32.gmra.mxu0 %v159_v1 }
  0xc7   :  { %v2167_v28 = vpop.eup %2166  ;;  %2180 = vrsqrt.f32 %v137_v22  ;;  %2097 = vmatprep.mubr.f32.mxu0 %v160_v26 }
  0xc8   :  { %v2169_v8 = vpop.eup %2168  ;;  %v162_v9 = vmul.f32 %v2167_v28, %v2493_v18 }
  0xc9   :  { %v163_v29 = vmul.f32 %v2169_v8, %v2495_v19 }
  0xca   :  { %2098 = vmatmul.mubr.f32.gmra.mxu0 %v161_v27 }
  0xcb   :  { %v2171_v30 = vpop.eup %2170  ;;  %2100 = vmatprep.mubr.f32.mxu0 %v162_v9 }
  0xcc   :  { %v2173_v31 = vpop.eup %2172  ;;  %v164_v32 = vmul.f32 %v2171_v30, %v2505_v23  ;;  %v337_v23 = vlaneseq }
  0xcd   :  { %v165_v13 = vmul.f32 %v2173_v31, %v2507_v24 }
  0xce   :  { %2101 = vmatmul.mubr.f32.gmra.mxu0 %v163_v29  ;;  %v2566_v24 = vand.u32 127, %v337_v23 }
  0xcf   :  { %v2175_v33 = vpop.eup %2174  ;;  %2103 = vmatprep.mubr.f32.mxu0 %v164_v32 }
  0xd0   :  { %v2177_v14 = vpop.eup %2176  ;;  %v166_v34 = vmul.f32 %v2175_v33, %v2509_v25  ;;  %4303 = vst [vmem:[#allocation11_spill] sm:$0xff] %v2566_v24  ;;  %vm339_vm0 = vcmp.lt.s32.totalorder %v2566_v24, 8 }
  0xd1   :  { %v167_v35 = vmul.f32 %v2177_v14, %v2497_v20 }
  0xd2   :  { %2104 = vmatmul.mubr.f32.gmra.mxu0 %v165_v13 }
  0xd3   :  { %v2179_v18 = vpop.eup %2178  ;;  %2106 = vmatprep.mubr.f32.mxu0 %v166_v34 }
  0xd4   :  { %v2181_v36 = vpop.eup %2180  ;;  %v168_v19 = vmul.f32 %v2179_v18, %v2485_v15 }
  0xd5   :  { %v169_v37 = vmul.f32 %v2181_v36, %v2474_v10 }
  0xd6   :  { %2107 = vmatmul.mubr.f32.gmra.mxu0 %v167_v35 }
  0xd7   :  { %2109 = vmatprep.mubr.f32.mxu0 %v168_v19 }
  0xda   :  { %2110 = vmatmul.mubr.f32.gmra.mxu0 %v169_v37 }
 0x17e   :  { %v2090_v39 = vpop.f32.mrf.mxu0 }
 0x17f   :  { %v322_v20 = vmul.f32 %v2090_v39, %v2568_v38 }
 0x180   :  { %v236_v25 = vpop.f32.mrf.mxu0 }
 0x181   :  { %v341_v40 = vsel %vm339_vm0, %v322_v20, -1e+30  ;;  %v321_v15 = vmul.f32 %v2568_v38, %v236_v25 }
 0x182   :  { %v358_v41 = vmul.f32 1.442695, %v341_v40  ;;  %v2093_v10 = vpop.f32.mrf.mxu0 }
 0x183   :  { %v340_v42 = vsel %vm339_vm0, %v321_v15, -1e+30  ;;  %v324_v43 = vmul.f32 %v2093_v10, %v2568_v38 }
 0x184   :  { %2182 = vpow2.f32 %v358_v41  ;;  %v356_v44 = vmul.f32 1.442695, %v340_v42  ;;  %v246_v45 = vpop.f32.mrf.mxu0 }
 0x185   :  { %v343_v46 = vsel %vm339_vm0, %v324_v43, -1e+30  ;;  %v323_v47 = vmul.f32 %v2568_v38, %v246_v45 }
 0x186   :  { %2184 = vpow2.f32 %v356_v44  ;;  %v362_v48 = vmul.f32 1.442695, %v343_v46  ;;  %v2096_v49 = vpop.f32.mrf.mxu0 }
 0x187   :  { %v342_v50 = vsel %vm339_vm0, %v323_v47, -1e+30  ;;  %v326_v51 = vmul.f32 %v2096_v49, %v2568_v38 }
 0x188   :  { %2186 = vpow2.f32 %v362_v48  ;;  %v360_v52 = vmul.f32 1.442695, %v342_v50  ;;  %v256_v53 = vpop.f32.mrf.mxu0 }
 0x189   :  { %v345_v54 = vsel %vm339_vm0, %v326_v51, -1e+30  ;;  %v325_v55 = vmul.f32 %v2568_v38, %v256_v53 }
 0x18a   :  { %2188 = vpow2.f32 %v360_v52  ;;  %v366_v56 = vmul.f32 1.442695, %v345_v54  ;;  %v2099_v57 = vpop.f32.mrf.mxu0 }
 0x18b   :  { %v344_v58 = vsel %vm339_vm0, %v325_v55, -1e+30  ;;  %v328_v59 = vmul.f32 %v2099_v57, %v2568_v38 }
 0x18c   :  { %2190 = vpow2.f32 %v366_v56  ;;  %v364_v60 = vmul.f32 1.442695, %v344_v58  ;;  %v266_v61 = vpop.f32.mrf.mxu0 }
 0x18d   :  { %v347_v62 = vsel %vm339_vm0, %v328_v59, -1e+30  ;;  %v327_v63 = vmul.f32 %v2568_v38, %v266_v61 }
 0x18e   :  { %2192 = vpow2.f32 %v364_v60  ;;  %v370_v0 = vmul.f32 1.442695, %v347_v62  ;;  %v2102_v3 = vpop.f32.mrf.mxu0 }
 0x18f   :  { %v346_v4 = vsel %vm339_vm0, %v327_v63, -1e+30  ;;  %v330_v6 = vmul.f32 %v2102_v3, %v2568_v38 }
 0x190   :  { %2194 = vpow2.f32 %v370_v0  ;;  %v368_v7 = vmul.f32 1.442695, %v346_v4  ;;  %v276_v11 = vpop.f32.mrf.mxu0 }
 0x191   :  { %v2596_v12 = vpop.eup %2182  ;;  %v349_v1 = vsel %vm339_vm0, %v330_v6, -1e+30  ;;  %v329_v2 = vmul.f32 %v2568_v38, %v276_v11 }
 0x192   :  { %2196 = vpow2.f32 %v368_v7  ;;  %v374_v16 = vmul.f32 1.442695, %v349_v1  ;;  %454 = vmax.xlane.f32.xlu1 %v2596_v12  ;;  %v2105_v17 = vpop.f32.mrf.mxu0 }
 0x193   :  { %v2602_v5 = vpop.eup %2184  ;;  %v348_v21 = vsel %vm339_vm0, %v329_v2, -1e+30  ;;  %v332_v22 = vmul.f32 %v2105_v17, %v2568_v38 }
 0x194   :  { %2198 = vpow2.f32 %v374_v16  ;;  %v372_v26 = vmul.f32 1.442695, %v348_v21  ;;  %452 = vmax.xlane.f32.xlu0 %v2602_v5  ;;  %v286_v27 = vpop.f32.mrf.mxu0 }
 0x195   :  { %v2608_v28 = vpop.eup %2186  ;;  %v351_v8 = vsel %vm339_vm0, %v332_v22, -1e+30  ;;  %v331_v9 = vmul.f32 %v2568_v38, %v286_v27 }
 0x196   :  { %2200 = vpow2.f32 %v372_v26  ;;  %v378_v29 = vmul.f32 1.442695, %v351_v8  ;;  %458 = vmax.xlane.f32.xlu1 %v2608_v28  ;;  %v2108_v30 = vpop.f32.mrf.mxu0 }
 0x197   :  { %v2614_v31 = vpop.eup %2188  ;;  %v350_v32 = vsel %vm339_vm0, %v331_v9, -1e+30  ;;  %v334_v13 = vmul.f32 %v2108_v30, %v2568_v38 }
 0x198   :  { %2202 = vpow2.f32 %v378_v29  ;;  %v376_v33 = vmul.f32 1.442695, %v350_v32  ;;  %456 = vmax.xlane.f32.xlu0 %v2614_v31  ;;  %v296_v14 = vpop.f32.mrf.mxu0 }
 0x199   :  { %v2620_v34 = vpop.eup %2190  ;;  %v353_v35 = vsel %vm339_vm0, %v334_v13, -1e+30  ;;  %v333_v18 = vmul.f32 %v2568_v38, %v296_v14 }
 0x19a   :  { %2204 = vpow2.f32 %v376_v33  ;;  %v382_v36 = vmul.f32 1.442695, %v353_v35  ;;  %462 = vmax.xlane.f32.xlu1 %v2620_v34  ;;  %v2111_v19 = vpop.f32.mrf.mxu0 }
 0x19b   :  { %v2626_v37 = vpop.eup %2192  ;;  %v352_v23 = vsel %vm339_vm0, %v333_v18, -1e+30  ;;  %v336_v39 = vmul.f32 %v2111_v19, %v2568_v38 }
 0x19c   :  { %4304 = vst [vmem:[#allocation12_spill] sm:$0xff] %v2626_v37  ;;  %2206 = vpow2.f32 %v382_v36  ;;  %v380_v20 = vmul.f32 1.442695, %v352_v23  ;;  %460 = vmax.xlane.f32.xlu0 %v2626_v37  ;;  %v306_v25 = vpop.f32.mrf.mxu0 }
 0x19d   :  { %v2632_v40 = vpop.eup %2194  ;;  %v355_v15 = vsel %vm339_vm0, %v336_v39, -1e+30  ;;  %v335_v41 = vmul.f32 %v2568_v38, %v306_v25 }
 0x19e   :  { %4305 = vst [vmem:[#allocation13_spill] sm:$0xff] %v2632_v40  ;;  %2208 = vpow2.f32 %v380_v20  ;;  %v386_v10 = vmul.f32 1.442695, %v355_v15  ;;  %466 = vmax.xlane.f32.xlu1 %v2632_v40 }
 0x19f   :  { %v2638_v42 = vpop.eup %2196  ;;  %v354_v43 = vsel %vm339_vm0, %v335_v41, -1e+30 }
 0x1a0   :  { %4306 = vst [vmem:[#allocation14_spill] sm:$0xff] %v2638_v42  ;;  %2210 = vpow2.f32 %v386_v10  ;;  %v384_v44 = vmul.f32 1.442695, %v354_v43  ;;  %464 = vmax.xlane.f32.xlu0 %v2638_v42 }
 0x1a1   :  { %v2643_v45 = vpop.eup %2198 }
 0x1a2   :  { %4307 = vst [vmem:[#allocation15_spill] sm:$0xff] %v2643_v45  ;;  %2212 = vpow2.f32 %v384_v44  ;;  %470 = vmax.xlane.f32.xlu1 %v2643_v45 }
 0x1a3   :  { %v2646_v46 = vpop.eup %2200 }
 0x1a4   :  { %4308 = vst [vmem:[#allocation16_spill] sm:$0xff] %v2646_v46  ;;  %468 = vmax.xlane.f32.xlu0 %v2646_v46 }
 0x1a5   :  { %v2649_v38 = vpop.eup %2202 }
 0x1a6   :  { %4309 = vst [vmem:[#allocation17_spill] sm:$0xff] %v2649_v38  ;;  %474 = vmax.xlane.f32.xlu1 %v2649_v38 }
 0x1a7   :  { %v2652_v47 = vpop.eup %2204 }
 0x1a8   :  { %4310 = vst [vmem:[#allocation18_spill] sm:$0xff] %v2652_v47  ;;  %472 = vmax.xlane.f32.xlu0 %v2652_v47 }
 0x1a9   :  { %v2655_v48 = vpop.eup %2206 }
 0x1aa   :  { %4311 = vst [vmem:[#allocation19_spill] sm:$0xff] %v2655_v48  ;;  %478 = vmax.xlane.f32.xlu1 %v2655_v48 }
 0x1ab   :  { %v2658_v49 = vpop.eup %2208 }
 0x1ac   :  { %4312 = vst [vmem:[#allocation20_spill] sm:$0xff] %v2658_v49  ;;  %476 = vmax.xlane.f32.xlu0 %v2658_v49 }
 0x1ad   :  { %v2661_v50 = vpop.eup %2210 }
 0x1ae   :  { %4313 = vst [vmem:[#allocation21_spill] sm:$0xff] %v2661_v50  ;;  %482 = vmax.xlane.f32.xlu1 %v2661_v50 }
 0x1af   :  { %v2664_v51 = vpop.eup %2212 }
 0x1b0   :  { %4314 = vst [vmem:[#allocation22_spill] sm:$0xff] %v2664_v51  ;;  %480 = vmax.xlane.f32.xlu0 %v2664_v51 }
 0x21b   :  { %v2667_v52 = vpop.xlane.xlu1 %454 }
 0x21c   :  { %4315 = vst [vmem:[#allocation23_spill] sm:$0xff] %v2667_v52  ;;  %vm485_vm1 = vcmp.ge.f32.partialorder %v2596_v12, %v2667_v52 }
 0x21d   :  { %v2671_v53 = vpop.xlane.xlu0 %452  ;;  %v2674_v54 = vsel %vm485_vm1, %v2566_v24, 128 }
 0x21e   :  { %4316 = vst [vmem:[#allocation24_spill] sm:$0xff] %v2671_v53  ;;  %v531_v55 = vshra.s32 %v2674_v54, 16  ;;  %vm484_vm2 = vcmp.ge.f32.partialorder %v2602_v5, %v2671_v53 }
 0x21f   :  { %v2679_v56 = vpop.xlane.xlu1 %458  ;;  %v2682_v57 = vsel %vm484_vm2, %v2566_v24, 128 }
 0x220   :  { %4317 = vst [vmem:[#allocation25_spill] sm:$0xff] %v2679_v56  ;;  %v2684_v58 = vcvt.s32.f32 %v531_v55  ;;  %v517_v59 = vshra.s32 %v2682_v57, 16  ;;  %vm487_vm3 = vcmp.ge.f32.partialorder %v2608_v28, %v2679_v56 }
 0x221   :  { %v2689_v60 = vpop.xlane.xlu0 %456  ;;  %v2692_v61 = vsel %vm487_vm3, %v2566_v24, 128 }
 0x222   :  { %4318 = vst [vmem:[#allocation26_spill] sm:$0xff] %v2689_v60  ;;  %534 = vmin.xlane.f32.xlu1 %v2684_v58  ;;  %v2695_v62 = vcvt.s32.f32 %v517_v59  ;;  %v559_v63 = vshra.s32 %v2692_v61, 16  ;;  %vm486_vm4 = vcmp.ge.f32.partialorder %v2614_v31, %v2689_v60 }
 0x223   :  { %v2700_v0 = vpop.xlane.xlu1 %462  ;;  %v2703_v3 = vsel %vm486_vm4, %v2566_v24, 128 }
 0x224   :  { %4319 = vst [vmem:[#allocation27_spill] sm:$0xff] %v2700_v0  ;;  %520 = vmin.xlane.f32.xlu0 %v2695_v62  ;;  %v2706_v4 = vcvt.s32.f32 %v559_v63  ;;  %v545_v6 = vshra.s32 %v2703_v3, 16  ;;  %vm489_vm5 = vcmp.ge.f32.partialorder %v2620_v34, %v2700_v0 }
 0x225   :  { %v2711_v7 = vpop.xlane.xlu0 %460  ;;  %v2714_v11 = vsel %vm489_vm5, %v2566_v24, 128 }
 0x226   :  { %4320 = vst [vmem:[#allocation28_spill] sm:$0xff] %v2711_v7  ;;  %562 = vmin.xlane.f32.xlu1 %v2706_v4  ;;  %v2717_v1 = vcvt.s32.f32 %v545_v6  ;;  %v587_v2 = vshra.s32 %v2714_v11, 16  ;;  %vm488_vm6 = vcmp.ge.f32.partialorder %v2626_v37, %v2711_v7 }
 0x227   :  { %v2722_v16 = vpop.xlane.xlu1 %466  ;;  %v2725_v17 = vsel %vm488_vm6, %v2566_v24, 128 }
 0x228   :  { %4321 = vst [vmem:[#allocation29_spill] sm:$0xff] %v2722_v16  ;;  %548 = vmin.xlane.f32.xlu0 %v2717_v1  ;;  %v2728_v21 = vcvt.s32.f32 %v587_v2  ;;  %v573_v22 = vshra.s32 %v2725_v17, 16  ;;  %vm491_vm7 = vcmp.ge.f32.partialorder %v2632_v40, %v2722_v16 }
 0x229   :  { %v2733_v26 = vpop.xlane.xlu0 %464  ;;  %v2736_v27 = vsel %vm491_vm7, %v2566_v24, 128 }
 0x22a   :  { %4322 = vst [vmem:[#allocation30_spill] sm:$0xff] %v2733_v26  ;;  %590 = vmin.xlane.f32.xlu1 %v2728_v21  ;;  %v2739_v8 = vcvt.s32.f32 %v573_v22  ;;  %v615_v9 = vshra.s32 %v2736_v27, 16  ;;  %vm490_vm8 = vcmp.ge.f32.partialorder %v2638_v42, %v2733_v26 }
 0x22b   :  { %v2744_v29 = vpop.xlane.xlu1 %470  ;;  %v2747_v30 = vsel %vm490_vm8, %v2566_v24, 128 }
 0x22c   :  { %4323 = vst [vmem:[#allocation31_spill] sm:$0xff] %v2744_v29  ;;  %576 = vmin.xlane.f32.xlu0 %v2739_v8  ;;  %v2750_v32 = vcvt.s32.f32 %v615_v9  ;;  %v601_v13 = vshra.s32 %v2747_v30, 16  ;;  %vm493_vm9 = vcmp.ge.f32.partialorder %v2643_v45, %v2744_v29  ;;  %v558_v29 = vand.u32 65535, %v2692_v61 }
 0x22d   :  { %v2755_v33 = vpop.xlane.xlu0 %468  ;;  %v2758_v14 = vsel %vm493_vm9, %v2566_v24, 128 }
 0x22e   :  { %4324 = vst [vmem:[#allocation32_spill] sm:$0xff] %v2755_v33  ;;  %618 = vmin.xlane.f32.xlu1 %v2750_v32  ;;  %v2761_v35 = vcvt.s32.f32 %v601_v13  ;;  %v643_v18 = vshra.s32 %v2758_v14, 16  ;;  %vm492_vm10 = vcmp.ge.f32.partialorder %v2646_v46, %v2755_v33  ;;  %v560_v7 = vcvt.s32.f32 %v558_v29 }
 0x22f   :  { %v2766_v36 = vpop.xlane.xlu1 %474  ;;  %v2769_v19 = vsel %vm492_vm10, %v2566_v24, 128 }
 0x230   :  { %4325 = vst [vmem:[#allocation33_spill] sm:$0xff] %v2766_v36  ;;  %604 = vmin.xlane.f32.xlu0 %v2761_v35  ;;  %v2772_v23 = vcvt.s32.f32 %v643_v18  ;;  %v629_v39 = vshra.s32 %v2769_v19, 16  ;;  %vm495_vm11 = vcmp.ge.f32.partialorder %v2649_v38, %v2766_v36  ;;  %v516_v36 = vand.u32 65535, %v2682_v57 }
 0x231   :  { %v2777_v20 = vpop.xlane.xlu0 %472  ;;  %v2780_v25 = vsel %vm495_vm11, %v2566_v24, 128 }
 0x232   :  { %4326 = vst [vmem:[#allocation34_spill] sm:$0xff] %v2777_v20  ;;  %646 = vmin.xlane.f32.xlu1 %v2772_v23  ;;  %v2783_v15 = vcvt.s32.f32 %v629_v39  ;;  %v671_v41 = vshra.s32 %v2780_v25, 16  ;;  %vm494_vm12 = vcmp.ge.f32.partialorder %v2652_v47, %v2777_v20  ;;  %v518_v16 = vcvt.s32.f32 %v516_v36 }
 0x233   :  { %v2788_v10 = vpop.xlane.xlu1 %478  ;;  %v2791_v43 = vsel %vm494_vm12, %v2566_v24, 128 }
 0x234   :  { %4327 = vst [vmem:[#allocation35_spill] sm:$0xff] %v2788_v10  ;;  %632 = vmin.xlane.f32.xlu0 %v2783_v15  ;;  %v2794_v44 = vcvt.s32.f32 %v671_v41  ;;  %v657_v55 = vshra.s32 %v2791_v43, 16  ;;  %vm497_vm13 = vcmp.ge.f32.partialorder %v2655_v48, %v2788_v10 }
 0x235   :  { %v2799_v59 = vpop.xlane.xlu0 %476  ;;  %v2802_v63 = vsel %vm497_vm13, %v2566_v24, 128 }
 0x236   :  { %4328 = vst [vmem:[#allocation36_spill] sm:$0xff] %v2799_v59  ;;  %674 = vmin.xlane.f32.xlu1 %v2794_v44  ;;  %v2805_v6 = vcvt.s32.f32 %v657_v55  ;;  %v699_v2 = vshra.s32 %v2802_v63, 16  ;;  %vm496_vm14 = vcmp.ge.f32.partialorder %v2658_v49, %v2799_v59 }
 0x237   :  { %v2810_v22 = vpop.xlane.xlu1 %482  ;;  %v2813_v9 = vsel %vm496_vm14, %v2566_v24, 128 }
 0x238   :  { %4329 = vst [vmem:[#allocation37_spill] sm:$0xff] %v2810_v22  ;;  %660 = vmin.xlane.f32.xlu0 %v2805_v6  ;;  %v2816_v13 = vcvt.s32.f32 %v699_v2  ;;  %v685_v18 = vshra.s32 %v2813_v9, 16  ;;  %vm499_vm15 = vcmp.ge.f32.partialorder %v2661_v50, %v2810_v22 }
 0x239   :  { %v2821_v39 = vpop.xlane.xlu0 %480  ;;  %v2824_v41 = vsel %vm499_vm15, %v2566_v24, 128 }
 0x23a   :  { %4330 = vst [vmem:[#allocation38_spill] sm:$0xff] %v2821_v39  ;;  %702 = vmin.xlane.f32.xlu1 %v2816_v13  ;;  %v2827_v55 = vcvt.s32.f32 %v685_v18  ;;  %v727_v59 = vshra.s32 %v2824_v41, 16  ;;  %vm498_vm0 = vcmp.ge.f32.partialorder %v2664_v51, %v2821_v39  ;;  %v530_v18 = vand.u32 65535, %v2674_v54 }
 0x23b   :  { %v2833_v2 = vsel %vm498_vm0, %v2566_v24, 128 }
 0x23c   :  { %688 = vmin.xlane.f32.xlu0 %v2827_v55  ;;  %v2836_v22 = vcvt.s32.f32 %v727_v59  ;;  %v713_v10 = vshra.s32 %v2833_v2, 16  ;;  %v532_v33 = vcvt.s32.f32 %v530_v18  ;;  %v586_v18 = vand.u32 65535, %v2714_v11 }
 0x23d   :  { %v614_v11 = vand.u32 65535, %v2736_v27  ;;  %v642_v27 = vand.u32 65535, %v2758_v14  ;;  %v670_v14 = vand.u32 65535, %v2780_v25  ;;  %v698_v25 = vand.u32 65535, %v2802_v63 }
 0x23e   :  { %730 = vmin.xlane.f32.xlu1 %v2836_v22  ;;  %v2840_v20 = vcvt.s32.f32 %v713_v10  ;;  %v544_v10 = vand.u32 65535, %v2703_v3  ;;  %v572_v3 = vand.u32 65535, %v2725_v17  ;;  %v600_v17 = vand.u32 65535, %v2747_v30 }
 0x23f   :  { %v628_v30 = vand.u32 65535, %v2769_v19  ;;  %v656_v19 = vand.u32 65535, %v2791_v43  ;;  %v684_v43 = vand.u32 65535, %v2813_v9  ;;  %v726_v63 = vand.u32 65535, %v2824_v41 }
 0x240   :  { %716 = vmin.xlane.f32.xlu0 %v2840_v20  ;;  %v574_v29 = vcvt.s32.f32 %v572_v3  ;;  %v712_v9 = vand.u32 65535, %v2833_v2 }
 0x2ab   :  { %v2845_v39 = vpop.xlane.xlu1 %534 }
 0x2ac   :  { %vm536_vm1 = vcmp.eq.f32.partialorder %v2684_v58, %v2845_v39 }
 0x2ad   :  { %v2850_v59 = vpop.xlane.xlu0 %520  ;;  %v537_v26 = vsel %vm536_vm1, %v532_v33, inf  ;;  %v546_v33 = vcvt.s32.f32 %v544_v10  ;;  %v616_v10 = vcvt.s32.f32 %v614_v11  ;;  %v672_v11 = vcvt.s32.f32 %v670_v14 }
 0x2ae   :  { %538 = vmin.xlane.f32.xlu1 %v537_v26  ;;  %vm522_vm2 = vcmp.eq.f32.partialorder %v2695_v62, %v2850_v59  ;;  %v588_v26 = vcvt.s32.f32 %v586_v18  ;;  %v602_v18 = vcvt.s32.f32 %v600_v17 }
 0x2af   :  { %v2855_v54 = vpop.xlane.xlu1 %562  ;;  %v523_v57 = vsel %vm522_vm2, %v518_v16, inf }
 0x2b0   :  { %524 = vmin.xlane.f32.xlu0 %v523_v57  ;;  %vm564_vm3 = vcmp.eq.f32.partialorder %v2706_v4, %v2855_v54 }
 0x2b1   :  { %v2860_v58 = vpop.xlane.xlu0 %548  ;;  %v565_v61 = vsel %vm564_vm3, %v560_v7, inf }
 0x2b2   :  { %566 = vmin.xlane.f32.xlu1 %v565_v61  ;;  %vm550_vm4 = vcmp.eq.f32.partialorder %v2717_v1, %v2860_v58 }
 0x2b3   :  { %v2865_v62 = vpop.xlane.xlu1 %590  ;;  %v551_v16 = vsel %vm550_vm4, %v546_v33, inf  ;;  %v644_v33 = vcvt.s32.f32 %v642_v27  ;;  %v686_v27 = vcvt.s32.f32 %v684_v43 }
 0x2b4   :  { %552 = vmin.xlane.f32.xlu0 %v551_v16  ;;  %vm592_vm5 = vcmp.eq.f32.partialorder %v2728_v21, %v2865_v62  ;;  %v630_v16 = vcvt.s32.f32 %v628_v30  ;;  %v714_v30 = vcvt.s32.f32 %v712_v9 }
 0x2b5   :  { %v2870_v4 = vpop.xlane.xlu0 %576  ;;  %v593_v7 = vsel %vm592_vm5, %v588_v26, inf }
 0x2b6   :  { %594 = vmin.xlane.f32.xlu1 %v593_v7  ;;  %vm578_vm6 = vcmp.eq.f32.partialorder %v2739_v8, %v2870_v4 }
 0x2b7   :  { %v2875_v1 = vpop.xlane.xlu1 %618  ;;  %v579_v36 = vsel %vm578_vm6, %v574_v29, inf  ;;  %v658_v29 = vcvt.s32.f32 %v656_v19 }
 0x2b8   :  { %580 = vmin.xlane.f32.xlu0 %v579_v36  ;;  %vm620_vm7 = vcmp.eq.f32.partialorder %v2750_v32, %v2875_v1  ;;  %v700_v36 = vcvt.s32.f32 %v698_v25  ;;  %v625_v9 = vcvt.f32.s32 %v2875_v1 }
 0x2b9   :  { %v2880_v21 = vpop.xlane.xlu0 %604  ;;  %v621_v57 = vsel %vm620_vm7, %v616_v10, inf }
 0x2ba   :  { %622 = vmin.xlane.f32.xlu1 %v621_v57  ;;  %vm606_vm8 = vcmp.eq.f32.partialorder %v2761_v35, %v2880_v21 }
 0x2bb   :  { %v2885_v8 = vpop.xlane.xlu1 %646  ;;  %v607_v61 = vsel %vm606_vm8, %v602_v18, inf  ;;  %v728_v18 = vcvt.s32.f32 %v726_v63 }
 0x2bc   :  { %608 = vmin.xlane.f32.xlu0 %v607_v61  ;;  %vm648_vm9 = vcmp.eq.f32.partialorder %v2772_v23, %v2885_v8  ;;  %v527_v61 = vcvt.f32.s32 %v2850_v59 }
 0x2bd   :  { %v2890_v32 = vpop.xlane.xlu0 %632  ;;  %v649_v3 = vsel %vm648_vm9, %v644_v33, inf }
 0x2be   :  { %650 = vmin.xlane.f32.xlu1 %v649_v3  ;;  %vm634_vm10 = vcmp.eq.f32.partialorder %v2783_v15, %v2890_v32  ;;  %v569_v3 = vcvt.f32.s32 %v2855_v54 }
 0x2bf   :  { %v2895_v35 = vpop.xlane.xlu1 %674  ;;  %v635_v26 = vsel %vm634_vm10, %v630_v16, inf }
 0x2c0   :  { %636 = vmin.xlane.f32.xlu0 %v635_v26  ;;  %vm676_vm11 = vcmp.eq.f32.partialorder %v2794_v44, %v2895_v35  ;;  %v528_v26 = vshll.u32 %v527_v61, 16 }
 0x2c1   :  { %v2900_v23 = vpop.xlane.xlu0 %660  ;;  %v677_v7 = vsel %vm676_vm11, %v672_v11, inf }
 0x2c2   :  { %678 = vmin.xlane.f32.xlu1 %v677_v7  ;;  %vm662_vm12 = vcmp.eq.f32.partialorder %v2805_v6, %v2900_v23  ;;  %v597_v7 = vcvt.f32.s32 %v2865_v62 }
 0x2c3   :  { %v2905_v15 = vpop.xlane.xlu1 %702  ;;  %v663_v17 = vsel %vm662_vm12, %v658_v29, inf  ;;  %v570_v29 = vshll.u32 %v569_v3, 16 }
 0x2c4   :  { %664 = vmin.xlane.f32.xlu0 %v663_v17  ;;  %vm704_vm13 = vcmp.eq.f32.partialorder %v2816_v13, %v2905_v15  ;;  %v583_v17 = vcvt.f32.s32 %v2870_v4 }
 0x2c5   :  { %v2910_v44 = vpop.xlane.xlu0 %688  ;;  %v705_v10 = vsel %vm704_vm13, %v700_v36, inf  ;;  %v4208_v36 = vmov 0.0  }
 0x2c6   :  { %706 = vmin.xlane.f32.xlu1 %v705_v10  ;;  %vm690_vm14 = vcmp.eq.f32.partialorder %v2827_v55, %v2910_v44  ;;  %v541_v55 = vcvt.f32.s32 %v2845_v39 }
 0x2c7   :  { %v2915_v6 = vpop.xlane.xlu1 %730  ;;  %v691_v57 = vsel %vm690_vm14, %v686_v27, inf  ;;  %v598_v27 = vshll.u32 %v597_v7, 16 }
 0x2c8   :  { %692 = vmin.xlane.f32.xlu0 %v691_v57  ;;  %vm732_vm15 = vcmp.eq.f32.partialorder %v2836_v22, %v2915_v6  ;;  %v542_v14 = vshll.u32 %v541_v55, 16  ;;  %v555_v22 = vcvt.f32.s32 %v2860_v58  ;;  %v611_v55 = vcvt.f32.s32 %v2880_v21 }
 0x2c9   :  { %v2919_v41 = vpop.xlane.xlu0 %716  ;;  %v733_v13 = vsel %vm732_vm15, %v728_v18, inf }
 0x2ca   :  { %734 = vmin.xlane.f32.xlu1 %v733_v13  ;;  %vm718_vm0 = vcmp.eq.f32.partialorder %v2840_v20, %v2919_v41  ;;  %v556_v59 = vshll.u32 %v555_v22, 16  ;;  %v626_v22 = vshll.u32 %v625_v9, 16 }
 0x2cb   :  { %v719_v2 = vsel %vm718_vm0, %v714_v30, inf }
 0x2cc   :  { %720 = vmin.xlane.f32.xlu0 %v719_v2  ;;  %v584_v2 = vshll.u32 %v583_v17, 16 }
 0x337   :  { %v539_v33 = vpop.xlane.xlu1 %538 }
 0x338   :  { %v540_v16 = vcvt.f32.s32 %v539_v33 }
 0x339   :  { %v525_v19 = vpop.xlane.xlu0 %524 }
 0x33a   :  { %v543_v11 = vadd.s32 %v542_v14, %v540_v16  ;;  %v526_v25 = vcvt.f32.s32 %v525_v19  ;;  %v653_v19 = vcvt.f32.s32 %v2885_v8 }
 0x33b   :  { %v567_v20 = vpop.xlane.xlu1 %566 }
 0x33c   :  { %vm741_vm1 = vcmp.eq.s32.totalorder %v2566_v24, %v543_v11  ;;  %v529_v39 = vadd.s32 %v528_v26, %v526_v25  ;;  %v568_v43 = vcvt.f32.s32 %v567_v20 }
 0x33d   :  { %v2931_v54 = vsel %vm741_vm1, 1.0, %v4208_v36  ;;  %v553_v58 = vpop.xlane.xlu0 %552 }
 0x33e   :  { %4331 = vst [vmem:[#allocation39_spill] sm:$0xff] %v2931_v54  ;;  %vm740_vm2 = vcmp.eq.s32.totalorder %v2566_v24, %v529_v39  ;;  %v571_v63 = vadd.s32 %v570_v29, %v568_v43  ;;  %v554_v10 = vcvt.f32.s32 %v553_v58  ;;  %v805_v62 = vsub.f32 1.0, %v2931_v54 }
 0x33f   :  { %v2937_v57 = vsel %vm740_vm2, 1.0, %v4208_v36  ;;  %v595_v18 = vpop.xlane.xlu1 %594  ;;  %v612_v29 = vshll.u32 %v611_v55, 16  ;;  %v639_v39 = vcvt.f32.s32 %v2890_v32  ;;  %v667_v55 = vcvt.f32.s32 %v2900_v23 }
 0x340   :  { %4332 = vst [vmem:[#allocation40_spill] sm:$0xff] %v2937_v57  ;;  %vm743_vm3 = vcmp.eq.s32.totalorder %v2566_v24, %v571_v63  ;;  %v557_v4 = vadd.s32 %v556_v59, %v554_v10  ;;  %v596_v13 = vcvt.f32.s32 %v595_v18  ;;  %v2941_v30 = vmul.f32 %v2596_v12, %v805_v62 }
 0x341   :  { %v2945_v61 = vsel %vm743_vm3, 1.0, %v4208_v36  ;;  %v581_v33 = vpop.xlane.xlu0 %580  ;;  %v804_v1 = vsub.f32 1.0, %v2937_v57  ;;  %v654_v10 = vshll.u32 %v653_v19, 16  ;;  %v681_v62 = vcvt.f32.s32 %v2895_v35 }
 0x342   :  { %4333 = vst [vmem:[#allocation41_spill] sm:$0xff] %v2945_v61  ;;  %vm742_vm4 = vcmp.eq.s32.totalorder %v2566_v24, %v557_v4  ;;  %v599_v14 = vadd.s32 %v598_v27, %v596_v13  ;;  %v582_v3 = vcvt.f32.s32 %v581_v33  ;;  %838 = vmax.xlane.f32.xlu1 %v2941_v30  ;;  %v807_v16 = vsub.f32 1.0, %v2945_v61 }
 0x343   :  { %v2953_v26 = vsel %vm742_vm4, 1.0, %v4208_v36  ;;  %v623_v21 = vpop.xlane.xlu1 %622  ;;  %v2956_v11 = vmul.f32 %v2602_v5, %v804_v1  ;;  %v709_v19 = vcvt.f32.s32 %v2905_v15 }
 0x344   :  { %4334 = vst [vmem:[#allocation42_spill] sm:$0xff] %v2953_v26  ;;  %vm745_vm5 = vcmp.eq.s32.totalorder %v2566_v24, %v599_v14  ;;  %v585_v25 = vadd.s32 %v584_v2, %v582_v3  ;;  %v624_v7 = vcvt.f32.s32 %v623_v21  ;;  %v2960_v20 = vmul.f32 %v2608_v28, %v807_v16 }
 0x345   :  { %v2964_v43 = vsel %vm745_vm5, 1.0, %v4208_v36  ;;  %836 = vmax.xlane.f32.xlu0 %v2956_v11  ;;  %v609_v8 = vpop.xlane.xlu0 %608  ;;  %v806_v59 = vsub.f32 1.0, %v2953_v26  ;;  %v640_v2 = vshll.u32 %v639_v39, 16 }
 0x346   :  { %4335 = vst [vmem:[#allocation43_spill] sm:$0xff] %v2964_v43  ;;  %vm744_vm6 = vcmp.eq.s32.totalorder %v2566_v24, %v585_v25  ;;  %v627_v17 = vadd.s32 %v626_v22, %v624_v7  ;;  %v610_v58 = vcvt.f32.s32 %v609_v8  ;;  %842 = vmax.xlane.f32.xlu1 %v2960_v20  ;;  %v809_v63 = vsub.f32 1.0, %v2964_v43 }
 0x347   :  { %v2973_v32 = vsel %vm744_vm6, 1.0, %v4208_v36  ;;  %v651_v27 = vpop.xlane.xlu1 %650  ;;  %v2976_v9 = vmul.f32 %v2614_v31, %v806_v59  ;;  %v682_v22 = vshll.u32 %v681_v62, 16  ;;  %v668_v8 = vshll.u32 %v667_v55, 16 }
 0x348   :  { %4336 = vst [vmem:[#allocation44_spill] sm:$0xff] %v2973_v32  ;;  %vm747_vm7 = vcmp.eq.s32.totalorder %v2566_v24, %v627_v17  ;;  %v613_v18 = vadd.s32 %v612_v29, %v610_v58  ;;  %v652_v4 = vcvt.f32.s32 %v651_v27  ;;  %v2980_v13 = vmul.f32 %v2620_v34, %v809_v63 }
 0x349   :  { %v2984_v33 = vsel %vm747_vm7, 1.0, %v4208_v36  ;;  %840 = vmax.xlane.f32.xlu0 %v2976_v9  ;;  %v637_v35 = vpop.xlane.xlu0 %636  ;;  %v808_v1 = vsub.f32 1.0, %v2973_v32  ;;  %v695_v59 = vcvt.f32.s32 %v2910_v44  ;;  %v710_v27 = vshll.u32 %v709_v19, 16 }
 0x34a   :  { %4337 = vst [vmem:[#allocation45_spill] sm:$0xff] %v2984_v33  ;;  %vm746_vm8 = vcmp.eq.s32.totalorder %v2566_v24, %v613_v18  ;;  %v655_v14 = vadd.s32 %v654_v10, %v652_v4  ;;  %v638_v3 = vcvt.f32.s32 %v637_v35  ;;  %846 = vmax.xlane.f32.xlu1 %v2980_v13  ;;  %v811_v16 = vsub.f32 1.0, %v2984_v33 }
 0x34b   :  { %v2993_v23 = vsel %vm746_vm8, 1.0, %v4208_v36  ;;  %v679_v21 = vpop.xlane.xlu1 %678  ;;  %v2996_v25 = vmul.f32 %v2626_v37, %v808_v1  ;;  %v737_v18 = vcvt.f32.s32 %v2915_v6 }
 0x34c   :  { %4338 = vst [vmem:[#allocation46_spill] sm:$0xff] %v2993_v23  ;;  %vm749_vm9 = vcmp.eq.s32.totalorder %v2566_v24, %v655_v14  ;;  %v641_v7 = vadd.s32 %v640_v2, %v638_v3  ;;  %v680_v29 = vcvt.f32.s32 %v679_v21  ;;  %v3000_v39 = vmul.f32 %v2632_v40, %v811_v16 }
 0x34d   :  { %v3004_v17 = vsel %vm749_vm9, 1.0, %v4208_v36  ;;  %844 = vmax.xlane.f32.xlu0 %v2996_v25  ;;  %v665_v15 = vpop.xlane.xlu0 %664  ;;  %v810_v58 = vsub.f32 1.0, %v2993_v23  ;;  %v696_v14 = vshll.u32 %v695_v59, 16  ;;  %v723_v3 = vcvt.f32.s32 %v2919_v41 }
 0x34e   :  { %4339 = vst [vmem:[#allocation47_spill] sm:$0xff] %v3004_v17  ;;  %vm748_vm10 = vcmp.eq.s32.totalorder %v2566_v24, %v641_v7  ;;  %v683_v63 = vadd.s32 %v682_v22, %v680_v29  ;;  %v666_v10 = vcvt.f32.s32 %v665_v15  ;;  %850 = vmax.xlane.f32.xlu1 %v3000_v39  ;;  %v813_v62 = vsub.f32 1.0, %v3004_v17 }
 0x34f   :  { %v3013_v44 = vsel %vm748_vm10, 1.0, %v4208_v36  ;;  %v707_v4 = vpop.xlane.xlu1 %706  ;;  %v3016_v2 = vmul.f32 %v2638_v42, %v810_v58  ;;  %v738_v29 = vshll.u32 %v737_v18, 16 }
 0x350   :  { %4340 = vst [vmem:[#allocation48_spill] sm:$0xff] %v3013_v44  ;;  %vm751_vm11 = vcmp.eq.s32.totalorder %v2566_v24, %v683_v63  ;;  %v669_v55 = vadd.s32 %v668_v8, %v666_v10  ;;  %v708_v35 = vcvt.f32.s32 %v707_v4  ;;  %v3020_v1 = vmul.f32 %v2643_v45, %v813_v62 }
 0x351   :  { %v3024_v16 = vsel %vm751_vm11, 1.0, %v4208_v36  ;;  %848 = vmax.xlane.f32.xlu0 %v3016_v2  ;;  %v693_v6 = vpop.xlane.xlu0 %692  ;;  %v812_v22 = vsub.f32 1.0, %v3013_v44  ;;  %v724_v10 = vshll.u32 %v723_v3, 16 }
 0x352   :  { %4341 = vst [vmem:[#allocation49_spill] sm:$0xff] %v3024_v16  ;;  %vm750_vm12 = vcmp.eq.s32.totalorder %v2566_v24, %v669_v55  ;;  %v711_v19 = vadd.s32 %v710_v27, %v708_v35  ;;  %v694_v21 = vcvt.f32.s32 %v693_v6  ;;  %854 = vmax.xlane.f32.xlu1 %v3020_v1  ;;  %v815_v7 = vsub.f32 1.0, %v3024_v16 }
 0x353   :  { %v3032_v8 = vsel %vm750_vm12, 1.0, %v4208_v36  ;;  %v735_v41 = vpop.xlane.xlu1 %734  ;;  %v3035_v59 = vmul.f32 %v2646_v46, %v812_v22 }
 0x354   :  { %4342 = vst [vmem:[#allocation50_spill] sm:$0xff] %v3032_v8  ;;  %vm753_vm13 = vcmp.eq.s32.totalorder %v2566_v24, %v711_v19  ;;  %v697_v15 = vadd.s32 %v696_v14, %v694_v21  ;;  %v736_v58 = vcvt.f32.s32 %v735_v41  ;;  %v3039_v63 = vmul.f32 %v2649_v38, %v815_v7 }
 0x355   :  { %v3042_v62 = vsel %vm753_vm13, 1.0, %v4208_v36  ;;  %852 = vmax.xlane.f32.xlu0 %v3035_v59  ;;  %v721_v27 = vpop.xlane.xlu0 %720  ;;  %v814_v18 = vsub.f32 1.0, %v3032_v8 }
 0x356   :  { %4343 = vst [vmem:[#allocation51_spill] sm:$0xff] %v3042_v62  ;;  %vm752_vm14 = vcmp.eq.s32.totalorder %v2566_v24, %v697_v15  ;;  %v739_v4 = vadd.s32 %v738_v29, %v736_v58  ;;  %v722_v55 = vcvt.f32.s32 %v721_v27  ;;  %858 = vmax.xlane.f32.xlu1 %v3039_v63  ;;  %v817_v35 = vsub.f32 1.0, %v3042_v62 }
 0x357   :  { %v3050_v14 = vsel %vm752_vm14, 1.0, %v4208_v36  ;;  %v3053_v3 = vmul.f32 %v2652_v47, %v814_v18 }
 0x358   :  { %4344 = vst [vmem:[#allocation52_spill] sm:$0xff] %v3050_v14  ;;  %vm755_vm15 = vcmp.eq.s32.totalorder %v2566_v24, %v739_v4  ;;  %v725_v6 = vadd.s32 %v724_v10, %v722_v55  ;;  %v3057_v22 = vmul.f32 %v2655_v48, %v817_v35  ;;  %v816_v19 = vsub.f32 1.0, %v3050_v14 }
 0x359   :  { %v3061_v21 = vsel %vm755_vm15, 1.0, %v4208_v36  ;;  %856 = vmax.xlane.f32.xlu0 %v3053_v3 }
 0x35a   :  { %4345 = vst [vmem:[#allocation53_spill] sm:$0xff] %v3061_v21  ;;  %vm754_vm0 = vcmp.eq.s32.totalorder %v2566_v24, %v725_v6  ;;  %862 = vmax.xlane.f32.xlu1 %v3057_v22  ;;  %v3067_v7 = vmul.f32 %v2658_v49, %v816_v19  ;;  %v819_v29 = vsub.f32 1.0, %v3061_v21 }
 0x35b   :  { %v3071_v41 = vsel %vm754_vm0, 1.0, %v4208_v36 }
 0x35c   :  { %4346 = vst [vmem:[#allocation54_spill] sm:$0xff] %v3071_v41  ;;  %v3074_v15 = vmul.f32 %v2661_v50, %v819_v29  ;;  %v818_v58 = vsub.f32 1.0, %v3071_v41 }
 0x35d   :  { %860 = vmax.xlane.f32.xlu0 %v3067_v7 }
 0x35e   :  { %866 = vmax.xlane.f32.xlu1 %v3074_v15  ;;  %v3080_v10 = vmul.f32 %v2664_v51, %v818_v58 }
 0x361   :  { %864 = vmax.xlane.f32.xlu0 %v3080_v10 }
 0x3cb   :  { %v3083_v27 = vpop.xlane.xlu1 %838 }
 0x3cc   :  { %4347 = vst [vmem:[#allocation55_spill] sm:$0xff] %v3083_v27  ;;  %vm869_vm1 = vcmp.ge.f32.partialorder %v2941_v30, %v3083_v27 }
 0x3cd   :  { %v3088_v18 = vsel %vm869_vm1, %v2566_v24, 128 }
 0x3ce   :  { %v3090_v4 = vpop.xlane.xlu0 %836  ;;  %v915_v55 = vshra.s32 %v3088_v18, 16  ;;  %v914_v38 = vand.u32 65535, %v3088_v18 }
 0x3cf   :  { %4348 = vst [vmem:[#allocation56_spill] sm:$0xff] %v3090_v4  ;;  %vm868_vm2 = vcmp.ge.f32.partialorder %v2956_v11, %v3090_v4  ;;  %v3095_v35 = vpop.xlane.xlu1 %842 }
 0x3d0   :  { %4349 = vst [vmem:[#allocation57_spill] sm:$0xff] %v3095_v35  ;;  %vm871_vm3 = vcmp.ge.f32.partialorder %v2960_v20, %v3095_v35  ;;  %v3099_v6 = vcvt.s32.f32 %v915_v55  ;;  %v3102_v19 = vsel %vm868_vm2, %v2566_v24, 128 }
 0x3d1   :  { %v901_v29 = vshra.s32 %v3102_v19, 16  ;;  %v3106_v58 = vsel %vm871_vm3, %v2566_v24, 128 }
 0x3d2   :  { %v3108_v36 = vpop.xlane.xlu0 %840  ;;  %918 = vmin.xlane.f32.xlu1 %v3099_v6  ;;  %v943_v41 = vshra.s32 %v3106_v58, 16 }
 0x3d3   :  { %4350 = vst [vmem:[#allocation58_spill] sm:$0xff] %v3108_v36  ;;  %vm870_vm4 = vcmp.ge.f32.partialorder %v2976_v9, %v3108_v36  ;;  %v3114_v21 = vpop.xlane.xlu1 %846  ;;  %v3116_v55 = vcvt.s32.f32 %v901_v29 }
 0x3d4   :  { %4351 = vst [vmem:[#allocation59_spill] sm:$0xff] %v3114_v21  ;;  %vm873_vm5 = vcmp.ge.f32.partialorder %v2980_v13, %v3114_v21  ;;  %v3120_v14 = vcvt.s32.f32 %v943_v41  ;;  %v3123_v62 = vsel %vm870_vm4, %v2566_v24, 128 }
 0x3d5   :  { %904 = vmin.xlane.f32.xlu0 %v3116_v55  ;;  %v929_v8 = vshra.s32 %v3123_v62, 16  ;;  %v3128_v16 = vsel %vm873_vm5, %v2566_v24, 128  ;;  %v928_v42 = vand.u32 65535, %v3123_v62 }
 0x3d6   :  { %v3130_v44 = vpop.xlane.xlu0 %844  ;;  %946 = vmin.xlane.f32.xlu1 %v3120_v14  ;;  %v971_v29 = vshra.s32 %v3128_v16, 16  ;;  %v970_v37 = vand.u32 65535, %v3128_v16 }
 0x3d7   :  { %4352 = vst [vmem:[#allocation60_spill] sm:$0xff] %v3130_v44  ;;  %vm872_vm6 = vcmp.ge.f32.partialorder %v2996_v25, %v3130_v44  ;;  %v3136_v41 = vpop.xlane.xlu1 %850  ;;  %v3138_v17 = vcvt.s32.f32 %v929_v8 }
 0x3d8   :  { %4353 = vst [vmem:[#allocation61_spill] sm:$0xff] %v3136_v41  ;;  %vm875_vm7 = vcmp.ge.f32.partialorder %v3000_v39, %v3136_v41  ;;  %v3142_v23 = vcvt.s32.f32 %v971_v29  ;;  %v3145_v33 = vsel %vm872_vm6, %v2566_v24, 128 }
 0x3d9   :  { %932 = vmin.xlane.f32.xlu0 %v3138_v17  ;;  %v957_v32 = vshra.s32 %v3145_v33, 16  ;;  %v3150_v43 = vsel %vm875_vm7, %v2566_v24, 128  ;;  %v956_v62 = vand.u32 65535, %v3145_v33 }
 0x3da   :  { %v3152_v26 = vpop.xlane.xlu0 %848  ;;  %974 = vmin.xlane.f32.xlu1 %v3142_v23  ;;  %v999_v8 = vshra.s32 %v3150_v43, 16  ;;  %v998_v16 = vand.u32 65535, %v3150_v43 }
 0x3db   :  { %4354 = vst [vmem:[#allocation62_spill] sm:$0xff] %v3152_v26  ;;  %vm874_vm8 = vcmp.ge.f32.partialorder %v3016_v2, %v3152_v26  ;;  %v3158_v29 = vpop.xlane.xlu1 %854  ;;  %v3160_v61 = vcvt.s32.f32 %v957_v32 }
 0x3dc   :  { %4355 = vst [vmem:[#allocation63_spill] sm:$0xff] %v3158_v29  ;;  %vm877_vm9 = vcmp.ge.f32.partialorder %v3020_v1, %v3158_v29  ;;  %v3164_v57 = vcvt.s32.f32 %v999_v8  ;;  %v3167_v54 = vsel %vm874_vm8, %v2566_v24, 128 }
 0x3dd   :  { %960 = vmin.xlane.f32.xlu0 %v3160_v61  ;;  %v985_v41 = vshra.s32 %v3167_v54, 16  ;;  %v3172_v44 = vsel %vm877_vm9, %v2566_v24, 128  ;;  %v984_v33 = vand.u32 65535, %v3167_v54 }
 0x3de   :  { %v3174_v26 = vpop.xlane.xlu0 %852  ;;  %1002 = vmin.xlane.f32.xlu1 %v3164_v57  ;;  %v1027_v32 = vshra.s32 %v3172_v44, 16  ;;  %v1026_v43 = vand.u32 65535, %v3172_v44 }
 0x3df   :  { %4356 = vst [vmem:[#allocation64_spill] sm:$0xff] %v3174_v26  ;;  %vm876_vm10 = vcmp.ge.f32.partialorder %v3035_v59, %v3174_v26  ;;  %v3180_v8 = vpop.xlane.xlu1 %858  ;;  %v3182_v29 = vcvt.s32.f32 %v985_v41 }
 0x3e0   :  { %4357 = vst [vmem:[#allocation65_spill] sm:$0xff] %v3180_v8  ;;  %vm879_vm11 = vcmp.ge.f32.partialorder %v3039_v63, %v3180_v8  ;;  %v3186_v21 = vcvt.s32.f32 %v1027_v32  ;;  %v3189_v0 = vsel %vm876_vm10, %v2566_v24, 128 }
 0x3e1   :  { %988 = vmin.xlane.f32.xlu0 %v3182_v29  ;;  %v1013_v36 = vshra.s32 %v3189_v0, 16  ;;  %v3194_v60 = vsel %vm879_vm11, %v2566_v24, 128  ;;  %v1012_v54 = vand.u32 65535, %v3189_v0 }
 0x3e2   :  { %v3196_v26 = vpop.xlane.xlu0 %856  ;;  %1030 = vmin.xlane.f32.xlu1 %v3186_v21  ;;  %v1055_v41 = vshra.s32 %v3194_v60, 16  ;;  %v1054_v44 = vand.u32 65535, %v3194_v60 }
 0x3e3   :  { %4358 = vst [vmem:[#allocation66_spill] sm:$0xff] %v3196_v26  ;;  %vm878_vm12 = vcmp.ge.f32.partialorder %v3053_v3, %v3196_v26  ;;  %v3202_v32 = vpop.xlane.xlu1 %862  ;;  %v3204_v8 = vcvt.s32.f32 %v1013_v36 }
 0x3e4   :  { %4359 = vst [vmem:[#allocation67_spill] sm:$0xff] %v3202_v32  ;;  %vm881_vm13 = vcmp.ge.f32.partialorder %v3057_v22, %v3202_v32  ;;  %v3208_v35 = vcvt.s32.f32 %v1055_v41  ;;  %v3211_v56 = vsel %vm878_vm12, %v2566_v24, 128 }
 0x3e5   :  { %1016 = vmin.xlane.f32.xlu0 %v3204_v8  ;;  %v1041_v4 = vshra.s32 %v3211_v56, 16  ;;  %v3216_v53 = vsel %vm881_vm13, %v2566_v24, 128  ;;  %v1040_v0 = vand.u32 65535, %v3211_v56 }
 0x3e6   :  { %v3218_v26 = vpop.xlane.xlu0 %860  ;;  %1058 = vmin.xlane.f32.xlu1 %v3208_v35  ;;  %v1083_v36 = vshra.s32 %v3216_v53, 16  ;;  %v1082_v60 = vand.u32 65535, %v3216_v53 }
 0x3e7   :  { %4360 = vst [vmem:[#allocation68_spill] sm:$0xff] %v3218_v26  ;;  %vm880_vm14 = vcmp.ge.f32.partialorder %v3067_v7, %v3218_v26  ;;  %v3224_v41 = vpop.xlane.xlu1 %866  ;;  %v3226_v32 = vcvt.s32.f32 %v1041_v4 }
 0x3e8   :  { %4361 = vst [vmem:[#allocation69_spill] sm:$0xff] %v3224_v41  ;;  %vm883_vm15 = vcmp.ge.f32.partialorder %v3074_v15, %v3224_v41  ;;  %v3230_v27 = vcvt.s32.f32 %v1083_v36  ;;  %v3233_v52 = vsel %vm880_vm14, %v2566_v24, 128 }
 0x3e9   :  { %v3236_v51 = vsel %vm883_vm15, %v2566_v24, 128  ;;  %1044 = vmin.xlane.f32.xlu0 %v3226_v32  ;;  %v1069_v50 = vshra.s32 %v3233_v52, 16  ;;  %v1068_v56 = vand.u32 65535, %v3233_v52 }
 0x3ea   :  { %v3240_v26 = vpop.xlane.xlu0 %864  ;;  %1086 = vmin.xlane.f32.xlu1 %v3230_v27  ;;  %v1111_v4 = vshra.s32 %v3236_v51, 16  ;;  %v1110_v53 = vand.u32 65535, %v3236_v51 }
 0x3eb   :  { %4362 = vst [vmem:[#allocation70_spill] sm:$0xff] %v3240_v26  ;;  %vm882_vm0 = vcmp.ge.f32.partialorder %v3080_v10, %v3240_v26  ;;  %v3246_v36 = vcvt.s32.f32 %v1069_v50  ;;  %v900_v50 = vand.u32 65535, %v3102_v19  ;;  %v942_v26 = vand.u32 65535, %v3106_v58 }
 0x3ec   :  { %v3249_v41 = vsel %vm882_vm0, %v2566_v24, 128  ;;  %v3251_v49 = vcvt.s32.f32 %v1111_v4  ;;  %v916_v4 = vcvt.s32.f32 %v914_v38 }
 0x3ed   :  { %1072 = vmin.xlane.f32.xlu0 %v3246_v36  ;;  %v1097_v48 = vshra.s32 %v3249_v41, 16  ;;  %v944_v19 = vcvt.s32.f32 %v942_v26  ;;  %v972_v26 = vcvt.s32.f32 %v970_v37  ;;  %v1000_v37 = vcvt.s32.f32 %v998_v16 }
 0x3ee   :  { %1114 = vmin.xlane.f32.xlu1 %v3251_v49  ;;  %v1014_v16 = vcvt.s32.f32 %v1012_v54  ;;  %v1096_v52 = vand.u32 65535, %v3249_v41 }
 0x3ef   :  { %v3256_v47 = vcvt.s32.f32 %v1097_v48  ;;  %v902_v48 = vcvt.s32.f32 %v900_v50 }
 0x3f0   :  { %v1098_v41 = vcvt.s32.f32 %v1096_v52 }
 0x3f1   :  { %1100 = vmin.xlane.f32.xlu0 %v3256_v47 }
 0x45b   :  { %v3262_v46 = vpop.xlane.xlu1 %918 }
 0x45c   :  { %vm920_vm1 = vcmp.eq.f32.partialorder %v3099_v6, %v3262_v46 }
 0x45d   :  { %v921_v45 = vsel %vm920_vm1, %v916_v4, inf }
 0x45e   :  { %v3267_v40 = vpop.xlane.xlu0 %904  ;;  %922 = vmin.xlane.f32.xlu1 %v921_v45  ;;  %v930_v45 = vcvt.s32.f32 %v928_v42  ;;  %v958_v42 = vcvt.s32.f32 %v956_v62 }
 0x45f   :  { %v3270_v18 = vpop.xlane.xlu1 %946  ;;  %vm906_vm2 = vcmp.eq.f32.partialorder %v3116_v55, %v3267_v40 }
 0x460   :  { %vm948_vm3 = vcmp.eq.f32.partialorder %v3120_v14, %v3270_v18  ;;  %v907_v38 = vsel %vm906_vm2, %v902_v48, inf }
 0x461   :  { %908 = vmin.xlane.f32.xlu0 %v907_v38  ;;  %v949_v6 = vsel %vm948_vm3, %v944_v19, inf  ;;  %v986_v38 = vcvt.s32.f32 %v984_v33  ;;  %v1042_v33 = vcvt.s32.f32 %v1040_v0 }
 0x462   :  { %v3277_v58 = vpop.xlane.xlu0 %932  ;;  %950 = vmin.xlane.f32.xlu1 %v949_v6  ;;  %v1028_v6 = vcvt.s32.f32 %v1026_v43 }
 0x463   :  { %vm934_vm4 = vcmp.eq.f32.partialorder %v3138_v17, %v3277_v58  ;;  %v3282_v50 = vpop.xlane.xlu1 %974 }
 0x464   :  { %vm976_vm5 = vcmp.eq.f32.partialorder %v3142_v23, %v3282_v50  ;;  %v935_v14 = vsel %vm934_vm4, %v930_v45, inf }
 0x465   :  { %936 = vmin.xlane.f32.xlu0 %v935_v14  ;;  %v977_v55 = vsel %vm976_vm5, %v972_v26, inf  ;;  %v1056_v26 = vcvt.s32.f32 %v1054_v44  ;;  %v911_v44 = vcvt.f32.s32 %v3267_v40 }
 0x466   :  { %v3287_v4 = vpop.xlane.xlu0 %960  ;;  %978 = vmin.xlane.f32.xlu1 %v977_v55 }
 0x467   :  { %vm962_vm6 = vcmp.eq.f32.partialorder %v3160_v61, %v3287_v4  ;;  %v3292_v17 = vpop.xlane.xlu1 %1002 }
 0x468   :  { %vm1004_vm7 = vcmp.eq.f32.partialorder %v3164_v57, %v3292_v17  ;;  %v963_v23 = vsel %vm962_vm6, %v958_v42, inf  ;;  %v1084_v42 = vcvt.s32.f32 %v1082_v60  ;;  %v912_v60 = vshll.u32 %v911_v44, 16 }
 0x469   :  { %964 = vmin.xlane.f32.xlu0 %v963_v23  ;;  %v1005_v48 = vsel %vm1004_vm7, %v1000_v37, inf  ;;  %v1070_v23 = vcvt.s32.f32 %v1068_v56 }
 0x46a   :  { %v3297_v19 = vpop.xlane.xlu0 %988  ;;  %1006 = vmin.xlane.f32.xlu1 %v1005_v48 }
 0x46b   :  { %vm990_vm8 = vcmp.eq.f32.partialorder %v3182_v29, %v3297_v19  ;;  %v3302_v61 = vpop.xlane.xlu1 %1030 }
 0x46c   :  { %vm1032_vm9 = vcmp.eq.f32.partialorder %v3186_v21, %v3302_v61  ;;  %v991_v57 = vsel %vm990_vm8, %v986_v38, inf }
 0x46d   :  { %992 = vmin.xlane.f32.xlu0 %v991_v57  ;;  %v1033_v62 = vsel %vm1032_vm9, %v1028_v6, inf }
 0x46e   :  { %v3307_v45 = vpop.xlane.xlu0 %1016  ;;  %1034 = vmin.xlane.f32.xlu1 %v1033_v62 }
 0x46f   :  { %vm1018_vm10 = vcmp.eq.f32.partialorder %v3204_v8, %v3307_v45  ;;  %v3312_v29 = vpop.xlane.xlu1 %1058 }
 0x470   :  { %vm1060_vm11 = vcmp.eq.f32.partialorder %v3208_v35, %v3312_v29  ;;  %v1019_v21 = vsel %vm1018_vm10, %v1014_v16, inf }
 0x471   :  { %1020 = vmin.xlane.f32.xlu0 %v1019_v21  ;;  %v1061_v14 = vsel %vm1060_vm11, %v1056_v26, inf  ;;  %v939_v26 = vcvt.f32.s32 %v3277_v58  ;;  %v981_v21 = vcvt.f32.s32 %v3282_v50 }
 0x472   :  { %v3317_v55 = vpop.xlane.xlu0 %1044  ;;  %1062 = vmin.xlane.f32.xlu1 %v1061_v14 }
 0x473   :  { %vm1046_vm12 = vcmp.eq.f32.partialorder %v3226_v32, %v3317_v55  ;;  %v3322_v8 = vpop.xlane.xlu1 %1086  ;;  %v1112_v32 = vcvt.s32.f32 %v1110_v53  ;;  %v940_v52 = vshll.u32 %v939_v26, 16  ;;  %v982_v50 = vshll.u32 %v981_v21, 16 }
 0x474   :  { %vm1088_vm13 = vcmp.eq.f32.partialorder %v3230_v27, %v3322_v8  ;;  %v1047_v35 = vsel %vm1046_vm12, %v1042_v33, inf  ;;  %v4363_v33 = vmov 0.0  }
 0x475   :  { %1048 = vmin.xlane.f32.xlu0 %v1047_v35  ;;  %v1089_v43 = vsel %vm1088_vm13, %v1084_v42, inf  ;;  %v1009_v42 = vcvt.f32.s32 %v3292_v17  ;;  %v995_v17 = vcvt.f32.s32 %v3297_v19 }
 0x476   :  { %v3327_v37 = vpop.xlane.xlu0 %1072  ;;  %1090 = vmin.xlane.f32.xlu1 %v1089_v43 }
 0x477   :  { %vm1074_vm14 = vcmp.eq.f32.partialorder %v3246_v36, %v3327_v37  ;;  %v3331_v51 = vpop.xlane.xlu1 %1114  ;;  %v925_v36 = vcvt.f32.s32 %v3262_v46 }
 0x478   :  { %vm1116_vm15 = vcmp.eq.f32.partialorder %v3251_v49, %v3331_v51  ;;  %v1075_v48 = vsel %vm1074_vm14, %v1070_v23, inf  ;;  %v953_v49 = vcvt.f32.s32 %v3270_v18  ;;  %v967_v18 = vcvt.f32.s32 %v3287_v4 }
 0x479   :  { %1076 = vmin.xlane.f32.xlu0 %v1075_v48  ;;  %v1117_v27 = vsel %vm1116_vm15, %v1112_v32, inf  ;;  %v926_v57 = vshll.u32 %v925_v36, 16 }
 0x47a   :  { %v3335_v54 = vpop.xlane.xlu0 %1100  ;;  %1118 = vmin.xlane.f32.xlu1 %v1117_v27  ;;  %v954_v56 = vshll.u32 %v953_v49, 16  ;;  %v968_v44 = vshll.u32 %v967_v18, 16 }
 0x47b   :  { %vm1102_vm0 = vcmp.eq.f32.partialorder %v3256_v47, %v3335_v54 }
 0x47c   :  { %v1103_v38 = vsel %vm1102_vm0, %v1098_v41, inf }
 0x47d   :  { %1104 = vmin.xlane.f32.xlu0 %v1103_v38 }
 0x4e7   :  { %v923_v6 = vpop.xlane.xlu1 %922 }
 0x4e8   :  { %v924_v62 = vcvt.f32.s32 %v923_v6  ;;  %v1010_v6 = vshll.u32 %v1009_v42, 16 }
 0x4ea   :  { %v927_v0 = vadd.s32 %v926_v57, %v924_v62  ;;  %v909_v16 = vpop.xlane.xlu0 %908 }
 0x4eb   :  { %v910_v14 = vcvt.f32.s32 %v909_v16  ;;  %v951_v47 = vpop.xlane.xlu1 %950 }
 0x4ec   :  { %vm1125_vm1 = vcmp.eq.s32.totalorder %v2566_v24, %v927_v0  ;;  %v952_v46 = vcvt.f32.s32 %v951_v47  ;;  %v1037_v0 = vcvt.f32.s32 %v3302_v61 }
 0x4ed   :  { %v3346_v40 = vsel %vm1125_vm1, 1.0, %v4363_v33  ;;  %v913_v53 = vadd.s32 %v912_v60, %v910_v14  ;;  %v996_v14 = vshll.u32 %v995_v17, 16 }
 0x4ee   :  { %4364 = vst [vmem:[#allocation71_spill] sm:$0xff] %v3346_v40  ;;  %v955_v35 = vadd.s32 %v954_v56, %v952_v46  ;;  %v937_v43 = vpop.xlane.xlu0 %936  ;;  %v1285_v58 = vsub.f32 1.0, %v3346_v40  ;;  %v1065_v46 = vcvt.f32.s32 %v3312_v29  ;;  %v1038_v42 = vshll.u32 %v1037_v0, 16 }
 0x4ef   :  { %vm1124_vm2 = vcmp.eq.s32.totalorder %v2566_v24, %v913_v53  ;;  %v938_v23 = vcvt.f32.s32 %v937_v43  ;;  %v979_v32 = vpop.xlane.xlu1 %978 }
 0x4f0   :  { %v3353_v48 = vsel %vm1124_vm2, 1.0, %v4363_v33  ;;  %vm1127_vm3 = vcmp.eq.s32.totalorder %v2566_v24, %v955_v35  ;;  %v980_v27 = vcvt.f32.s32 %v979_v32  ;;  %v3357_v4 = vmul.f32 %v1285_v58, %v2941_v30 }
 0x4f1   :  { %4365 = vst [vmem:[#allocation72_spill] sm:$0xff] %v3353_v48  ;;  %v3361_v41 = vsel %vm1127_vm3, 1.0, %v4363_v33  ;;  %v941_v38 = vadd.s32 %v940_v52, %v938_v23  ;;  %v1284_v36 = vsub.f32 1.0, %v3353_v48  ;;  %v1066_v17 = vshll.u32 %v1065_v46, 16 }
 0x4f2   :  { %4366 = vst [vmem:[#allocation73_spill] sm:$0xff] %v3361_v41  ;;  %v983_v57 = vadd.s32 %v982_v50, %v980_v27  ;;  %v965_v49 = vpop.xlane.xlu0 %964  ;;  %1318 = vmax.xlane.f32.xlu1 %v3357_v4  ;;  %v1287_v62 = vsub.f32 1.0, %v3361_v41  ;;  %v1051_v50 = vcvt.f32.s32 %v3317_v55  ;;  %v4418_v41 = vld [vmem:[#allocation32_spill] sm:$0xff] }
 0x4f3   :  { %vm1126_vm4 = vcmp.eq.s32.totalorder %v2566_v24, %v941_v38  ;;  %v966_v30 = vcvt.f32.s32 %v965_v49  ;;  %v1007_v19 = vpop.xlane.xlu1 %1006  ;;  %v3369_v16 = vmul.f32 %v1284_v36, %v2956_v11  ;;  %v1023_v11 = vcvt.f32.s32 %v3307_v45 }
 0x4f4   :  { %v3372_v60 = vsel %vm1126_vm4, 1.0, %v4363_v33  ;;  %vm1129_vm5 = vcmp.eq.s32.totalorder %v2566_v24, %v983_v57  ;;  %v1008_v26 = vcvt.f32.s32 %v1007_v19  ;;  %v3376_v21 = vmul.f32 %v1287_v62, %v2960_v20 }
 0x4f5   :  { %4367 = vst [vmem:[#allocation74_spill] sm:$0xff] %v3372_v60  ;;  %v3379_v47 = vsel %vm1129_vm5, 1.0, %v4363_v33  ;;  %v969_v61 = vadd.s32 %v968_v44, %v966_v30  ;;  %1316 = vmax.xlane.f32.xlu0 %v3369_v16  ;;  %v1286_v56 = vsub.f32 1.0, %v3372_v60  ;;  %v1024_v27 = vshll.u32 %v1023_v11, 16  ;;  %v2345_v60 = vld [vmem:[#allocation5 + $0x60] sm:$0xff] }
 0x4f6   :  { %4368 = vst [vmem:[#allocation75_spill] sm:$0xff] %v3379_v47  ;;  %v1011_v53 = vadd.s32 %v1010_v6, %v1008_v26  ;;  %v993_v18 = vpop.xlane.xlu0 %992  ;;  %1322 = vmax.xlane.f32.xlu1 %v3376_v21  ;;  %v1289_v20 = vsub.f32 1.0, %v3379_v47  ;;  %v1052_v30 = vshll.u32 %v1051_v50, 16 }
 0x4f7   :  { %vm1128_vm6 = vcmp.eq.s32.totalorder %v2566_v24, %v969_v61  ;;  %v994_v35 = vcvt.f32.s32 %v993_v18  ;;  %v1035_v43 = vpop.xlane.xlu1 %1034  ;;  %v3389_v58 = vmul.f32 %v1286_v56, %v2976_v9 }
 0x4f8   :  { %v3392_v52 = vsel %vm1128_vm6, 1.0, %v4363_v33  ;;  %vm1131_vm7 = vcmp.eq.s32.totalorder %v2566_v24, %v1011_v53  ;;  %v1036_v45 = vcvt.f32.s32 %v1035_v43  ;;  %v3396_v29 = vmul.f32 %v1289_v20, %v2980_v13 }
 0x4f9   :  { %4369 = vst [vmem:[#allocation76_spill] sm:$0xff] %v3392_v52  ;;  %v3400_v23 = vsel %vm1131_vm7, 1.0, %v4363_v33  ;;  %v997_v32 = vadd.s32 %v996_v14, %v994_v35  ;;  %1320 = vmax.xlane.f32.xlu0 %v3389_v58  ;;  %v1288_v9 = vsub.f32 1.0, %v3392_v52  ;;  %v1093_v13 = vcvt.f32.s32 %v3322_v8  ;;  %v4385_v52 = vld [vmem:[#allocation17_spill] sm:$0xff] }
 0x4fa   :  { %4370 = vst [vmem:[#allocation77_spill] sm:$0xff] %v3400_v23  ;;  %v1039_v38 = vadd.s32 %v1038_v42, %v1036_v45  ;;  %v1021_v36 = vpop.xlane.xlu0 %1020  ;;  %1326 = vmax.xlane.f32.xlu1 %v3396_v29  ;;  %v1291_v44 = vsub.f32 1.0, %v3400_v23  ;;  %v1121_v14 = vcvt.f32.s32 %v3331_v51 }
 0x4fb   :  { %vm1130_vm8 = vcmp.eq.s32.totalorder %v2566_v24, %v997_v32  ;;  %v1022_v55 = vcvt.f32.s32 %v1021_v36  ;;  %v1063_v6 = vpop.xlane.xlu1 %1062  ;;  %v3409_v57 = vmul.f32 %v1288_v9, %v2996_v25  ;;  %v1079_v25 = vcvt.f32.s32 %v3327_v37 }
 0x4fc   :  { %v3412_v49 = vsel %vm1130_vm8, 1.0, %v4363_v33  ;;  %vm1133_vm9 = vcmp.eq.s32.totalorder %v2566_v24, %v1039_v38  ;;  %v1064_v62 = vcvt.f32.s32 %v1063_v6  ;;  %v3416_v0 = vmul.f32 %v1291_v44, %v3000_v39 }
 0x4fd   :  { %4371 = vst [vmem:[#allocation78_spill] sm:$0xff] %v3412_v49  ;;  %v3419_v19 = vsel %vm1133_vm9, 1.0, %v4363_v33  ;;  %v1025_v8 = vadd.s32 %v1024_v27, %v1022_v55  ;;  %1324 = vmax.xlane.f32.xlu0 %v3409_v57  ;;  %v1290_v26 = vsub.f32 1.0, %v3412_v49  ;;  %v1094_v11 = vshll.u32 %v1093_v13, 16 }
 0x4fe   :  { %4372 = vst [vmem:[#allocation79_spill] sm:$0xff] %v3419_v19  ;;  %v1067_v61 = vadd.s32 %v1066_v17, %v1064_v62  ;;  %v1049_v56 = vpop.xlane.xlu0 %1048  ;;  %1330 = vmax.xlane.f32.xlu1 %v3416_v0  ;;  %v1293_v39 = vsub.f32 1.0, %v3419_v19  ;;  %v1080_v45 = vshll.u32 %v1079_v25, 16  ;;  %v1107_v27 = vcvt.f32.s32 %v3335_v54 }
 0x4ff   :  { %vm1132_vm10 = vcmp.eq.s32.totalorder %v2566_v24, %v1025_v8  ;;  %v1050_v46 = vcvt.f32.s32 %v1049_v56  ;;  %v1091_v53 = vpop.xlane.xlu1 %1090  ;;  %v3429_v18 = vmul.f32 %v1290_v26, %v3016_v2  ;;  %v1122_v2 = vshll.u32 %v1121_v14, 16 }
 0x500   :  { %v3432_v20 = vsel %vm1132_vm10, 1.0, %v4363_v33  ;;  %vm1135_vm11 = vcmp.eq.s32.totalorder %v2566_v24, %v1067_v61  ;;  %v1092_v37 = vcvt.f32.s32 %v1091_v53  ;;  %v3436_v51 = vmul.f32 %v1293_v39, %v3020_v1 }
 0x501   :  { %4373 = vst [vmem:[#allocation80_spill] sm:$0xff] %v3432_v20  ;;  %v3439_v42 = vsel %vm1135_vm11, 1.0, %v4363_v33  ;;  %v1053_v35 = vadd.s32 %v1052_v30, %v1050_v46  ;;  %1328 = vmax.xlane.f32.xlu0 %v3429_v18  ;;  %v1292_v43 = vsub.f32 1.0, %v3432_v20  ;;  %v1108_v8 = vshll.u32 %v1107_v27, 16 }
 0x502   :  { %4374 = vst [vmem:[#allocation81_spill] sm:$0xff] %v3439_v42  ;;  %v1095_v50 = vadd.s32 %v1094_v11, %v1092_v37  ;;  %v1077_v32 = vpop.xlane.xlu0 %1076  ;;  %1334 = vmax.xlane.f32.xlu1 %v3436_v51  ;;  %v1295_v9 = vsub.f32 1.0, %v3439_v42 }
 0x503   :  { %vm1134_vm12 = vcmp.eq.s32.totalorder %v2566_v24, %v1053_v35  ;;  %v1078_v1 = vcvt.f32.s32 %v1077_v32  ;;  %v1119_v17 = vpop.xlane.xlu1 %1118  ;;  %v3448_v38 = vmul.f32 %v1292_v43, %v3035_v59 }
 0x504   :  { %v3451_v36 = vsel %vm1134_vm12, 1.0, %v4363_v33  ;;  %vm1137_vm13 = vcmp.eq.s32.totalorder %v2566_v24, %v1095_v50  ;;  %v1120_v44 = vcvt.f32.s32 %v1119_v17  ;;  %v3455_v13 = vmul.f32 %v1295_v9, %v3039_v63 }
 0x505   :  { %4375 = vst [vmem:[#allocation82_spill] sm:$0xff] %v3451_v36  ;;  %v3458_v55 = vsel %vm1137_vm13, 1.0, %v4363_v33  ;;  %v1081_v54 = vadd.s32 %v1080_v45, %v1078_v1  ;;  %1332 = vmax.xlane.f32.xlu0 %v3448_v38  ;;  %v1294_v6 = vsub.f32 1.0, %v3451_v36 }
 0x506   :  { %4376 = vst [vmem:[#allocation83_spill] sm:$0xff] %v3458_v55  ;;  %v1123_v62 = vadd.s32 %v1122_v2, %v1120_v44  ;;  %v1105_v59 = vpop.xlane.xlu0 %1104  ;;  %1338 = vmax.xlane.f32.xlu1 %v3455_v13  ;;  %v1297_v30 = vsub.f32 1.0, %v3458_v55 }
 0x507   :  { %vm1136_vm14 = vcmp.eq.s32.totalorder %v2566_v24, %v1081_v54  ;;  %v1106_v26 = vcvt.f32.s32 %v1105_v59  ;;  %v3466_v63 = vmul.f32 %v1294_v6, %v3053_v3 }
 0x508   :  { %v3469_v25 = vsel %vm1136_vm14, 1.0, %v4363_v33  ;;  %vm1139_vm15 = vcmp.eq.s32.totalorder %v2566_v24, %v1123_v62  ;;  %v3473_v14 = vmul.f32 %v1297_v30, %v3057_v22 }
 0x509   :  { %4377 = vst [vmem:[#allocation84_spill] sm:$0xff] %v3469_v25  ;;  %v3476_v61 = vsel %vm1139_vm15, 1.0, %v4363_v33  ;;  %v1109_v56 = vadd.s32 %v1108_v8, %v1106_v26  ;;  %1336 = vmax.xlane.f32.xlu0 %v3466_v63  ;;  %v1296_v39 = vsub.f32 1.0, %v3469_v25 }
 0x50a   :  { %4378 = vst [vmem:[#allocation85_spill] sm:$0xff] %v3476_v61  ;;  %1342 = vmax.xlane.f32.xlu1 %v3473_v14  ;;  %v1299_v3 = vsub.f32 1.0, %v3476_v61 }
 0x50b   :  { %vm1138_vm0 = vcmp.eq.s32.totalorder %v2566_v24, %v1109_v56  ;;  %v3484_v11 = vmul.f32 %v1296_v39, %v3067_v7 }
 0x50c   :  { %v3487_v22 = vsel %vm1138_vm0, 1.0, %v4363_v33  ;;  %v3490_v46 = vmul.f32 %v1299_v3, %v3074_v15 }
 0x50d   :  { %4379 = vst [vmem:[#allocation86_spill] sm:$0xff] %v3487_v22  ;;  %1340 = vmax.xlane.f32.xlu0 %v3484_v11  ;;  %v1298_v53 = vsub.f32 1.0, %v3487_v22 }
 0x50e   :  { %1346 = vmax.xlane.f32.xlu1 %v3490_v46 }
 0x50f   :  { %v3496_v37 = vmul.f32 %v1298_v53, %v3080_v10 }
 0x511   :  { %1344 = vmax.xlane.f32.xlu0 %v3496_v37 }
 0x57b   :  { %v3499_v35 = vpop.xlane.xlu1 %1318 }
 0x57c   :  { %vm1349_vm1 = vcmp.ge.f32.partialorder %v3357_v4, %v3499_v35 }
 0x57d   :  { %v3504_v7 = vsel %vm1349_vm1, %v2566_v24, 128 }
 0x57e   :  { %v1395_v15 = vshra.s32 %v3504_v7, 16  ;;  %v3507_v43 = vpop.xlane.xlu0 %1316 }
 0x57f   :  { %vm1348_vm2 = vcmp.ge.f32.partialorder %v3369_v16, %v3507_v43  ;;  %v3511_v45 = vpop.xlane.xlu1 %1322 }
 0x580   :  { %v3514_v10 = vsel %vm1348_vm2, %v2566_v24, 128  ;;  %vm1351_vm3 = vcmp.ge.f32.partialorder %v3376_v21, %v3511_v45  ;;  %v3518_v2 = vcvt.s32.f32 %v1395_v15 }
 0x581   :  { %v1381_v4 = vshra.s32 %v3514_v10, 16  ;;  %v3522_v50 = vsel %vm1351_vm3, %v2566_v24, 128 }
 0x582   :  { %v1423_v32 = vshra.s32 %v3522_v50, 16  ;;  %v3525_v9 = vpop.xlane.xlu0 %1320  ;;  %1398 = vmin.xlane.f32.xlu1 %v3518_v2 }
 0x583   :  { %vm1350_vm4 = vcmp.ge.f32.partialorder %v3389_v58, %v3525_v9  ;;  %v3530_v16 = vpop.xlane.xlu1 %1326  ;;  %v3532_v27 = vcvt.s32.f32 %v1381_v4 }
 0x584   :  { %v3535_v21 = vsel %vm1350_vm4, %v2566_v24, 128  ;;  %vm1353_vm5 = vcmp.ge.f32.partialorder %v3396_v29, %v3530_v16  ;;  %v3539_v1 = vcvt.s32.f32 %v1423_v32 }
 0x585   :  { %v1409_v17 = vshra.s32 %v3535_v21, 16  ;;  %v3543_v44 = vsel %vm1353_vm5, %v2566_v24, 128  ;;  %1384 = vmin.xlane.f32.xlu0 %v3532_v27 }
 0x586   :  { %v1451_v58 = vshra.s32 %v3543_v44, 16  ;;  %v3547_v54 = vpop.xlane.xlu0 %1324  ;;  %1426 = vmin.xlane.f32.xlu1 %v3539_v1 }
 0x587   :  { %vm1352_vm6 = vcmp.ge.f32.partialorder %v3409_v57, %v3547_v54  ;;  %v3552_v6 = vpop.xlane.xlu1 %1330  ;;  %v3554_v29 = vcvt.s32.f32 %v1409_v17 }
 0x588   :  { %v3557_v62 = vsel %vm1352_vm6, %v2566_v24, 128  ;;  %vm1355_vm7 = vcmp.ge.f32.partialorder %v3416_v0, %v3552_v6  ;;  %v3561_v59 = vcvt.s32.f32 %v1451_v58 }
 0x589   :  { %v1437_v30 = vshra.s32 %v3557_v62, 16  ;;  %v3565_v8 = vsel %vm1355_vm7, %v2566_v24, 128  ;;  %1412 = vmin.xlane.f32.xlu0 %v3554_v29 }
 0x58a   :  { %v1479_v57 = vshra.s32 %v3565_v8, 16  ;;  %v3569_v26 = vpop.xlane.xlu0 %1328  ;;  %1454 = vmin.xlane.f32.xlu1 %v3561_v59 }
 0x58b   :  { %vm1354_vm8 = vcmp.ge.f32.partialorder %v3429_v18, %v3569_v26  ;;  %v3574_v56 = vpop.xlane.xlu1 %1334  ;;  %v3576_v0 = vcvt.s32.f32 %v1437_v30 }
 0x58c   :  { %v3579_v39 = vsel %vm1354_vm8, %v2566_v24, 128  ;;  %vm1357_vm9 = vcmp.ge.f32.partialorder %v3436_v51, %v3574_v56  ;;  %v3583_v3 = vcvt.s32.f32 %v1479_v57 }
 0x58d   :  { %v1465_v53 = vshra.s32 %v3579_v39, 16  ;;  %v3587_v15 = vsel %vm1357_vm9, %v2566_v24, 128  ;;  %1440 = vmin.xlane.f32.xlu0 %v3576_v0 }
 0x58e   :  { %v1507_v18 = vshra.s32 %v3587_v15, 16  ;;  %v3591_v4 = vpop.xlane.xlu0 %1332  ;;  %1482 = vmin.xlane.f32.xlu1 %v3583_v3 }
 0x58f   :  { %vm1356_vm10 = vcmp.ge.f32.partialorder %v3448_v38, %v3591_v4  ;;  %v3596_v32 = vpop.xlane.xlu1 %1338  ;;  %v3598_v51 = vcvt.s32.f32 %v1465_v53 }
 0x590   :  { %v3601_v17 = vsel %vm1356_vm10, %v2566_v24, 128  ;;  %vm1359_vm11 = vcmp.ge.f32.partialorder %v3455_v13, %v3596_v32  ;;  %v3605_v58 = vcvt.s32.f32 %v1507_v18 }
 0x591   :  { %v1493_v30 = vshra.s32 %v3601_v17, 16  ;;  %v3609_v57 = vsel %vm1359_vm11, %v2566_v24, 128  ;;  %1468 = vmin.xlane.f32.xlu0 %v3598_v51 }
 0x592   :  { %v1535_v38 = vshra.s32 %v3609_v57, 16  ;;  %v3613_v22 = vpop.xlane.xlu0 %1336  ;;  %1510 = vmin.xlane.f32.xlu1 %v3605_v58 }
 0x593   :  { %vm1358_vm12 = vcmp.ge.f32.partialorder %v3466_v63, %v3613_v22  ;;  %v3618_v53 = vpop.xlane.xlu1 %1342  ;;  %v3620_v13 = vcvt.s32.f32 %v1493_v30 }
 0x594   :  { %v3623_v18 = vsel %vm1358_vm12, %v2566_v24, 128  ;;  %vm1361_vm13 = vcmp.ge.f32.partialorder %v3473_v14, %v3618_v53  ;;  %v3627_v61 = vcvt.s32.f32 %v1535_v38 }
 0x595   :  { %v1521_v25 = vshra.s32 %v3623_v18, 16  ;;  %v3631_v33 = vsel %vm1361_vm13, %v2566_v24, 128  ;;  %1496 = vmin.xlane.f32.xlu0 %v3620_v13 }
 0x596   :  { %v1563_v63 = vshra.s32 %v3631_v33, 16  ;;  %v3635_v55 = vpop.xlane.xlu0 %1340  ;;  %1538 = vmin.xlane.f32.xlu1 %v3627_v61 }
 0x597   :  { %vm1360_vm14 = vcmp.ge.f32.partialorder %v3484_v11, %v3635_v55  ;;  %v3640_v30 = vpop.xlane.xlu1 %1346  ;;  %v3642_v14 = vcvt.s32.f32 %v1521_v25 }
 0x598   :  { %v3645_v38 = vsel %vm1360_vm14, %v2566_v24, 128  ;;  %vm1363_vm15 = vcmp.ge.f32.partialorder %v3490_v46, %v3640_v30  ;;  %v3649_v36 = vcvt.s32.f32 %v1563_v63 }
 0x599   :  { %v1549_v42 = vshra.s32 %v3645_v38, 16  ;;  %v3653_v20 = vsel %vm1363_vm15, %v2566_v24, 128  ;;  %1524 = vmin.xlane.f32.xlu0 %v3642_v14 }
 0x59a   :  { %v1591_v11 = vshra.s32 %v3653_v20, 16  ;;  %v3657_v19 = vpop.xlane.xlu0 %1344  ;;  %1566 = vmin.xlane.f32.xlu1 %v3649_v36 }
 0x59b   :  { %vm1362_vm0 = vcmp.ge.f32.partialorder %v3496_v37, %v3657_v19  ;;  %v3662_v25 = vcvt.s32.f32 %v1549_v42  ;;  %v4380_v42 = vld [vmem:[#allocation12_spill] sm:$0xff]  ;;  %v4381_v37 = vld [vmem:[#allocation13_spill] sm:$0xff] }
 0x59c   :  { %v3665_v46 = vsel %vm1362_vm0, %v2566_v24, 128  ;;  %v3667_v63 = vcvt.s32.f32 %v1591_v11  ;;  %v4382_v11 = vld [vmem:[#allocation14_spill] sm:$0xff]  ;;  %v4384_v24 = vld [vmem:[#allocation16_spill] sm:$0xff] }
 0x59d   :  { %v1577_v49 = vshra.s32 %v3665_v46, 16  ;;  %1552 = vmin.xlane.f32.xlu0 %v3662_v25 }
 0x59e   :  { %1594 = vmin.xlane.f32.xlu1 %v3667_v63 }
 0x59f   :  { %v3672_v23 = vcvt.s32.f32 %v1577_v49  ;;  %v4383_v49 = vld [vmem:[#allocation15_spill] sm:$0xff] }
 0x5a1   :  { %1580 = vmin.xlane.f32.xlu0 %v3672_v23 }
 0x5a2   :  { %390 = vadd.xlane.f32.xlu1 %v2596_v12  ;;  %v4386_v12 = vld [vmem:[#allocation18_spill] sm:$0xff] }
 0x5a5   :  { %388 = vadd.xlane.f32.xlu0 %v2602_v5  ;;  %v4387_v5 = vld [vmem:[#allocation19_spill] sm:$0xff] }
 0x5a6   :  { %394 = vadd.xlane.f32.xlu1 %v2608_v28  ;;  %v4388_v28 = vld [vmem:[#allocation20_spill] sm:$0xff] }
 0x5a9   :  { %392 = vadd.xlane.f32.xlu0 %v2614_v31  ;;  %v4389_v31 = vld [vmem:[#allocation21_spill] sm:$0xff] }
 0x5aa   :  { %398 = vadd.xlane.f32.xlu1 %v2620_v34  ;;  %v4390_v34 = vld [vmem:[#allocation22_spill] sm:$0xff] }
 0x5ad   :  { %396 = vadd.xlane.f32.xlu0 %v4380_v42  ;;  %v2342_v42 = vld [vmem:[#allocation5 + $0x78] sm:$0xff] }
 0x5ae   :  { %402 = vadd.xlane.f32.xlu1 %v4381_v37  ;;  %v2343_v37 = vld [vmem:[#allocation5 + $0x70] sm:$0xff] }
 0x5af   :  { %v1827_v47 = vpack.c.bf16 %v2342_v42, %v2343_v37 }
 0x5b1   :  { %400 = vadd.xlane.f32.xlu0 %v4382_v11  ;;  %v2344_v11 = vld [vmem:[#allocation5 + $0x68] sm:$0xff]  ;;  %2112 = vmatprep.subr.bf16.mxu1 %v1827_v47 }
 0x5b2   :  { %406 = vadd.xlane.f32.xlu1 %v4383_v49  ;;  %v1826_v49 = vpack.c.bf16 %v2344_v11, %v2345_v60  ;;  %2113 = vmatpush3.bf16.msra.mxu1 %v1827_v47  ;;  %v1408_v47 = vand.u32 65535, %v3535_v21  ;;  %v1436_v21 = vand.u32 65535, %v3557_v62  ;;  %v1464_v62 = vand.u32 65535, %v3579_v39 }
 0x5b3   :  { %v1492_v39 = vand.u32 65535, %v3601_v17  ;;  %v2349_v17 = vld [vmem:[#allocation5 + $0x48] sm:$0xff] }
 0x5b4   :  { %2114 = vmatprep.subr.bf16.mxu1 %v1826_v49 }
 0x5b5   :  { %404 = vadd.xlane.f32.xlu0 %v4384_v24  ;;  %v2346_v24 = vld [vmem:[#allocation5 + $0x50] sm:$0xff] }
 0x5b6   :  { %410 = vadd.xlane.f32.xlu1 %v4385_v52  ;;  %v2347_v52 = vld [vmem:[#allocation5 + $0x58] sm:$0xff]  ;;  %2115 = vmatpush3.bf16.msra.mxu1 %v1826_v49  ;;  %v1450_v49 = vand.u32 65535, %v3543_v44  ;;  %v1478_v44 = vand.u32 65535, %v3565_v8  ;;  %v1506_v8 = vand.u32 65535, %v3587_v15  ;;  %v1534_v15 = vand.u32 65535, %v3609_v57 }
 0x5b7   :  { %v1494_v57 = vcvt.s32.f32 %v1492_v39 }
 0x5b9   :  { %408 = vadd.xlane.f32.xlu0 %v4386_v12  ;;  %v1825_v12 = vpack.c.bf16 %v2347_v52, %v2346_v24  ;;  %v1410_v52 = vcvt.s32.f32 %v1408_v47 }
 0x5ba   :  { %414 = vadd.xlane.f32.xlu1 %v4387_v5  ;;  %v1394_v5 = vand.u32 65535, %v3504_v7 }
 0x5bb   :  { %2116 = vmatprep.subr.bf16.mxu1 %v1825_v12 }
 0x5bc   :  { %2117 = vmatpush3.bf16.msra.mxu1 %v1825_v12  ;;  %v1396_v42 = vcvt.s32.f32 %v1394_v5  ;;  %v1452_v12 = vcvt.s32.f32 %v1450_v49  ;;  %v1508_v49 = vcvt.s32.f32 %v1506_v8  ;;  %v1590_v8 = vand.u32 65535, %v3653_v20 }
 0x5bd   :  { %412 = vadd.xlane.f32.xlu0 %v4388_v28  ;;  %v1380_v28 = vand.u32 65535, %v3514_v10 }
 0x5be   :  { %418 = vadd.xlane.f32.xlu1 %v4389_v31  ;;  %v1422_v31 = vand.u32 65535, %v3522_v50 }
 0x5bf   :  { %v1382_v11 = vcvt.s32.f32 %v1380_v28 }
 0x5c0   :  { %v1424_v10 = vcvt.s32.f32 %v1422_v31  ;;  %v1438_v31 = vcvt.s32.f32 %v1436_v21  ;;  %v1520_v21 = vand.u32 65535, %v3623_v18 }
 0x5c1   :  { %416 = vadd.xlane.f32.xlu0 %v4390_v34 }
 0x60b   :  { %v3694_v34 = vpop.xlane.xlu1 %1398 }
 0x60c   :  { %vm1400_vm1 = vcmp.eq.f32.partialorder %v3518_v2, %v3694_v34 }
 0x60d   :  { %v1401_v60 = vsel %vm1400_vm1, %v1396_v42, inf  ;;  %v1480_v42 = vcvt.s32.f32 %v1478_v44 }
 0x60e   :  { %v3699_v37 = vpop.xlane.xlu0 %1384  ;;  %1402 = vmin.xlane.f32.xlu1 %v1401_v60 }
 0x60f   :  { %vm1386_vm2 = vcmp.eq.f32.partialorder %v3532_v27, %v3699_v37  ;;  %v3704_v7 = vpop.xlane.xlu1 %1426 }
 0x610   :  { %vm1428_vm3 = vcmp.eq.f32.partialorder %v3539_v1, %v3704_v7  ;;  %v1387_v50 = vsel %vm1386_vm2, %v1382_v11, inf  ;;  %v1466_v11 = vcvt.s32.f32 %v1464_v62  ;;  %v2350_v62 = vld [vmem:[#allocation5 + $0x30] sm:$0xff] }
 0x611   :  { %1388 = vmin.xlane.f32.xlu0 %v1387_v50  ;;  %v1429_v2 = vsel %vm1428_vm3, %v1424_v10, inf  ;;  %v2348_v50 = vld [vmem:[#allocation5 + $0x40] sm:$0xff] }
 0x612   :  { %v3709_v24 = vpop.xlane.xlu0 %1412  ;;  %1430 = vmin.xlane.f32.xlu1 %v1429_v2  ;;  %v1824_v2 = vpack.c.bf16 %v2349_v17, %v2348_v50  ;;  %v2354_v17 = vld [vmem:[#allocation5 + $0x10] sm:$0xff] }
 0x613   :  { %vm1414_vm4 = vcmp.eq.f32.partialorder %v3554_v29, %v3709_v24  ;;  %v3714_v27 = vpop.xlane.xlu1 %1454 }
 0x614   :  { %vm1456_vm5 = vcmp.eq.f32.partialorder %v3561_v59, %v3714_v27  ;;  %v1415_v1 = vsel %vm1414_vm4, %v1410_v52, inf  ;;  %2118 = vmatprep.subr.bf16.mxu1 %v1824_v2 }
 0x615   :  { %1416 = vmin.xlane.f32.xlu0 %v1415_v1  ;;  %v1457_v5 = vsel %vm1456_vm5, %v1452_v12, inf  ;;  %2119 = vmatpush3.bf16.msra.mxu1 %v1824_v2  ;;  %v1548_v1 = vand.u32 65535, %v3645_v38  ;;  %v2355_v2 = vld [vmem:[#allocation5 + $0x18] sm:$0xff] }
 0x616   :  { %v3719_v28 = vpop.xlane.xlu0 %1440  ;;  %1458 = vmin.xlane.f32.xlu1 %v1457_v5 }
 0x617   :  { %vm1442_vm6 = vcmp.eq.f32.partialorder %v3576_v0, %v3719_v28  ;;  %v3724_v29 = vpop.xlane.xlu1 %1482  ;;  %v1550_v20 = vcvt.s32.f32 %v1548_v1 }
 0x618   :  { %vm1484_vm7 = vcmp.eq.f32.partialorder %v3583_v3, %v3724_v29  ;;  %v1443_v59 = vsel %vm1442_vm6, %v1438_v31, inf  ;;  %v2351_v31 = vld [vmem:[#allocation5 + $0x38] sm:$0xff] }
 0x619   :  { %1444 = vmin.xlane.f32.xlu0 %v1443_v59  ;;  %v1485_v60 = vsel %vm1484_vm7, %v1480_v42, inf }
 0x61a   :  { %v3729_v47 = vpop.xlane.xlu0 %1468  ;;  %1486 = vmin.xlane.f32.xlu1 %v1485_v60  ;;  %v1576_v60 = vand.u32 65535, %v3665_v46 }
 0x61b   :  { %4391 = vst [vmem:[#allocation12_spill] sm:$0xff] %v3729_v47  ;;  %vm1470_vm8 = vcmp.eq.f32.partialorder %v3598_v51, %v3729_v47  ;;  %v3734_v0 = vpop.xlane.xlu1 %1510  ;;  %v1562_v51 = vand.u32 65535, %v3631_v33  ;;  %v1522_v33 = vcvt.s32.f32 %v1520_v21  ;;  %v1821_v21 = vpack.c.bf16 %v2355_v2, %v2354_v17  ;;  %v4409_v17 = vld [vmem:[#allocation59_spill] sm:$0xff]  ;;  %v4420_v2 = vld [vmem:[#allocation33_spill] sm:$0xff]  ;;  %v4430_v47 = vld [vmem:[#allocation38_spill] sm:$0xff] }
 0x61c   :  { %4392 = vst [vmem:[#allocation13_spill] sm:$0xff] %v3734_v0  ;;  %vm1512_vm9 = vcmp.eq.f32.partialorder %v3605_v58, %v3734_v0  ;;  %v1471_v3 = vsel %vm1470_vm8, %v1466_v11, inf  ;;  %v1536_v58 = vcvt.s32.f32 %v1534_v15  ;;  %v2352_v11 = vld [vmem:[#allocation5 + $0x20] sm:$0xff]  ;;  %v2353_v15 = vld [vmem:[#allocation5 + $0x28] sm:$0xff]  ;;  %v1578_v50 = vcvt.s32.f32 %v1576_v60 }
 0x61d   :  { %1472 = vmin.xlane.f32.xlu0 %v1471_v3  ;;  %v1513_v10 = vsel %vm1512_vm9, %v1508_v49, inf  ;;  %v4427_v0 = vld [vmem:[#allocation68_spill] sm:$0xff] }
 0x61e   :  { %v3739_v52 = vpop.xlane.xlu0 %1496  ;;  %1514 = vmin.xlane.f32.xlu1 %v1513_v10 }
 0x61f   :  { %4393 = vst [vmem:[#allocation14_spill] sm:$0xff] %v3739_v52  ;;  %vm1498_vm10 = vcmp.eq.f32.partialorder %v3620_v13, %v3739_v52  ;;  %v3744_v44 = vpop.xlane.xlu1 %1538  ;;  %v1823_v13 = vpack.c.bf16 %v2351_v31, %v2350_v62  ;;  %v4426_v52 = vld [vmem:[#allocation36_spill] sm:$0xff] }
 0x620   :  { %4394 = vst [vmem:[#allocation15_spill] sm:$0xff] %v3744_v44  ;;  %vm1540_vm11 = vcmp.eq.f32.partialorder %v3627_v61, %v3744_v44  ;;  %v1499_v12 = vsel %vm1498_vm10, %v1494_v57, inf  ;;  %v1564_v61 = vcvt.s32.f32 %v1562_v51  ;;  %v2357_v57 = vld [vmem:[#allocation5 + $0x8] sm:$0xff]  ;;  %v4425_v44 = vld [vmem:[#allocation67_spill] sm:$0xff] }
 0x621   :  { %1500 = vmin.xlane.f32.xlu0 %v1499_v12  ;;  %v1541_v18 = vsel %vm1540_vm11, %v1536_v58, inf  ;;  %2120 = vmatprep.subr.bf16.mxu1 %v1823_v13 }
 0x622   :  { %v3749_v5 = vpop.xlane.xlu0 %1524  ;;  %1542 = vmin.xlane.f32.xlu1 %v1541_v18  ;;  %2121 = vmatpush3.bf16.msra.mxu1 %v1823_v13  ;;  %v4400_v13 = vld [vmem:[#allocation23_spill] sm:$0xff] }
 0x623   :  { %4395 = vst [vmem:[#allocation16_spill] sm:$0xff] %v3749_v5  ;;  %vm1526_vm12 = vcmp.eq.f32.partialorder %v3642_v14, %v3749_v5  ;;  %v3754_v42 = vpop.xlane.xlu1 %1566  ;;  %v1822_v14 = vpack.c.bf16 %v2353_v15, %v2352_v11  ;;  %v4405_v11 = vld [vmem:[#allocation57_spill] sm:$0xff]  ;;  %v4424_v5 = vld [vmem:[#allocation35_spill] sm:$0xff] }
 0x624   :  { %4396 = vst [vmem:[#allocation17_spill] sm:$0xff] %v3754_v42  ;;  %vm1568_vm13 = vcmp.eq.f32.partialorder %v3649_v36, %v3754_v42  ;;  %v1527_v59 = vsel %vm1526_vm12, %v1522_v33, inf  ;;  %v1592_v36 = vcvt.s32.f32 %v1590_v8  ;;  %v4401_v8 = vld [vmem:[#allocation55_spill] sm:$0xff] }
 0x625   :  { %1528 = vmin.xlane.f32.xlu0 %v1527_v59  ;;  %v1569_v38 = vsel %vm1568_vm13, %v1564_v61, inf  ;;  %2122 = vmatprep.subr.bf16.mxu1 %v1822_v14  ;;  %v1173_v61 = vsub.f32 %v4401_v8, %v4400_v13  ;;  %v4402_v59 = vld [vmem:[#allocation24_spill] sm:$0xff]  ;;  %v4416_v8 = vld [vmem:[#allocation31_spill] sm:$0xff] }
 0x626   :  { %v3759_v39 = vpop.xlane.xlu0 %1552  ;;  %1570 = vmin.xlane.f32.xlu1 %v1569_v38  ;;  %2123 = vmatpush3.bf16.msra.mxu1 %v1822_v14  ;;  %v4403_v38 = vld [vmem:[#allocation56_spill] sm:$0xff]  ;;  %v1652_v42 = vsub.f32 %v3507_v43, %v4402_v59 }
 0x627   :  { %4397 = vst [vmem:[#allocation18_spill] sm:$0xff] %v3759_v39  ;;  %vm1554_vm14 = vcmp.eq.f32.partialorder %v3662_v25, %v3759_v39  ;;  %v3763_v49 = vpop.xlane.xlu1 %1594  ;;  %2124 = vmatprep.subr.bf16.mxu1 %v1821_v21  ;;  %v1172_v60 = vsub.f32 %v4403_v38, %v4402_v59  ;;  %v4428_v38 = vld [vmem:[#allocation37_spill] sm:$0xff]  ;;  %v1665_v39 = vsub.f32 %v3618_v53, %v4424_v5 }
 0x628   :  { %4398 = vst [vmem:[#allocation19_spill] sm:$0xff] %v3763_v49  ;;  %vm1596_vm15 = vcmp.eq.f32.partialorder %v3667_v63, %v3763_v49  ;;  %v1555_v3 = vsel %vm1554_vm14, %v1550_v20, inf  ;;  %v2356_v63 = vld [vmem:[#allocation5] sm:$0xff]  ;;  %v4404_v20 = vld [vmem:[#allocation25_spill] sm:$0xff] }
 0x629   :  { %1556 = vmin.xlane.f32.xlu0 %v1555_v3  ;;  %v1597_v46 = vsel %vm1596_vm15, %v1592_v36, inf  ;;  %v1820_v51 = vpack.c.bf16 %v2357_v57, %v2356_v63  ;;  %v1175_v15 = vsub.f32 %v4405_v11, %v4404_v20  ;;  %v4406_v36 = vld [vmem:[#allocation26_spill] sm:$0xff]  ;;  %v4421_v49 = vld [vmem:[#allocation65_spill] sm:$0xff] }
 0x62a   :  { %v3767_v10 = vpop.xlane.xlu0 %1580  ;;  %1598 = vmin.xlane.f32.xlu1 %v1597_v46  ;;  %2125 = vmatpush3.bf16.msra.mxu1 %v1821_v21  ;;  %v4407_v3 = vld [vmem:[#allocation58_spill] sm:$0xff]  ;;  %v4410_v21 = vld [vmem:[#allocation28_spill] sm:$0xff] }
 0x62b   :  { %4399 = vst [vmem:[#allocation20_spill] sm:$0xff] %v3767_v10  ;;  %vm1582_vm0 = vcmp.eq.f32.partialorder %v3672_v23, %v3767_v10  ;;  %2126 = vmatprep.subr.bf16.mxu1 %v1820_v51  ;;  %v391_v58 = vpop.xlane.xlu1 %390  ;;  %v1174_v46 = vsub.f32 %v4407_v3, %v4406_v36  ;;  %v4422_v63 = vld [vmem:[#allocation34_spill] sm:$0xff] }
 0x62c   :  { %v1583_v25 = vsel %vm1582_vm0, %v1578_v50, inf  ;;  %2214 = vrcp.f32 %v391_v58  ;;  %v4408_v50 = vld [vmem:[#allocation27_spill] sm:$0xff]  ;;  %v4429_v58 = vld [vmem:[#allocation69_spill] sm:$0xff] }
 0x62d   :  { %1584 = vmin.xlane.f32.xlu0 %v1583_v25  ;;  %v4411_v25 = vld [vmem:[#allocation60_spill] sm:$0xff] }
 0x62e   :  { %2127 = vmatpush3.bf16.msra.mxu1 %v1820_v51  ;;  %v389_v12 = vpop.xlane.xlu0 %388  ;;  %v4412_v51 = vld [vmem:[#allocation29_spill] sm:$0xff] }
 0x62f   :  { %v395_v18 = vpop.xlane.xlu1 %394  ;;  %2216 = vrcp.f32 %v389_v12  ;;  %v1655_v12 = vsub.f32 %v3511_v45, %v4404_v20  ;;  %v1659_v43 = vsub.f32 %v3552_v6, %v4412_v51 }
 0x630   :  { %2218 = vrcp.f32 %v395_v18  ;;  %v4414_v18 = vld [vmem:[#allocation30_spill] sm:$0xff] }
 0x631   :  { %v1658_v45 = vsub.f32 %v3569_v26, %v4414_v18 }
 0x632   :  { %v393_v1 = vpop.xlane.xlu0 %392 }
 0x633   :  { %v399_v33 = vpop.xlane.xlu1 %398  ;;  %2220 = vrcp.f32 %v393_v1  ;;  %v4431_v1 = vld [vmem:[#allocation70_spill] sm:$0xff] }
 0x634   :  { %2222 = vrcp.f32 %v399_v33  ;;  %v1653_v33 = vsub.f32 %v3499_v35, %v4400_v13  ;;  %v1654_v35 = vsub.f32 %v3525_v9, %v4406_v36  ;;  %v1661_v9 = vsub.f32 %v3574_v56, %v4416_v8 }
 0x635   :  { %v1419_v36 = vcvt.f32.s32 %v3709_v24 }
 0x636   :  { %v397_v62 = vpop.xlane.xlu0 %396 }
 0x637   :  { %v403_v31 = vpop.xlane.xlu1 %402  ;;  %2224 = vrcp.f32 %v397_v62 }
 0x639   :  { %v2215_v14 = vpop.eup %2214 }
 0x63a   :  { %v401_v23 = vpop.xlane.xlu0 %400  ;;  %v1189_v48 = vmul.f32 %v2215_v14, %v1173_v61  ;;  %v1669_v62 = vmul.f32 %v2215_v14, %v1653_v33  ;;  %v1656_v61 = vsub.f32 %v3547_v54, %v4410_v21  ;;  %v1664_v54 = vsub.f32 %v3635_v55, %v4426_v52 }
 0x63b   :  { %v407_v57 = vpop.xlane.xlu1 %406  ;;  %2226 = vrcp.f32 %v401_v23  ;;  %v1657_v23 = vsub.f32 %v3530_v16, %v4408_v50 }
 0x63c   :  { %v2217_v10 = vpop.eup %2216  ;;  %2228 = vrcp.f32 %v403_v31  ;;  %v1206_v20 = vmul.f32 1.442695, %v1189_v48 }
 0x63d   :  { %v1188_v13 = vmul.f32 %v2217_v10, %v1172_v60  ;;  %2230 = vrcp.f32 %v407_v57  ;;  %v2219_v11 = vpop.eup %2218  ;;  %v1668_v59 = vmul.f32 %v2217_v10, %v1652_v42  ;;  %v1686_v42 = vmul.f32 1.442695, %v1669_v62 }
 0x63e   :  { %v405_v40 = vpop.xlane.xlu0 %404  ;;  %v1405_v10 = vcvt.f32.s32 %v3694_v34  ;;  %v1191_v33 = vmul.f32 %v2219_v11, %v1175_v15  ;;  %v1671_v48 = vmul.f32 %v2219_v11, %v1655_v12  ;;  %v1391_v15 = vcvt.f32.s32 %v3699_v37 }
 0x63f   :  { %v411_v31 = vpop.xlane.xlu1 %410  ;;  %2232 = vrcp.f32 %v405_v40  ;;  %v1204_v57 = vmul.f32 1.442695, %v1188_v13  ;;  %v1684_v3 = vmul.f32 1.442695, %v1668_v59  ;;  %v1433_v11 = vcvt.f32.s32 %v3704_v7 }
 0x640   :  { %v2221_v16 = vpop.eup %2220  ;;  %2234 = vrcp.f32 %v411_v31  ;;  %v3837_v12 = vshll.u32 %v1405_v10, 16  ;;  %v1210_v31 = vmul.f32 1.442695, %v1191_v33  ;;  %v1461_v37 = vcvt.f32.s32 %v3714_v27 }
 0x641   :  { %v2223_v60 = vpop.eup %2222  ;;  %v1190_v40 = vmul.f32 %v2221_v16, %v1174_v46  ;;  %v1670_v62 = vmul.f32 %v2221_v16, %v1654_v35  ;;  %v1690_v46 = vmul.f32 1.442695, %v1671_v48  ;;  %v3845_v10 = vshll.u32 %v1391_v15, 16 }
 0x642   :  { %v409_v14 = vpop.xlane.xlu0 %408  ;;  %v1673_v16 = vmul.f32 %v2223_v60, %v1657_v23  ;;  %v3854_v23 = vshll.u32 %v1419_v36, 16  ;;  %v3856_v15 = vshll.u32 %v1461_v37, 16 }
 0x643   :  { %2236 = vrcp.f32 %v409_v14  ;;  %v415_v13 = vpop.xlane.xlu1 %414  ;;  %v1208_v35 = vmul.f32 1.442695, %v1190_v40  ;;  %v1688_v7 = vmul.f32 1.442695, %v1670_v62 }
 0x644   :  { %2238 = vpow2.f32 %v1206_v20  ;;  %v2225_v59 = vpop.eup %2224  ;;  %v4432_v20 = vsub.f32 %v4409_v17, %v4408_v50  ;;  %v1447_v50 = vcvt.f32.s32 %v3719_v28  ;;  %v1489_v17 = vcvt.f32.s32 %v3724_v29 }
 0x645   :  { %2240 = vpow2.f32 %v1686_v42  ;;  %v1672_v48 = vmul.f32 %v2225_v59, %v1656_v61 }
 0x646   :  { %2242 = vpow2.f32 %v1204_v57  ;;  %v413_v14 = vpop.xlane.xlu0 %412  ;;  %v1193_v34 = vmul.f32 %v2223_v60, %v4432_v20  ;;  %v4433_v57 = vsub.f32 %v4411_v25, %v4410_v21  ;;  %v1694_v21 = vmul.f32 1.442695, %v1673_v16  ;;  %v4434_v25 = vld [vmem:[#allocation62_spill] sm:$0xff]  ;;  %v4441_v16 = vld [vmem:[#allocation13_spill] sm:$0xff] }
 0x647   :  { %2244 = vpow2.f32 %v1684_v3  ;;  %v3850_v3 = vshll.u32 %v1433_v11, 16  ;;  %v419_v40 = vpop.xlane.xlu1 %418  ;;  %v4435_v62 = vsub.f32 %v4434_v25, %v4414_v18  ;;  %v4436_v11 = vld [vmem:[#allocation12_spill] sm:$0xff]  ;;  %v3867_v61 = vshll.u32 %v1489_v17, 16 }
 0x648   :  { %2246 = vrcp.f32 %v415_v13  ;;  %v2227_v42 = vpop.eup %2226  ;;  %v1192_v33 = vmul.f32 %v2225_v59, %v4433_v57  ;;  %v1214_v60 = vmul.f32 1.442695, %v1193_v34  ;;  %v1475_v28 = vcvt.f32.s32 %v4436_v11  ;;  %v4439_v59 = vld [vmem:[#allocation63_spill] sm:$0xff] }
 0x649   :  { %2248 = vrcp.f32 %v413_v14  ;;  %v2229_v24 = vpop.eup %2228  ;;  %v1194_v13 = vmul.f32 %v2227_v42, %v4435_v62  ;;  %v3865_v34 = vshll.u32 %v1447_v50, 16  ;;  %v4440_v20 = vsub.f32 %v4439_v59, %v4416_v8  ;;  %v4442_v50 = vld [vmem:[#allocation14_spill] sm:$0xff]  ;;  %v4452_v8 = vld [vmem:[#allocation17_spill] sm:$0xff] }
 0x64a   :  { %2250 = vpow2.f32 %v1210_v31  ;;  %v2231_v27 = vpop.eup %2230  ;;  %v1212_v29 = vmul.f32 1.442695, %v1192_v33  ;;  %v4437_v31 = vld [vmem:[#allocation61_spill] sm:$0xff]  ;;  %v1517_v57 = vcvt.f32.s32 %v4441_v16  ;;  %v1675_v33 = vmul.f32 %v2229_v24, %v1659_v43  ;;  %v417_v25 = vpop.xlane.xlu0 %416 }
 0x64b   :  { %2252 = vpow2.f32 %v1690_v46  ;;  %v4438_v36 = vsub.f32 %v4437_v31, %v4412_v51  ;;  %v1197_v37 = vmul.f32 %v2231_v27, %v4440_v20  ;;  %v1503_v11 = vcvt.f32.s32 %v4442_v50  ;;  %v4449_v50 = vld [vmem:[#allocation16_spill] sm:$0xff] }
 0x64c   :  { %2254 = vpow2.f32 %v1208_v35  ;;  %v2233_v46 = vpop.eup %2232  ;;  %v1216_v17 = vmul.f32 1.442695, %v1194_v13  ;;  %v1674_v31 = vmul.f32 %v2227_v42, %v1658_v45  ;;  %v4446_v13 = vsub.f32 %v4421_v49, %v4420_v2 }
 0x64d   :  { %2256 = vpow2.f32 %v1688_v7  ;;  %v1195_v14 = vmul.f32 %v2229_v24, %v4438_v36  ;;  %v2235_v35 = vpop.eup %2234  ;;  %v1692_v7 = vmul.f32 1.442695, %v1672_v48  ;;  %v3882_v36 = vshll.u32 %v1475_v28, 16  ;;  %v4443_v48 = vld [vmem:[#allocation64_spill] sm:$0xff]  ;;  %v4445_v24 = vld [vmem:[#allocation15_spill] sm:$0xff]  ;;  %v4447_v28 = vld [vmem:[#allocation66_spill] sm:$0xff] }
 0x64e   :  { %2258 = vrcp.f32 %v419_v40  ;;  %v4444_v6 = vsub.f32 %v4443_v48, %v4418_v41  ;;  %v1545_v59 = vcvt.f32.s32 %v4445_v24  ;;  %v1199_v26 = vmul.f32 %v2235_v35, %v4446_v13 }
 0x64f   :  { %2260 = vpow2.f32 %v1214_v60  ;;  %v1218_v60 = vmul.f32 1.442695, %v1195_v14  ;;  %v3895_v45 = vshll.u32 %v1517_v57, 16  ;;  %v1698_v42 = vmul.f32 1.442695, %v1675_v33 }
 0x650   :  { %v2237_v62 = vpop.eup %2236  ;;  %2262 = vpow2.f32 %v1694_v21  ;;  %v1196_v51 = vmul.f32 %v2233_v46, %v4444_v6  ;;  %v1222_v21 = vmul.f32 1.442695, %v1197_v37  ;;  %v3902_v16 = vshll.u32 %v1503_v11, 16 }
 0x651   :  { %v3880_v40 = vpop.eup %2238  ;;  %2264 = vpow2.f32 %v1212_v29  ;;  %v4448_v29 = vsub.f32 %v4447_v28, %v4422_v63  ;;  %v1696_v37 = vmul.f32 1.442695, %v1674_v31  ;;  %v1677_v49 = vmul.f32 %v2231_v27, %v1661_v9 }
 0x652   :  { %v3887_v43 = vpop.eup %2240  ;;  %2266 = vrcp.f32 %v417_v25  ;;  %v1531_v57 = vcvt.f32.s32 %v4449_v50  ;;  %v4450_v33 = vsub.f32 %v3591_v4, %v4418_v41  ;;  %v3911_v24 = vshll.u32 %v1545_v59, 16  ;;  %v4454_v4 = vld [vmem:[#allocation18_spill] sm:$0xff] }
 0x653   :  { %v3893_v18 = vpop.eup %2242  ;;  %2268 = vpow2.f32 %v1692_v7  ;;  %v1198_v14 = vmul.f32 %v2237_v62, %v4448_v29  ;;  %v1220_v7 = vmul.f32 1.442695, %v1196_v51  ;;  %v1226_v11 = vmul.f32 1.442695, %v1199_v26 }
 0x654   :  { %v3900_v20 = vpop.eup %2244  ;;  %2270 = vpow2.f32 %v1216_v17  ;;  %v1676_v48 = vmul.f32 %v2233_v46, %v4450_v33  ;;  %v4451_v17 = vsub.f32 %v3596_v32, %v4420_v2  ;;  %v1573_v9 = vcvt.f32.s32 %v4452_v8 }
 0x655   :  { %v2247_v25 = vpop.eup %2246  ;;  %2272 = vpow2.f32 %v1218_v60  ;;  %v1224_v27 = vmul.f32 1.442695, %v1198_v14  ;;  %v4453_v60 = vsub.f32 %v3613_v22, %v4422_v63  ;;  %v1559_v46 = vcvt.f32.s32 %v4454_v4 }
 0x656   :  { %v2249_v6 = vpop.eup %2248  ;;  %2274 = vpow2.f32 %v1222_v21  ;;  %v1679_v31 = vmul.f32 %v2235_v35, %v4451_v17  ;;  %v1702_v59 = vmul.f32 1.442695, %v1677_v49  ;;  %v4455_v21 = vsub.f32 %v4425_v44, %v4424_v5 }
 0x657   :  { %v2251_v56 = vpop.eup %2250  ;;  %2276 = vpow2.f32 %v1698_v42  ;;  %v1678_v51 = vmul.f32 %v2237_v62, %v4453_v60  ;;  %v3926_v35 = vshll.u32 %v1531_v57, 16  ;;  %v1700_v13 = vmul.f32 1.442695, %v1676_v48  ;;  %v4457_v62 = vld [vmem:[#allocation19_spill] sm:$0xff]  ;;  %v4458_v48 = vld [vmem:[#allocation20_spill] sm:$0xff] }
 0x658   :  { %v3920_v41 = vpop.eup %2252  ;;  %2278 = vpow2.f32 %v1696_v37  ;;  %v1201_v32 = vmul.f32 %v2247_v25, %v4455_v21  ;;  %v4456_v26 = vsub.f32 %v4427_v0, %v4426_v52  ;;  %v1601_v42 = vcvt.f32.s32 %v4457_v62  ;;  %v4464_v62 = vld [vmem:[#allocation73_spill] sm:$0xff] }
 0x659   :  { %v2255_v2 = vpop.eup %2254  ;;  %2280 = vpow2.f32 %v1220_v7  ;;  %v1706_v28 = vmul.f32 1.442695, %v1679_v31  ;;  %v1236_v29 = vadd.f32 1.0, %v3893_v18  ;;  %v3935_v44 = vshll.u32 %v1573_v9, 16 }
 0x65a   :  { %v1200_v22 = vmul.f32 %v2249_v6, %v4456_v26  ;;  %v3931_v63 = vpop.eup %2256  ;;  %2282 = vpow2.f32 %v1226_v11  ;;  %v1704_v37 = vmul.f32 1.442695, %v1678_v51  ;;  %v1237_v49 = vadd.f32 1.0, %v3880_v40 }
 0x65b   :  { %v2259_v14 = vpop.eup %2258  ;;  %2284 = vpow2.f32 %v1224_v27  ;;  %v3938_v57 = vshll.u32 %v1559_v46, 16  ;;  %v1230_v0 = vmul.f32 1.442695, %v1201_v32  ;;  %v1238_v7 = vadd.f32 1.0, %v2255_v2 }
 0x65c   :  { %v2261_v50 = vpop.eup %2260  ;;  %2286 = vpow2.f32 %v1702_v59  ;;  %v1587_v11 = vcvt.f32.s32 %v4458_v48  ;;  %v1681_v17 = vmul.f32 %v2247_v25, %v1665_v39  ;;  %v1228_v31 = vmul.f32 1.442695, %v1200_v22  ;;  %v4460_v59 = vld [vmem:[#allocation71_spill] sm:$0xff]  ;;  %v4461_v25 = vld [vmem:[#allocation72_spill] sm:$0xff] }
 0x65d   :  { %v3940_v33 = vpop.eup %2262  ;;  %2288 = vpow2.f32 %v1700_v13  ;;  %v3946_v9 = vshll.u32 %v1601_v42, 16  ;;  %v4459_v27 = vsub.f32 %v4429_v58, %v4428_v38  ;;  %v1716_v51 = vadd.f32 %v3900_v20, %v1236_v29  ;;  %v4465_v29 = vld [vmem:[#allocation39_spill] sm:$0xff] }
 0x65e   :  { %v2265_v8 = vpop.eup %2264  ;;  %2290 = vpow2.f32 %v1706_v28  ;;  %v1680_v46 = vmul.f32 %v2249_v6, %v1664_v54  ;;  %v1253_v53 = vmul.f32 %v3880_v40, %v4460_v59  ;;  %v1717_v5 = vadd.f32 %v3887_v43, %v1237_v49  ;;  %v4468_v59 = vld [vmem:[#allocation41_spill] sm:$0xff] }
 0x65f   :  { %v1203_v60 = vmul.f32 %v2259_v14, %v4459_v27  ;;  %v2267_v4 = vpop.eup %2266  ;;  %2292 = vpow2.f32 %v1704_v37  ;;  %v1252_v58 = vmul.f32 %v3893_v18, %v4461_v25  ;;  %v1239_v21 = vadd.f32 1.0, %v2251_v56 }
 0x660   :  { %v3958_v39 = vpop.eup %2268  ;;  %2294 = vpow2.f32 %v1230_v0  ;;  %v1718_v32 = vadd.f32 %v3931_v63, %v1238_v7  ;;  %v3963_v26 = vshll.u32 %v1587_v11, 16  ;;  %v1710_v22 = vmul.f32 1.442695, %v1681_v17  ;;  %v4466_v7 = vld [vmem:[#allocation40_spill] sm:$0xff] }
 0x661   :  { %v2271_v13 = vpop.eup %2270  ;;  %2296 = vpow2.f32 %v1228_v31  ;;  %v1240_v55 = vadd.f32 1.0, %v2265_v8  ;;  %v1234_v54 = vmul.f32 1.442695, %v1203_v60  ;;  %v4463_v40 = vsub.f32 %v4431_v1, %v4430_v47 }
 0x662   :  { %4462 = vst [vmem:[#allocation21_spill] sm:$0xff] %v3963_v26  ;;  %v2273_v52 = vpop.eup %2272  ;;  %2298 = vrcp.f32 %v1716_v51  ;;  %v1255_v42 = vmul.f32 %v2251_v56, %v4464_v62  ;;  %v1708_v18 = vmul.f32 1.442695, %v1680_v46  ;;  %v3970_v37 = vadd.f32 %v4465_v29, %v1253_v53  ;;  %v4467_v56 = vld [vmem:[#allocation74_spill] sm:$0xff] }
 0x663   :  { %v1202_v6 = vmul.f32 %v2267_v4, %v4463_v40  ;;  %v2275_v28 = vpop.eup %2274  ;;  %2300 = vrcp.f32 %v1717_v5  ;;  %v1241_v49 = vadd.f32 1.0, %v2261_v50  ;;  %v3975_v48 = vadd.f32 %v4466_v7, %v1252_v58 }
 0x664   :  { %v3972_v0 = vpop.eup %2276  ;;  %v1719_v11 = vadd.f32 %v3920_v41, %v1239_v21  ;;  %2302 = vrcp.f32 %v1718_v32  ;;  %v1242_v1 = vadd.f32 1.0, %v2271_v13  ;;  %v1254_v31 = vmul.f32 %v2255_v2, %v4467_v56  ;;  %v4470_v32 = vld [vmem:[#allocation75_spill] sm:$0xff] }
 0x665   :  { %v3978_v17 = vpop.eup %2278  ;;  %2304 = vpow2.f32 %v1710_v22  ;;  %v1720_v27 = vadd.f32 %v3958_v39, %v1240_v55  ;;  %v1243_v60 = vadd.f32 1.0, %v2273_v52  ;;  %v1232_v46 = vmul.f32 1.442695, %v1202_v6  ;;  %v4472_v6 = vld [vmem:[#allocation76_spill] sm:$0xff] }
 0x666   :  { %v2281_v51 = vpop.eup %2280  ;;  %2306 = vpow2.f32 %v1234_v54  ;;  %v3983_v53 = vadd.f32 %v4468_v59, %v1255_v42  ;;  %v1245_v5 = vadd.f32 1.0, %v2275_v28  ;;  %v4469_v58 = vsub.f32 %v3640_v30, %v4428_v38 }
 0x667   :  { %v2283_v25 = vpop.eup %2282  ;;  %2308 = vpow2.f32 %v1708_v18  ;;  %v1257_v22 = vmul.f32 %v2261_v50, %v4470_v32  ;;  %v1721_v2 = vadd.f32 %v3940_v33, %v1241_v49  ;;  %v4471_v55 = vsub.f32 %v3657_v19, %v4430_v47  ;;  %v4473_v18 = vld [vmem:[#allocation77_spill] sm:$0xff]  ;;  %v4474_v49 = vld [vmem:[#allocation42_spill] sm:$0xff]  ;;  %v4478_v32 = vld [vmem:[#allocation44_spill] sm:$0xff] }
 0x668   :  { %v1683_v21 = vmul.f32 %v2259_v14, %v4469_v58  ;;  %v2285_v40 = vpop.eup %2284  ;;  %2310 = vrcp.f32 %v1719_v11  ;;  %v1256_v62 = vmul.f32 %v2265_v8, %v4472_v6  ;;  %v1722_v42 = vadd.f32 %v3978_v17, %v1242_v1  ;;  %v4475_v11 = vld [vmem:[#allocation43_spill] sm:$0xff] }
 0x669   :  { %v1682_v54 = vmul.f32 %v2267_v4, %v4471_v55  ;;  %v3995_v29 = vpop.eup %2286  ;;  %2312 = vrcp.f32 %v1720_v27  ;;  %v1259_v30 = vmul.f32 %v2273_v52, %v4473_v18  ;;  %v1723_v38 = vadd.f32 %v3972_v0, %v1243_v60  ;;  %v4476_v60 = vld [vmem:[#allocation78_spill] sm:$0xff]  ;;  %v4479_v55 = vld [vmem:[#allocation45_spill] sm:$0xff]  ;;  %v4480_v18 = vld [vmem:[#allocation80_spill] sm:$0xff] }
 0x66a   :  { %v1244_v14 = vadd.f32 1.0, %v2281_v51  ;;  %v3999_v50 = vpop.eup %2288  ;;  %2314 = vpow2.f32 %v1232_v46  ;;  %v4002_v7 = vadd.f32 %v4474_v49, %v1254_v31  ;;  %v1725_v19 = vadd.f32 %v3995_v29, %v1245_v5  ;;  %v4477_v46 = vld [vmem:[#allocation79_spill] sm:$0xff] }
 0x66b   :  { %v1247_v47 = vadd.f32 1.0, %v2283_v25  ;;  %v4005_v8 = vpop.eup %2290  ;;  %v1714_v4 = vmul.f32 1.442695, %v1683_v21  ;;  %v4008_v1 = vadd.f32 %v4475_v11, %v1257_v22  ;;  %2316 = vrcp.f32 %v1721_v2  ;;  %v4482_v11 = vld [vmem:[#allocation82_spill] sm:$0xff] }
 0x66c   :  { %v1246_v52 = vadd.f32 1.0, %v2285_v40  ;;  %v4010_v56 = vpop.eup %2292  ;;  %v1712_v27 = vmul.f32 1.442695, %v1682_v54  ;;  %v1258_v59 = vmul.f32 %v2271_v13, %v4476_v60  ;;  %2318 = vrcp.f32 %v1722_v42  ;;  %v4481_v54 = vld [vmem:[#allocation81_spill] sm:$0xff] }
 0x66d   :  { %v1261_v31 = vmul.f32 %v2275_v28, %v4477_v46  ;;  %v2295_v58 = vpop.eup %2294  ;;  %v4015_v5 = vadd.f32 %v4478_v32, %v1256_v62  ;;  %v4018_v6 = vadd.f32 %v4479_v55, %v1259_v30  ;;  %2320 = vrcp.f32 %v1723_v38  ;;  %v4484_v32 = vld [vmem:[#allocation47_spill] sm:$0xff] }
 0x66e   :  { %v1724_v21 = vadd.f32 %v3999_v50, %v1244_v14  ;;  %v2297_v22 = vpop.eup %2296  ;;  %v1260_v49 = vmul.f32 %v2281_v51, %v4480_v18  ;;  %2322 = vrcp.f32 %v1725_v19  ;;  %v1263_v13 = vmul.f32 %v2283_v25, %v4481_v54  ;;  %v4483_v14 = vld [vmem:[#allocation46_spill] sm:$0xff]  ;;  %v4486_v54 = vld [vmem:[#allocation48_spill] sm:$0xff] }
 0x66f   :  { %v1727_v42 = vadd.f32 %v4005_v8, %v1247_v47  ;;  %v4024_v28 = vpop.eup %2298  ;;  %2324 = vpow2.f32 %v1714_v4  ;;  %v1262_v60 = vmul.f32 %v2285_v40, %v4482_v11  ;;  %v1726_v30 = vadd.f32 %v4010_v56, %v1246_v52  ;;  %v4487_v11 = vld [vmem:[#allocation49_spill] sm:$0xff] }
 0x670   :  { %v2301_v38 = vpop.eup %2300  ;;  %2326 = vpow2.f32 %v1712_v27  ;;  %v4029_v46 = vadd.f32 %v4483_v14, %v1258_v59  ;;  %v4032_v51 = vadd.f32 %v4484_v32, %v1261_v31  ;;  %v1249_v19 = vadd.f32 1.0, %v2295_v58  ;;  %v4488_v32 = vld [vmem:[#allocation11_spill] sm:$0xff] }
 0x671   :  { %v4034_v25 = vpop.eup %2302  ;;  %2328 = vrcp.f32 %v1724_v21  ;;  %v1248_v4 = vadd.f32 1.0, %v2297_v22  ;;  %v4041_v59 = vadd.f32 %v4486_v54, %v1260_v49  ;;  %v4044_v31 = vadd.f32 %v4487_v11, %v1263_v13  ;;  %v4492_v49 = vld [vmem:[#allocation84_spill] sm:$0xff] }
 0x672   :  { %v4038_v18 = vpop.eup %2304  ;;  %2330 = vrcp.f32 %v1727_v42  ;;  %v4055_v54 = vmul.f32 %v2297_v22, %v4492_v49 }
 0x673   :  { %v2307_v14 = vpop.eup %2306  ;;  %2332 = vrcp.f32 %v1726_v30  ;;  %v1729_v13 = vadd.f32 %v4038_v18, %v1249_v19 }
 0x674   :  { %4493 = vst [vmem:[#allocation23_spill] sm:$0xff] %v4055_v54  ;;  %v1251_v19 = vadd.f32 1.0, %v2307_v14 }
 0x675   :  { %2334 = vrcp.f32 %v1729_v13 }
 0x697   :  { %v1403_v2 = vpop.xlane.xlu1 %1402 }
 0x698   :  { %v1404_v62 = vcvt.f32.s32 %v1403_v2  ;;  %v4485_v2 = vld [vmem:[#allocation83_spill] sm:$0xff] }
 0x699   :  { %v1265_v40 = vmul.f32 %v2295_v58, %v4485_v2  ;;  %v4050_v58 = vpop.eup %2308  ;;  %v4491_v2 = vmov 0.0  }
 0x69a   :  { %v1407_v47 = vadd.s32 %v3837_v12, %v1404_v62  ;;  %v1389_v55 = vpop.xlane.xlu0 %1388  ;;  %v4489_v62 = vld [vmem:[#allocation50_spill] sm:$0xff]  ;;  %v2311_v42 = vpop.eup %2310  ;;  %v1728_v30 = vadd.f32 %v4050_v58, %v1248_v4 }
 0x69b   :  { %v1390_v52 = vcvt.f32.s32 %v1389_v55  ;;  %v1431_v27 = vpop.xlane.xlu1 %1430  ;;  %v4048_v21 = vadd.f32 %v4489_v62, %v1262_v60  ;;  %v4494_v60 = vld [vmem:[#allocation51_spill] sm:$0xff] }
 0x69c   :  { %vm1605_vm1 = vcmp.eq.s32.totalorder %v4488_v32, %v1407_v47  ;;  %v1432_v12 = vcvt.f32.s32 %v1431_v27  ;;  %v4061_v62 = vadd.f32 %v4494_v60, %v1265_v40  ;;  %2336 = vrcp.f32 %v1728_v30 }
 0x69d   :  { %4490 = vst [vmem:[#allocation22_spill] sm:$0xff] %v4048_v21  ;;  %v1993_v55 = vsel %vm1605_vm1, 1.0, %v4491_v2  ;;  %v1393_v26 = vadd.s32 %v3845_v10, %v1390_v52  ;;  %v4064_v21 = vpop.eup %2312  ;;  %v4495_v52 = vld [vmem:[#allocation85_spill] sm:$0xff] }
 0x69e   :  { %v1435_v11 = vadd.s32 %v3850_v3, %v1432_v12  ;;  %v1417_v47 = vpop.xlane.xlu0 %1416  ;;  %v1733_v27 = vmul.f32 %v3887_v43, %v1993_v55  ;;  %v4068_v49 = vmul.f32 %v2307_v14, %v4495_v52  ;;  %v4070_v54 = vpop.eup %2314 }
 0x69f   :  { %vm1604_vm2 = vcmp.eq.s32.totalorder %v4488_v32, %v1393_v26  ;;  %v1418_v10 = vcvt.f32.s32 %v1417_v47  ;;  %v1459_v22 = vpop.xlane.xlu1 %1458  ;;  %v2317_v4 = vpop.eup %2316 }
 0x6a0   :  { %4496 = vst [vmem:[#allocation55_spill] sm:$0xff] %v4068_v49  ;;  %v1992_v3 = vsel %vm1604_vm2, 1.0, %v4491_v2  ;;  %vm1607_vm3 = vcmp.eq.s32.totalorder %v4488_v32, %v1435_v11  ;;  %v1460_v43 = vcvt.f32.s32 %v1459_v22  ;;  %v1749_v40 = vadd.f32 %v1733_v27, %v3970_v37  ;;  %v4078_v47 = vpop.eup %2318 }
 0x6a1   :  { %v1995_v12 = vsel %vm1607_vm3, 1.0, %v4491_v2  ;;  %v1421_v26 = vadd.s32 %v3854_v23, %v1418_v10  ;;  %v1732_v55 = vmul.f32 %v3900_v20, %v1992_v3  ;;  %v2321_v11 = vpop.eup %2320  ;;  %v1250_v23 = vadd.f32 1.0, %v4070_v54 }
 0x6a2   :  { %v1735_v14 = vmul.f32 %v3920_v41, %v1995_v12  ;;  %v1463_v60 = vadd.s32 %v3856_v15, %v1460_v43  ;;  %v1445_v52 = vpop.xlane.xlu0 %1444  ;;  %v1797_v49 = vmul.f32 %v2301_v38, %v1749_v40  ;;  %v4085_v20 = vpop.eup %2322 }
 0x6a3   :  { %vm1606_vm4 = vcmp.eq.s32.totalorder %v4488_v32, %v1421_v26  ;;  %v1446_v37 = vcvt.f32.s32 %v1445_v52  ;;  %v1487_v27 = vpop.xlane.xlu1 %1486  ;;  %v1748_v22 = vadd.f32 %v1732_v55, %v3975_v48  ;;  %v4090_v38 = vpop.eup %2324 }
 0x6a4   :  { %v1994_v13 = vsel %vm1606_vm4, 1.0, %v4491_v2  ;;  %vm1609_vm5 = vcmp.eq.s32.totalorder %v4488_v32, %v1463_v60  ;;  %v1488_v41 = vcvt.f32.s32 %v1487_v27  ;;  %v1751_v15 = vadd.f32 %v1735_v14, %v3983_v53  ;;  %v4096_v43 = vpop.eup %2326 }
 0x6a5   :  { %v1734_v30 = vmul.f32 %v3931_v63, %v1994_v13  ;;  %v1997_v10 = vsel %vm1609_vm5, 1.0, %v4491_v2  ;;  %v1449_v3 = vadd.s32 %v3865_v34, %v1446_v37  ;;  %v1796_v48 = vmul.f32 %v4024_v28, %v1748_v22  ;;  %v4101_v14 = vpop.eup %2328 }
 0x6a6   :  { %v1737_v40 = vmul.f32 %v3940_v33, %v1997_v10  ;;  %v1491_v12 = vadd.s32 %v3867_v61, %v1488_v41  ;;  %v1473_v26 = vpop.xlane.xlu0 %1472  ;;  %v1799_v55 = vmul.f32 %v2311_v42, %v1751_v15  ;;  %v1731_v53 = vadd.f32 %v4090_v38, %v1251_v19  ;;  %v4105_v28 = vpop.eup %2330 }
 0x6a7   :  { %vm1608_vm6 = vcmp.eq.s32.totalorder %v4488_v32, %v1449_v3  ;;  %v1474_v63 = vcvt.f32.s32 %v1473_v26  ;;  %v1515_v60 = vpop.xlane.xlu1 %1514  ;;  %v1812_v52 = vpack.c.bf16 %v1797_v49, %v1796_v48  ;;  %v1750_v34 = vadd.f32 %v1734_v30, %v4002_v7  ;;  %v4110_v42 = vpop.eup %2332 }
 0x6a8   :  { %v1996_v37 = vsel %vm1608_vm6, 1.0, %v4491_v2  ;;  %vm1611_vm7 = vcmp.eq.s32.totalorder %v4488_v32, %v1491_v12  ;;  %v1516_v61 = vcvt.f32.s32 %v1515_v60  ;;  %v1753_v33 = vadd.f32 %v1737_v40, %v4008_v1  ;;  %v2335_v40 = vpop.eup %2334 }
 0x6a9   :  { %v1736_v19 = vmul.f32 %v3958_v39, %v1996_v37  ;;  %v1999_v27 = vsel %vm1611_vm7, 1.0, %v4491_v2  ;;  %v1477_v22 = vadd.s32 %v3882_v36, %v1474_v63  ;;  %2128 = vmatprep.mubr.bf16.mxu1 %v1812_v52  ;;  %v1798_v7 = vmul.f32 %v4034_v25, %v1750_v34  ;;  %v4130_v63 = vpop.eup %2336 }
 0x6aa   :  { %v1739_v49 = vmul.f32 %v3972_v0, %v1999_v27  ;;  %v1519_v13 = vadd.s32 %v3895_v45, %v1516_v61  ;;  %v1501_v41 = vpop.xlane.xlu0 %1500  ;;  %v1801_v15 = vmul.f32 %v2317_v4, %v1753_v33  ;;  %v1730_v30 = vadd.f32 %v4096_v43, %v1250_v23 }
 0x6ab   :  { %vm1610_vm8 = vcmp.eq.s32.totalorder %v4488_v32, %v1477_v22  ;;  %v1502_v1 = vcvt.f32.s32 %v1501_v41  ;;  %v1543_v10 = vpop.xlane.xlu1 %1542  ;;  %v1813_v39 = vpack.c.bf16 %v1799_v55, %v1798_v7  ;;  %v1752_v3 = vadd.f32 %v1736_v19, %v4015_v5 }
 0x6ac   :  { %v1998_v36 = vsel %vm1610_vm8, 1.0, %v4491_v2  ;;  %vm1613_vm9 = vcmp.eq.s32.totalorder %v4488_v32, %v1519_v13  ;;  %v1544_v25 = vcvt.f32.s32 %v1543_v10  ;;  %v1755_v0 = vadd.f32 %v1739_v49, %v4018_v6  ;;  %v4499_v10 = vld [vmem:[#allocation22_spill] sm:$0xff] }
 0x6ad   :  { %v1738_v45 = vmul.f32 %v3978_v17, %v1998_v36  ;;  %v2001_v4 = vsel %vm1613_vm9, 1.0, %v4491_v2  ;;  %v1505_v23 = vadd.s32 %v3902_v16, %v1502_v1  ;;  %2129 = vmatmul.mubr.bf16.vlgmr.msra.gmra.mxu1 %v1813_v39  ;;  %v1800_v48 = vmul.f32 %v4064_v21, %v1752_v3  ;;  %v4501_v36 = vld [vmem:[#allocation21_spill] sm:$0xff] }
 0x6ae   :  { %v1741_v12 = vmul.f32 %v3995_v29, %v2001_v4  ;;  %v1547_v5 = vadd.s32 %v3911_v24, %v1544_v25  ;;  %v1529_v26 = vpop.xlane.xlu0 %1528  ;;  %v1803_v55 = vmul.f32 %v2321_v11, %v1755_v0  ;;  %2338 = vrcp.f32 %v1731_v53 }
 0x6af   :  { %vm1612_vm10 = vcmp.eq.s32.totalorder %v4488_v32, %v1505_v23  ;;  %v1530_v17 = vcvt.f32.s32 %v1529_v26  ;;  %v1571_v6 = vpop.xlane.xlu1 %1570  ;;  %v1814_v60 = vpack.c.bf16 %v1801_v15, %v1800_v48  ;;  %v1754_v16 = vadd.f32 %v1738_v45, %v4029_v46  ;;  %v4497_v15 = vld [vmem:[#allocation23_spill] sm:$0xff] }
 0x6b0   :  { %v2000_v52 = vsel %vm1612_vm10, 1.0, %v4491_v2  ;;  %vm1615_vm11 = vcmp.eq.s32.totalorder %v4488_v32, %v1547_v5  ;;  %v1572_v21 = vcvt.f32.s32 %v1571_v6  ;;  %v1757_v29 = vadd.f32 %v1741_v12, %v4032_v51  ;;  %v4502_v48 = vld [vmem:[#allocation55_spill] sm:$0xff]  ;;  %v4503_v12 = vld [vmem:[#allocation53_spill] sm:$0xff] }
 0x6b1   :  { %v1740_v24 = vmul.f32 %v3999_v50, %v2000_v52  ;;  %v2003_v11 = vsel %vm1615_vm11, 1.0, %v4491_v2  ;;  %v1533_v53 = vadd.s32 %v3926_v35, %v1530_v17  ;;  %2132 = vmatprep.mubr.bf16.mxu1 %v1814_v60  ;;  %v1802_v34 = vmul.f32 %v4078_v47, %v1754_v16 }
 0x6b2   :  { %v1743_v37 = vmul.f32 %v4005_v8, %v2003_v11  ;;  %v1575_v46 = vadd.s32 %v3935_v44, %v1572_v21  ;;  %v1557_v61 = vpop.xlane.xlu0 %1556  ;;  %v1805_v33 = vmul.f32 %v4085_v20, %v1757_v29  ;;  %2340 = vrcp.f32 %v1730_v30  ;;  %v4498_v30 = vld [vmem:[#allocation52_spill] sm:$0xff] }
 0x6b3   :  { %vm1614_vm12 = vcmp.eq.s32.totalorder %v4488_v32, %v1533_v53  ;;  %v1558_v51 = vcvt.f32.s32 %v1557_v61  ;;  %v1599_v19 = vpop.xlane.xlu1 %1598  ;;  %v1815_v50 = vpack.c.bf16 %v1803_v55, %v1802_v34  ;;  %v1756_v27 = vadd.f32 %v1740_v24, %v4041_v59  ;;  %v4504_v55 = vld [vmem:[#allocation54_spill] sm:$0xff] }
 0x6b4   :  { %v2002_v35 = vsel %vm1614_vm12, 1.0, %v4491_v2  ;;  %vm1617_vm13 = vcmp.eq.s32.totalorder %v4488_v32, %v1575_v46  ;;  %v1600_v47 = vcvt.f32.s32 %v1599_v19  ;;  %v1759_v8 = vadd.f32 %v1743_v37, %v4044_v31 }
 0x6b5   :  { %v1742_v44 = vmul.f32 %v4010_v56, %v2002_v35  ;;  %v2005_v22 = vsel %vm1617_vm13, 1.0, %v4491_v2  ;;  %v1561_v20 = vadd.s32 %v3938_v57, %v1558_v51  ;;  %2133 = vmatmul.mubr.bf16.gmra.mxu1 %v1815_v50  ;;  %v1804_v7 = vmul.f32 %v4101_v14, %v1756_v27  ;;  %v4500_v14 = vld [vmem:[#allocation86_spill] sm:$0xff] }
 0x6b6   :  { %v1745_v49 = vmul.f32 %v4038_v18, %v2005_v22  ;;  %v1603_v59 = vadd.s32 %v3946_v9, %v1600_v47  ;;  %v1585_v13 = vpop.xlane.xlu0 %1584  ;;  %v1807_v41 = vmul.f32 %v4105_v28, %v1759_v8  ;;  %v1280_v1 = vadd.f32 %v4498_v30, %v4497_v15 }
 0x6b7   :  { %vm1616_vm14 = vcmp.eq.s32.totalorder %v4488_v32, %v1561_v20  ;;  %v1586_v56 = vcvt.f32.s32 %v1585_v13  ;;  %v1816_v31 = vpack.c.bf16 %v1805_v33, %v1804_v7  ;;  %v1758_v39 = vadd.f32 %v1742_v44, %v4499_v10 }
 0x6b8   :  { %v2004_v57 = vsel %vm1616_vm14, 1.0, %v4491_v2  ;;  %vm1619_vm15 = vcmp.eq.s32.totalorder %v4488_v32, %v1603_v59  ;;  %v1266_v18 = vmul.f32 %v4070_v54, %v4500_v14  ;;  %v1761_v9 = vadd.f32 %v1745_v49, %v4061_v62 }
 0x6b9   :  { %v1744_v28 = vmul.f32 %v4050_v58, %v2004_v57  ;;  %v2007_v3 = vsel %vm1619_vm15, 1.0, %v4491_v2  ;;  %v1589_v25 = vadd.s32 %v4501_v36, %v1586_v56  ;;  %2136 = vmatprep.mubr.bf16.mxu1 %v1816_v31  ;;  %v1806_v0 = vmul.f32 %v4110_v42, %v1758_v39 }
 0x6ba   :  { %v1747_v45 = vmul.f32 %v4090_v38, %v2007_v3  ;;  %v1809_v4 = vmul.f32 %v2335_v40, %v1761_v9  ;;  %v1283_v5 = vadd.f32 %v4503_v12, %v4502_v48  ;;  %v1282_v17 = vadd.f32 %v4504_v55, %v1266_v18 }
 0x6bb   :  { %v2339_v23 = vpop.eup %2338  ;;  %vm1618_vm0 = vcmp.eq.s32.totalorder %v4488_v32, %v1589_v25  ;;  %v1817_v54 = vpack.c.bf16 %v1807_v41, %v1806_v0  ;;  %v1760_v62 = vadd.f32 %v1744_v28, %v1280_v1 }
 0x6bc   :  { %v2006_v58 = vsel %vm1618_vm0, 1.0, %v4491_v2  ;;  %v1763_v26 = vadd.f32 %v1747_v45, %v1283_v5 }
 0x6bd   :  { %v1746_v6 = vmul.f32 %v4096_v43, %v2006_v58  ;;  %2137 = vmatmul.mubr.bf16.gmra.mxu1 %v1817_v54  ;;  %v1808_v42 = vmul.f32 %v4130_v63, %v1760_v62 }
 0x6be   :  { %v1811_v52 = vmul.f32 %v2339_v23, %v1763_v26 }
 0x6bf   :  { %v2341_v38 = vpop.eup %2340  ;;  %v1762_v40 = vadd.f32 %v1746_v6, %v1282_v17  ;;  %v1818_v60 = vpack.c.bf16 %v1809_v4, %v1808_v42 }
 0x6c1   :  { %2140 = vmatprep.mubr.bf16.mxu1 %v1818_v60  ;;  %v1810_v16 = vmul.f32 %v2341_v38, %v1762_v40 }
 0x6c3   :  { %v1819_v21 = vpack.c.bf16 %v1811_v52, %v1810_v16 }
 0x6c5   :  { %2141 = vmatmul.mubr.bf16.gmra.mxu1 %v1819_v21 }
 0x76d   :  { %v2130_v32 = vpop.f32.mrf.mxu1 }
 0x76e   :  { %1927 = vst [vmem:[#allocation7 + $0x10] sm:$0xff] %v2130_v32 }
 0x76f   :  { %v1862_v29 = vpop.f32.mrf.mxu1 }
 0x770   :  { %1925 = vst [vmem:[#allocation7] sm:$0xff] %v1862_v29 }
 0x771   :  { %v2131_v2 = vpop.f32.mrf.mxu1 }
 0x772   :  { %1928 = vst [vmem:[#allocation7 + $0x18] sm:$0xff] %v2131_v2 }
 0x773   :  { %v1865_v24 = vpop.f32.mrf.mxu1 }
 0x774   :  { %1926 = vst [vmem:[#allocation7 + $0x8] sm:$0xff] %v1865_v24 }
 0x775   :  { %v2134_v43 = vpop.f32.mrf.mxu1 }
 0x776   :  { %1931 = vst [vmem:[#allocation7 + $0x30] sm:$0xff] %v2134_v43 }
 0x777   :  { %v1878_v11 = vpop.f32.mrf.mxu1 }
 0x778   :  { %1929 = vst [vmem:[#allocation7 + $0x20] sm:$0xff] %v1878_v11 }
 0x779   :  { %v2135_v63 = vpop.f32.mrf.mxu1 }
 0x77a   :  { %1932 = vst [vmem:[#allocation7 + $0x38] sm:$0xff] %v2135_v63 }
 0x77b   :  { %v1881_v53 = vpop.f32.mrf.mxu1 }
 0x77c   :  { %1930 = vst [vmem:[#allocation7 + $0x28] sm:$0xff] %v1881_v53 }
 0x77d   :  { %v2138_v34 = vpop.f32.mrf.mxu1 }
 0x77e   :  { %1935 = vst [vmem:[#allocation7 + $0x50] sm:$0xff] %v2138_v34 }
 0x77f   :  { %v1894_v37 = vpop.f32.mrf.mxu1 }
 0x780   :  { %1933 = vst [vmem:[#allocation7 + $0x40] sm:$0xff] %v1894_v37 }
 0x781   :  { %v2139_v46 = vpop.f32.mrf.mxu1 }
 0x782   :  { %1936 = vst [vmem:[#allocation7 + $0x58] sm:$0xff] %v2139_v46 }
 0x783   :  { %v1897_v61 = vpop.f32.mrf.mxu1 }
 0x784   :  { %1934 = vst [vmem:[#allocation7 + $0x48] sm:$0xff] %v1897_v61 }
 0x785   :  { %v2142_v33 = vpop.f32.mrf.mxu1 }
 0x786   :  { %1939 = vst [vmem:[#allocation7 + $0x70] sm:$0xff] %v2142_v33 }
 0x787   :  { %v1910_v51 = vpop.f32.mrf.mxu1 }
 0x788   :  { %1937 = vst [vmem:[#allocation7 + $0x60] sm:$0xff] %v1910_v51 }
 0x789   :  { %v2143_v19 = vpop.f32.mrf.mxu1 }
 0x78a   :  { %1940 = vst [vmem:[#allocation7 + $0x78] sm:$0xff] %v2143_v19 }
 0x78b   :  { %v1913_v50 = vpop.f32.mrf.mxu1 }
 0x78c   :  { %1938 = vst [vmem:[#allocation7 + $0x68] sm:$0xff] %v1913_v50 }
 0x78d   :  { %2409 = shalt.err (!%p2406_p0)
}
 0x78e   :  { %1952 = dma.vmem_to_hbm [thread:$0]  %s1947_s1, 2048, %s4185_s2, [#allocation4], %s2426_s18, %s2426_s18, %s2427_s19  }
 0x78f   :  { %2422 = dma.done.wait [#allocation4], 2048  }
 0x790   :  { %2423 = vsyncadd [#allocation4], 4294965248 }
 0x791   :  { %1956 = vsyncpa [#allocation3], 1 }
 0x792   :  { %1957 = vsyncpa [#allocation6], 1 }
 0x793   :  { %1958 = vsyncpa [#allocation4], 1 }

</bundles_post_ra>
